<compile_context>
chip_gen: v6e
topology: v6e:2x2x1
jax: 0.10.0
libtpu: 0.0.40
codegen_flags: <defaults>
</compile_context>

<pallas_src>
import jax
import jax.numpy as jnp
import numpy as np
from jax.experimental import pallas as pl
from jax.experimental.pallas import tpu as pltpu


def _round_up(x: int, m: int) -> int:
    return ((x + m - 1) // m) * m


def _mlp_kernel(x_ref, w1_ref, b1_ref, w2_ref, b2_ref, w3_ref, b3_ref,
                o_ref, acc_ref):
    """One (batch_tile, k_tile) grid step of the fused 3-layer MLP.

    x_ref:  (TB, TK)      bf16   activation K-slice
    w1_ref: (TK, H1)      bf16   layer-1 weight K-slice (streamed)
    b*_ref: (1, H*)       f32    biases (b3 padded to NC_pad)
    w2_ref: (H1, H2)      bf16   VMEM-resident
    w3_ref: (H2, NC_pad)  bf16   VMEM-resident (zero-padded cols)
    o_ref:  (TB, NC_pad)  f32    logits (padded, lane-dense)
    acc_ref:(TB, H1)      f32    layer-1 accumulator scratch
    """
    k = pl.program_id(1)

    @pl.when(k == 0)
    def _init():
        acc_ref[...] = jnp.zeros_like(acc_ref)

    # Layer 1 partial: accumulate this K-slice on the MXU in fp32.
    acc_ref[...] += jnp.dot(x_ref[...], w1_ref[...],
                            preferred_element_type=jnp.float32)

    @pl.when(k == pl.num_programs(1) - 1)
    def _finish():
        # Layer 1 bias + ReLU (fp32), back to bf16 for the next MXU matmul.
        h1 = jnp.maximum(acc_ref[...] + b1_ref[...], 0.0).astype(jnp.bfloat16)
        # Layer 2: Linear + ReLU.
        h2 = jnp.dot(h1, w2_ref[...], preferred_element_type=jnp.float32)
        h2 = jnp.maximum(h2 + b2_ref[...], 0.0).astype(jnp.bfloat16)
        # Layer 3: logits (lane-dense padded output, fp32).
        logits = jnp.dot(h2, w3_ref[...], preferred_element_type=jnp.float32)
        o_ref[...] = logits + b3_ref[...]


def classifier_forward(x, params):
    """x: [B, C, H, W] float32 (NCHW). Returns logits [B, num_classes] (f32)."""
    w1, b1, w2, b2, w3, b3 = params          # fp32, weights stored [in, out]
    B = x.shape[0]
    xf = x.reshape(B, -1)                    # == torch x.view(B, -1)
    D = xf.shape[1]
    H1 = w1.shape[1]
    H2 = w2.shape[1]
    NC = w3.shape[1]

    # ---- tiling / padding ------------------------------------------------
    TB = 128 if B >= 128 else _round_up(max(B, 1), 16)   # batch tile (bf16 sublanes)
    B_pad = _round_up(B, TB)
    # K tile over input_dim: large tile -> fewer grid steps, better HBM BW.
    TK = 2048 if D >= 2048 else _round_up(D, 128)
    D_pad = _round_up(D, TK)
    NC_pad = _round_up(NC, 128)                          # lane-dense logits

    # Cast / zero-pad inputs (skip the copy entirely when already aligned).
    x_bf = xf.astype(jnp.bfloat16)
    if B_pad != B or D_pad != D:
        x_bf = jnp.pad(x_bf, ((0, B_pad - B), (0, D_pad - D)))
    w1_bf = w1.astype(jnp.bfloat16)
    if D_pad != D:
        w1_bf = jnp.pad(w1_bf, ((0, D_pad - D), (0, 0)))
    w2_bf = w2.astype(jnp.bfloat16)
    w3_bf = w3.astype(jnp.bfloat16)
    b3_p = b3
    if NC_pad != NC:
        w3_bf = jnp.pad(w3_bf, ((0, 0), (0, NC_pad - NC)))
        b3_p = jnp.pad(b3, ((0, 0), (0, NC_pad - NC)))

    grid = (B_pad // TB, D_pad // TK)

    out = pl.pallas_call(
        _mlp_kernel,
        out_shape=jax.ShapeDtypeStruct((B_pad, NC_pad), jnp.float32),
        grid=grid,
        in_specs=[
            pl.BlockSpec((TB, TK), lambda b, k: (b, k)),       # x   (tiled B,K)
            pl.BlockSpec((TK, H1), lambda b, k: (k, 0)),       # w1  (tiled K, streamed)
            pl.BlockSpec((1, H1), lambda b, k: (0, 0)),        # b1  (resident)
            pl.BlockSpec((H1, H2), lambda b, k: (0, 0)),       # w2  (resident)
            pl.BlockSpec((1, H2), lambda b, k: (0, 0)),        # b2  (resident)
            pl.BlockSpec((H2, NC_pad), lambda b, k: (0, 0)),   # w3  (resident)
            pl.BlockSpec((1, NC_pad), lambda b, k: (0, 0)),    # b3  (resident)
        ],
        out_specs=pl.BlockSpec((TB, NC_pad), lambda b, k: (b, 0)),
        scratch_shapes=[pltpu.VMEM((TB, H1), jnp.float32)],
        compiler_params=pltpu.CompilerParams(
            dimension_semantics=("parallel", "arbitrary"),
            vmem_limit_bytes=32 << 20,
        ),
    )(x_bf, w1_bf, b1, w2_bf, b2, w3_bf, b3_p)

    return out[:B, :NC]


def init_params(key, input_dim, num_classes=10, h1=1024, h2=512):
    """Deterministic init mimicking nn.Linear's uniform(-1/sqrt(fan_in), +).

    Weights are stored as [in, out] (transposed vs. PyTorch's [out, in])."""
    ks = jax.random.split(key, 6)

    def lin(kw, kb, fan_in, fan_out):
        bound = 1.0 / np.sqrt(fan_in)
        w = jax.random.uniform(kw, (fan_in, fan_out), jnp.float32, -bound, bound)
        b = jax.random.uniform(kb, (1, fan_out), jnp.float32, -bound, bound)
        return w, b

    w1, b1 = lin(ks[0], ks[1], input_dim, h1)
    w2, b2 = lin(ks[2], ks[3], h1, h2)
    w3, b3 = lin(ks[4], ks[5], h2, num_classes)
    return (w1, b1, w2, b2, w3, b3)


def reference_forward(x, params):
    """Pure-JAX reference emulating the kernel's bf16-weight / fp32-accum math."""
    w1, b1, w2, b2, w3, b3 = params
    bf = lambda a: a.astype(jnp.bfloat16).astype(jnp.float32)
    xf = bf(x.reshape(x.shape[0], -1))
    h1 = jnp.maximum(xf @ bf(w1) + b1, 0.0)
    h2 = jnp.maximum(bf(h1) @ bf(w2) + b2, 0.0)
    return bf(h2) @ bf(w3) + b3


if __name__ == "__main__":
    key = jax.random.PRNGKey(0)
    k_x, k_p = jax.random.split(key)

    # Small image: B=2, C=4, H=W=16 -> input_dim = 4*16*16 = 1024
    B, C, H, W = 2, 4, 16, 16
    num_classes = 10
    x = jax.random.normal(k_x, (B, C, H, W), dtype=jnp.float32)

    params = init_params(k_p, input_dim=C * H * W, num_classes=num_classes)

    logits = classifier_forward(x, params)
    logits = jax.block_until_ready(logits)

    ref = reference_forward(x, params)
    assert logits.shape == (B, num_classes)
    np.testing.assert_allclose(np.asarray(logits), np.asarray(ref),
                               rtol=1e-2, atol=1e-2)

    print("KERNEL_OK")
</pallas_src>

<mosaic_0001>
module attributes {stable_mosaic.version = 11 : i64} {
  func.func @_mlp_kernel(%arg0: i32, %arg1: i32, %arg2: memref<16x1024xbf16, #tpu.memory_space<vmem>>, %arg3: memref<1024x1024xbf16, #tpu.memory_space<vmem>>, %arg4: memref<1x1024xf32, #tpu.memory_space<vmem>>, %arg5: memref<1024x512xbf16, #tpu.memory_space<vmem>>, %arg6: memref<1x512xf32, #tpu.memory_space<vmem>>, %arg7: memref<512x128xbf16, #tpu.memory_space<vmem>>, %arg8: memref<1x128xf32, #tpu.memory_space<vmem>>, %arg9: memref<16x128xf32, #tpu.memory_space<vmem>>, %arg10: memref<16x1024xf32, #tpu.memory_space<vmem>>) attributes {dimension_semantics = [#tpu.dimension_semantics<parallel>, #tpu.dimension_semantics<arbitrary>], iteration_bounds = array<i64: 1, 1>, scalar_prefetch = 0 : i64, scratch_operands = 1 : i64, tpu.core_type = #tpu.core_type<tc>, window_params = [{transform_indices = @transform_0, window_bounds = array<i64: 16, 1024>}, {transform_indices = @transform_1, window_bounds = array<i64: 1024, 1024>}, {pipeline_mode = #tpu.pipeline_mode<synchronous>, transform_indices = @transform_2, window_bounds = array<i64: 1, 1024>}, {pipeline_mode = #tpu.pipeline_mode<synchronous>, transform_indices = @transform_3, window_bounds = array<i64: 1024, 512>}, {pipeline_mode = #tpu.pipeline_mode<synchronous>, transform_indices = @transform_4, window_bounds = array<i64: 1, 512>}, {pipeline_mode = #tpu.pipeline_mode<synchronous>, transform_indices = @transform_5, window_bounds = array<i64: 512, 128>}, {pipeline_mode = #tpu.pipeline_mode<synchronous>, transform_indices = @transform_6, window_bounds = array<i64: 1, 128>}, {transform_indices = @transform_7, window_bounds = array<i64: 16, 128>}]} {
    %c0_i32 = arith.constant 0 : i32
    %0 = arith.cmpi eq, %arg1, %c0_i32 : i32
    %1 = arith.extui %0 : i1 to i32
    %c0_i32_0 = arith.constant 0 : i32
    %2 = arith.cmpi ne, %1, %c0_i32_0 : i32
    scf.if %2 {
      %cst_10 = arith.constant 0.000000e+00 : f32
      %12 = vector.broadcast %cst_10 : f32 to vector<16x1024xf32>
      %c0_11 = arith.constant 0 : index
      %c0_12 = arith.constant 0 : index
      %13 = vector.load %arg10[%c0_11, %c0_12] : memref<16x1024xf32, #tpu.memory_space<vmem>>, vector<16x1024xf32>
      tpu.vector_store %arg10[%c0_11, %c0_12], %12 {strides = array<i32>} : memref<16x1024xf32, #tpu.memory_space<vmem>>, vector<16x1024xf32>,
    } else {
    }
    %c0 = arith.constant 0 : index
    %c0_1 = arith.constant 0 : index
    %3 = vector.load %arg10[%c0, %c0_1] : memref<16x1024xf32, #tpu.memory_space<vmem>>, vector<16x1024xf32>
    %c0_2 = arith.constant 0 : index
    %c0_3 = arith.constant 0 : index
    %4 = vector.load %arg2[%c0_2, %c0_3] : memref<16x1024xbf16, #tpu.memory_space<vmem>>, vector<16x1024xbf16>
    %c0_4 = arith.constant 0 : index
    %c0_5 = arith.constant 0 : index
    %5 = vector.load %arg3[%c0_4, %c0_5] : memref<1024x1024xbf16, #tpu.memory_space<vmem>>, vector<1024x1024xbf16>
    %cst = arith.constant dense<0.000000e+00> : vector<16x1024xf32>
    %6 = tpu.matmul %4, %5, %cst {dimension_numbers = #tpu.dot_dimension_numbers<[1], [0], [0], [1], [0, 0, 1, 1], [], []>} : vector<16x1024xbf16>, vector<1024x1024xbf16>, vector<16x1024xf32> -> vector<16x1024xf32>
    %7 = arith.addf %3, %6 : vector<16x1024xf32>
    %c0_6 = arith.constant 0 : index
    %c0_7 = arith.constant 0 : index
    %8 = vector.load %arg10[%c0_6, %c0_7] : memref<16x1024xf32, #tpu.memory_space<vmem>>, vector<16x1024xf32>
    tpu.vector_store %arg10[%c0_6, %c0_7], %7 {strides = array<i32>} : memref<16x1024xf32, #tpu.memory_space<vmem>>, vector<16x1024xf32>,
    %c0_i32_8 = arith.constant 0 : i32
    %9 = arith.cmpi eq, %arg1, %c0_i32_8 : i32
    %10 = arith.extui %9 : i1 to i32
    %c0_i32_9 = arith.constant 0 : i32
    %11 = arith.cmpi ne, %10, %c0_i32_9 : i32
    scf.if %11 {
      %c0_10 = arith.constant 0 : index
      %c0_11 = arith.constant 0 : index
      %12 = vector.load %arg10[%c0_10, %c0_11] : memref<16x1024xf32, #tpu.memory_space<vmem>>, vector<16x1024xf32>
      %c0_12 = arith.constant 0 : index
      %c0_13 = arith.constant 0 : index
      %13 = vector.load %arg4[%c0_12, %c0_13] : memref<1x1024xf32, #tpu.memory_space<vmem>>, vector<1x1024xf32>
      %14 = vector.broadcast %13 : vector<1x1024xf32> to vector<16x1024xf32>
      %15 = arith.addf %12, %14 : vector<16x1024xf32>
      %cst_14 = arith.constant 0.000000e+00 : f32
      %16 = vector.broadcast %cst_14 : f32 to vector<16x1024xf32>
      %17 = arith.maximumf %15, %16 : vector<16x1024xf32>
      %18 = arith.truncf %17 : vector<16x1024xf32> to vector<16x1024xbf16>
      %c0_15 = arith.constant 0 : index
      %c0_16 = arith.constant 0 : index
      %19 = vector.load %arg5[%c0_15, %c0_16] : memref<1024x512xbf16, #tpu.memory_space<vmem>>, vector<1024x512xbf16>
      %cst_17 = arith.constant dense<0.000000e+00> : vector<16x512xf32>
      %20 = tpu.matmul %18, %19, %cst_17 {dimension_numbers = #tpu.dot_dimension_numbers<[1], [0], [0], [1], [0, 0, 1, 1], [], []>} : vector<16x1024xbf16>, vector<1024x512xbf16>, vector<16x512xf32> -> vector<16x512xf32>
      %c0_18 = arith.constant 0 : index
      %c0_19 = arith.constant 0 : index
      %21 = vector.load %arg6[%c0_18, %c0_19] : memref<1x512xf32, #tpu.memory_space<vmem>>, vector<1x512xf32>
      %22 = vector.broadcast %21 : vector<1x512xf32> to vector<16x512xf32>
      %23 = arith.addf %20, %22 : vector<16x512xf32>
      %cst_20 = arith.constant 0.000000e+00 : f32
      %24 = vector.broadcast %cst_20 : f32 to vector<16x512xf32>
      %25 = arith.maximumf %23, %24 : vector<16x512xf32>
      %26 = arith.truncf %25 : vector<16x512xf32> to vector<16x512xbf16>
      %c0_21 = arith.constant 0 : index
      %c0_22 = arith.constant 0 : index
      %27 = vector.load %arg7[%c0_21, %c0_22] : memref<512x128xbf16, #tpu.memory_space<vmem>>, vector<512x128xbf16>
      %cst_23 = arith.constant dense<0.000000e+00> : vector<16x128xf32>
      %28 = tpu.matmul %26, %27, %cst_23 {dimension_numbers = #tpu.dot_dimension_numbers<[1], [0], [0], [1], [0, 0, 1, 1], [], []>} : vector<16x512xbf16>, vector<512x128xbf16>, vector<16x128xf32> -> vector<16x128xf32>
      %c0_24 = arith.constant 0 : index
      %c0_25 = arith.constant 0 : index
      %29 = vector.load %arg8[%c0_24, %c0_25] : memref<1x128xf32, #tpu.memory_space<vmem>>, vector<1x128xf32>
      %30 = vector.broadcast %29 : vector<1x128xf32> to vector<16x128xf32>
      %31 = arith.addf %28, %30 : vector<16x128xf32>
      %c0_26 = arith.constant 0 : index
      %c0_27 = arith.constant 0 : index
      %32 = vector.load %arg9[%c0_26, %c0_27] : memref<16x128xf32, #tpu.memory_space<vmem>>, vector<16x128xf32>
      tpu.vector_store %arg9[%c0_26, %c0_27], %31 {strides = array<i32>} : memref<16x128xf32, #tpu.memory_space<vmem>>, vector<16x128xf32>,
    } else {
    }
    return
  }
  func.func @transform_0(%arg0: i32, %arg1: i32) -> (i32, i32) {
    %c0_i32 = arith.constant 0 : i32
    return %arg0, %arg1 : i32, i32
  }
  func.func @transform_1(%arg0: i32, %arg1: i32) -> (i32, i32) {
    %c0_i32 = arith.constant 0 : i32
    %c0_i32_0 = arith.constant 0 : i32
    return %arg1, %c0_i32 : i32, i32
  }
  func.func @transform_2(%arg0: i32, %arg1: i32) -> (i32, i32) {
    %c0_i32 = arith.constant 0 : i32
    %c0_i32_0 = arith.constant 0 : i32
    %c0_i32_1 = arith.constant 0 : i32
    return %c0_i32, %c0_i32_0 : i32, i32
  }
  func.func @transform_3(%arg0: i32, %arg1: i32) -> (i32, i32) {
    %c0_i32 = arith.constant 0 : i32
    %c0_i32_0 = arith.constant 0 : i32
    %c0_i32_1 = arith.constant 0 : i32
    return %c0_i32, %c0_i32_0 : i32, i32
  }
  func.func @transform_4(%arg0: i32, %arg1: i32) -> (i32, i32) {
    %c0_i32 = arith.constant 0 : i32
    %c0_i32_0 = arith.constant 0 : i32
    %c0_i32_1 = arith.constant 0 : i32
    return %c0_i32, %c0_i32_0 : i32, i32
  }
  func.func @transform_5(%arg0: i32, %arg1: i32) -> (i32, i32) {
    %c0_i32 = arith.constant 0 : i32
    %c0_i32_0 = arith.constant 0 : i32
    %c0_i32_1 = arith.constant 0 : i32
    return %c0_i32, %c0_i32_0 : i32, i32
  }
  func.func @transform_6(%arg0: i32, %arg1: i32) -> (i32, i32) {
    %c0_i32 = arith.constant 0 : i32
    %c0_i32_0 = arith.constant 0 : i32
    %c0_i32_1 = arith.constant 0 : i32
    return %c0_i32, %c0_i32_0 : i32, i32
  }
  func.func @transform_7(%arg0: i32, %arg1: i32) -> (i32, i32) {
    %c0_i32 = arith.constant 0 : i32
    %c0_i32_0 = arith.constant 0 : i32
    return %arg0, %c0_i32 : i32, i32
  }
}

</mosaic_0001>

<bundles_post_ra>
// kernel: tpu_custom_call.1
= control target key start
LH: loop header
LB: loop body
LE: loop exit
PB: predicated region body
PF: predicated region fallthrough
CT: control target
= control target key end

     0   :  { %12 = vsyncpa [#allocation4], 0  ;;  %s8145_s0 = inlined_call_operand.hbm [shape: bf16[16,1024], index: 0, kind: input, shape index: {}]   ;;  %s8146_s1 = inlined_call_operand.hbm [shape: bf16[1024,1024], index: 1, kind: input, shape index: {}]   ;;  %s8147_s2 = inlined_call_operand.hbm [shape: f32[1,1024], index: 2, kind: input, shape index: {}]   ;;  %s8148_s3 = inlined_call_operand.hbm [shape: bf16[1024,512], index: 3, kind: input, shape index: {}]   ;;  %s8149_s4 = inlined_call_operand.hbm [shape: f32[1,512], index: 4, kind: input, shape index: {}]   ;;  %s8150_s5 = inlined_call_operand.hbm [shape: bf16[512,128], index: 5, kind: input, shape index: {}]   ;;  %s8151_s6 = inlined_call_operand.hbm [shape: f32[1,128], index: 6, kind: input, shape index: {}]   ;;  %s8152_s7 = inlined_call_operand.hbm [shape: f32[16,128], index: 7, kind: output, shape index: {}]  }
   0x1   :  { %13 = vsyncpa [#allocation7], 0 }
   0x2   :  { %14 = vsyncpa [#allocation10], 0 }
   0x3   :  { %15 = vsyncpa [#allocation13], 0 }
   0x4   :  { %16 = vsyncpa [#allocation5], 0  ;;  %s7831_s24 = smov [#allocation6]   ;;  %s7832_s26 = smov [#allocation9]  }
   0x5   :  { %s34_s25 = sshll.u32 %s7831_s24, 4  ;;  %s56_s27 = sshll.u32 %s7832_s26, 4  ;;  %s35_s25 = int_to_ptr.vmem [resolvable:$true] %s34_s25  ;;  %s57_s27 = int_to_ptr.vmem [resolvable:$true] %s56_s27 }
   0x6   :  { %s7669_s28 = scalar_lea.vmem %s35_s25, 65536  ;;  %p7674_p1 = scmp.lt.s32.totalorder %s35_s25, %s35_s25 }
   0x7   :  { %p7670_p0 = scmp.ne.s32.totalorder %s35_s25, %s7669_s28  ;;  %p7675_p2 = scmp.lt.s32.totalorder %s7669_s28, %s7669_s28 }
   0x9   :  { %p7676_p3 = por %p7675_p2, %p7674_p1 }
   0xb   :  { %p7677_p4 = pnand %p7676_p3, %p7670_p0 }
   0xd   :  { %7680 = shalt.err (!%p7677_p4)
}
   0xe   :  { %s7833_s29 = smov 512   ;;  %s7834_s30 = smov 32  }
   0xf   :  { %40 = dma.hbm_to_vmem [thread:$0]  %s8146_s1, 65536, %s35_s25, [#allocation7], %s7833_s29, %s7833_s29, %s7834_s30  }
  0x10   :  { %s7689_s10 = scalar_lea.vmem %s57_s27, 32768  ;;  %p7694_p6 = scmp.lt.s32.totalorder %s57_s27, %s57_s27 }
  0x11   :  { %p7690_p5 = scmp.ne.s32.totalorder %s57_s27, %s7689_s10  ;;  %p7695_p7 = scmp.lt.s32.totalorder %s7689_s10, %s7689_s10 }
  0x13   :  { %p7696_p8 = por %p7695_p7, %p7694_p6 }
  0x15   :  { %p7697_p9 = pnand %p7696_p8, %p7690_p5 }
  0x17   :  { %7700 = shalt.err (!%p7697_p9)
}
  0x18   :  { %s7835_s11 = smov 256   ;;  %s7836_s12 = smov 16  }
  0x19   :  { %62 = dma.hbm_to_vmem [thread:$0]  %s8148_s3, 32768, %s57_s27, [#allocation10], %s7835_s11, %s7835_s11, %s7836_s12  }
  0x1a   :  { %s7837_s15 = smov [#allocation12]  }
  0x1b   :  { %s78_s16 = sshll.u32 %s7837_s15, 4  ;;  %s79_s16 = int_to_ptr.vmem [resolvable:$true] %s78_s16 }
  0x1c   :  { %s7709_s17 = scalar_lea.vmem %s79_s16, 4096  ;;  %p7714_p11 = scmp.lt.s32.totalorder %s79_s16, %s79_s16 }
  0x1d   :  { %p7710_p10 = scmp.ne.s32.totalorder %s79_s16, %s7709_s17  ;;  %p7715_p12 = scmp.lt.s32.totalorder %s7709_s17, %s7709_s17 }
  0x1f   :  { %p7716_p13 = por %p7715_p12, %p7714_p11 }
  0x21   :  { %p7717_p0 = pnand %p7716_p13, %p7710_p10 }
  0x23   :  { %7720 = shalt.err (!%p7717_p0)
}
  0x24   :  { %s7838_s1 = smov 64   ;;  %s7839_s18 = smov 4  }
  0x25   :  { %84 = dma.hbm_to_vmem [thread:$0]  %s8150_s5, 4096, %s79_s16, [#allocation13], %s7838_s1, %s7838_s1, %s7839_s18  }
  0x26   :  { %s7840_s21 = smov [#allocation3]   ;;  %s7841_s3 = smov [#allocation8]  }
  0x27   :  { %s22_s22 = sshll.u32 %s7840_s21, 4  ;;  %s47_s23 = sshll.u32 %s7841_s3, 4  ;;  %s23_s22 = int_to_ptr.vmem [resolvable:$true] %s22_s22  ;;  %s48_s23 = int_to_ptr.vmem [resolvable:$true] %s47_s23 }
  0x28   :  { %s7729_s24 = scalar_lea.vmem %s23_s22, 1024  ;;  %p7734_p2 = scmp.lt.s32.totalorder %s23_s22, %s23_s22 }
  0x29   :  { %p7730_p1 = scmp.ne.s32.totalorder %s23_s22, %s7729_s24  ;;  %p7735_p3 = scmp.lt.s32.totalorder %s7729_s24, %s7729_s24 }
  0x2b   :  { %p7736_p4 = por %p7735_p3, %p7734_p2 }
  0x2d   :  { %p7737_p5 = pnand %p7736_p4, %p7730_p1 }
  0x2f   :  { %7740 = shalt.err (!%p7737_p5)
}
  0x30   :  { %28 = dma.hbm_to_vmem [thread:$0]  %s8145_s0, 1024, %s23_s22, [#allocation4], %s7833_s29, %s7833_s29, %s7834_s30  }
  0x31   :  { %s7749_s5 = scalar_lea.vmem %s48_s23, 128  ;;  %p7754_p7 = scmp.lt.s32.totalorder %s48_s23, %s48_s23 }
  0x32   :  { %p7750_p6 = scmp.ne.s32.totalorder %s48_s23, %s7749_s5  ;;  %p7755_p8 = scmp.lt.s32.totalorder %s7749_s5, %s7749_s5 }
  0x34   :  { %p7756_p9 = por %p7755_p8, %p7754_p7 }
  0x36   :  { %p7757_p10 = pnand %p7756_p9, %p7750_p6 }
  0x38   :  { %7760 = shalt.err (!%p7757_p10)
}
  0x39   :  { %50 = dma.hbm_to_vmem [thread:$0]  %s8147_s2, 128, %s48_s23, [#allocation7]  }
  0x3a   :  { %s7842_s8 = smov [#allocation11]   ;;  %s7843_s10 = smov [#allocation14]  }
  0x3b   :  { %s69_s9 = sshll.u32 %s7842_s8, 4  ;;  %s91_s11 = sshll.u32 %s7843_s10, 4  ;;  %s70_s9 = int_to_ptr.vmem [resolvable:$true] %s69_s9  ;;  %s92_s11 = int_to_ptr.vmem [resolvable:$true] %s91_s11 }
  0x3c   :  { %s7769_s12 = scalar_lea.vmem %s70_s9, 64  ;;  %p7774_p12 = scmp.lt.s32.totalorder %s70_s9, %s70_s9 }
  0x3d   :  { %p7770_p11 = scmp.ne.s32.totalorder %s70_s9, %s7769_s12  ;;  %p7775_p13 = scmp.lt.s32.totalorder %s7769_s12, %s7769_s12 }
  0x3f   :  { %p7776_p0 = por %p7775_p13, %p7774_p12 }
  0x41   :  { %p7777_p1 = pnand %p7776_p0, %p7770_p11 }
  0x43   :  { %7780 = shalt.err (!%p7777_p1)
}
  0x44   :  { %72 = dma.hbm_to_vmem [thread:$0]  %s8149_s4, 64, %s70_s9, [#allocation10]  }
  0x45   :  { %s7789_s30 = scalar_lea.vmem %s92_s11, 16  ;;  %s7793_s2 = scalar_lea.vmem %s92_s11, 32 }
  0x46   :  { %p7790_p2 = scmp.ne.s32.totalorder %s92_s11, %s7789_s30  ;;  %p7794_p3 = scmp.lt.s32.totalorder %s92_s11, %s92_s11 }
  0x47   :  { %p7795_p4 = scmp.lt.s32.totalorder %s7793_s2, %s7789_s30 }
  0x49   :  { %p7796_p5 = por %p7795_p4, %p7794_p3 }
  0x4b   :  { %p7797_p6 = pnand %p7796_p5, %p7790_p2 }
  0x4d   :  { %7800 = shalt.err (!%p7797_p6)
}
  0x4e   :  { %94 = dma.hbm_to_vmem [thread:$0]  %s8151_s6, 16, %s92_s11, [#allocation13]  }
  0x4f   :  { %7821 = dma.done.wait [#allocation4], 1024  }
  0x50   :  { %7822 = vsyncadd [#allocation4], 4294966272 }
  0x51   :  { %7823 = dma.done.wait [#allocation7], 65664  }
  0x52   :  { %7824 = vsyncadd [#allocation7], 4294901632 }
  0x53   :  { %7825 = dma.done.wait [#allocation10], 32832  }
  0x54   :  { %7826 = vsyncadd [#allocation10], 4294934464 }
  0x55   :  { %7827 = dma.done.wait [#allocation13], 4112  }
  0x56   :  { %7828 = vsyncadd [#allocation13], 4294963184  ;;  %v217_v0 = vld [vmem:[#allocation6 + $0x1c0] sm:$0xff]  ;;  %v7922_v59 = vld [vmem:[#allocation3 + $0x8] sm:$0xff]  ;;  %s7844_s4 = smov [#allocation15]  }
  0x57   :  { %v221_v1 = vld [vmem:[#allocation6 + $0x1e0] sm:$0xff]  ;;  %v7924_v60 = vld [vmem:[#allocation3 + $0x28] sm:$0xff]  ;;  %s6360_s6 = sshll.u32 %s7844_s4, 4  ;;  %s6361_s6 = int_to_ptr.vmem [resolvable:$true] %s6360_s6 }
  0x58   :  { %v345_v2 = vld [vmem:[#allocation6 + $0x5c0] sm:$0xff]  ;;  %v6440_v3 = vcombine.high %v217_v0, %v221_v1  ;;  %v6439_v5 = vcombine.low %v217_v0, %v221_v1  ;;  %v7928_v63 = vcombine.high %v7922_v59, %v7924_v60  ;;  %s7801_s15 = scalar_lea.vmem %s6361_s6, 256  ;;  %p7806_p8 = scmp.lt.s32.totalorder %s6361_s6, %s6361_s6 }
  0x59   :  { %v349_v4 = vld [vmem:[#allocation6 + $0x5e0] sm:$0xff]  ;;  %p7802_p7 = scmp.ne.s32.totalorder %s6361_s6, %s7801_s15  ;;  %p7807_p9 = scmp.lt.s32.totalorder %s7801_s15, %s7801_s15 }
  0x5a   :  { %v209_v6 = vld [vmem:[#allocation6 + $0x180] sm:$0xff]  ;;  %v6568_v8 = vcombine.high %v345_v2, %v349_v4  ;;  %v6567_v9 = vcombine.low %v345_v2, %v349_v4  ;;  %3273 = vmatprep.subr.bf16.mxu0 %v6440_v3  ;;  %3348 = vmatprep.mubr.bf16.mxu1 %v7928_v63 }
  0x5b   :  { %v213_v7 = vld [vmem:[#allocation6 + $0x1a0] sm:$0xff]  ;;  %3274 = vmatpush1.bf16.msra.mxu0 %v6439_v5  ;;  %p7808_p10 = por %p7807_p9, %p7806_p8 }
  0x5c   :  { %v6432_v10 = vcombine.high %v209_v6, %v213_v7  ;;  %v337_v11 = vld [vmem:[#allocation6 + $0x580] sm:$0xff]  ;;  %3316 = vmatprep.subr.bf16.mxu1 %v6568_v8  ;;  %v6431_v18 = vcombine.low %v209_v6, %v213_v7 }
  0x5d   :  { %v341_v12 = vld [vmem:[#allocation6 + $0x5a0] sm:$0xff]  ;;  %3317 = vmatpush1.bf16.msra.mxu1 %v6567_v9  ;;  %p7809_p11 = pnand %p7808_p10, %p7802_p7 }
  0x5e   :  { %v201_v13 = vld [vmem:[#allocation6 + $0x140] sm:$0xff]  ;;  %v6560_v14 = vcombine.high %v337_v11, %v341_v12  ;;  %3275 = vmatprep.subr.bf16.mxu0 %v6432_v10  ;;  %v6559_v19 = vcombine.low %v337_v11, %v341_v12 }
  0x5f   :  { %v205_v15 = vld [vmem:[#allocation6 + $0x160] sm:$0xff]  ;;  %3276 = vmatpush1.bf16.msra.mxu0 %v6431_v18 }
  0x60   :  { %v329_v16 = vld [vmem:[#allocation6 + $0x540] sm:$0xff]  ;;  %v6424_v20 = vcombine.high %v201_v13, %v205_v15  ;;  %3318 = vmatprep.subr.bf16.mxu1 %v6560_v14  ;;  %v6423_v26 = vcombine.low %v201_v13, %v205_v15 }
  0x61   :  { %v333_v17 = vld [vmem:[#allocation6 + $0x560] sm:$0xff]  ;;  %3319 = vmatpush1.bf16.msra.mxu1 %v6559_v19 }
  0x62   :  { %v6552_v21 = vcombine.high %v329_v16, %v333_v17  ;;  %v193_v22 = vld [vmem:[#allocation6 + $0x100] sm:$0xff]  ;;  %3277 = vmatprep.subr.bf16.mxu0 %v6424_v20  ;;  %v6551_v27 = vcombine.low %v329_v16, %v333_v17 }
  0x63   :  { %v197_v23 = vld [vmem:[#allocation6 + $0x120] sm:$0xff]  ;;  %3278 = vmatpush1.bf16.msra.mxu0 %v6423_v26 }
  0x64   :  { %v321_v24 = vld [vmem:[#allocation6 + $0x500] sm:$0xff]  ;;  %v6416_v28 = vcombine.high %v193_v22, %v197_v23  ;;  %3320 = vmatprep.subr.bf16.mxu1 %v6552_v21  ;;  %v6415_v34 = vcombine.low %v193_v22, %v197_v23 }
  0x65   :  { %v325_v25 = vld [vmem:[#allocation6 + $0x520] sm:$0xff]  ;;  %3321 = vmatpush1.bf16.msra.mxu1 %v6551_v27 }
  0x66   :  { %v6544_v29 = vcombine.high %v321_v24, %v325_v25  ;;  %v185_v30 = vld [vmem:[#allocation6 + $0xc0] sm:$0xff]  ;;  %3279 = vmatprep.subr.bf16.mxu0 %v6416_v28  ;;  %v6543_v35 = vcombine.low %v321_v24, %v325_v25 }
  0x67   :  { %v189_v31 = vld [vmem:[#allocation6 + $0xe0] sm:$0xff]  ;;  %3280 = vmatpush1.bf16.msra.mxu0 %v6415_v34 }
  0x68   :  { %v313_v32 = vld [vmem:[#allocation6 + $0x4c0] sm:$0xff]  ;;  %v6408_v36 = vcombine.high %v185_v30, %v189_v31  ;;  %3322 = vmatprep.subr.bf16.mxu1 %v6544_v29  ;;  %v6407_v42 = vcombine.low %v185_v30, %v189_v31 }
  0x69   :  { %v317_v33 = vld [vmem:[#allocation6 + $0x4e0] sm:$0xff]  ;;  %3323 = vmatpush1.bf16.msra.mxu1 %v6543_v35 }
  0x6a   :  { %v6536_v37 = vcombine.high %v313_v32, %v317_v33  ;;  %v177_v38 = vld [vmem:[#allocation6 + $0x80] sm:$0xff]  ;;  %3281 = vmatprep.subr.bf16.mxu0 %v6408_v36  ;;  %v6535_v43 = vcombine.low %v313_v32, %v317_v33 }
  0x6b   :  { %v181_v39 = vld [vmem:[#allocation6 + $0xa0] sm:$0xff]  ;;  %3282 = vmatpush1.bf16.msra.mxu0 %v6407_v42 }
  0x6c   :  { %v305_v40 = vld [vmem:[#allocation6 + $0x480] sm:$0xff]  ;;  %v6400_v44 = vcombine.high %v177_v38, %v181_v39  ;;  %3324 = vmatprep.subr.bf16.mxu1 %v6536_v37  ;;  %v6399_v50 = vcombine.low %v177_v38, %v181_v39 }
  0x6d   :  { %v309_v41 = vld [vmem:[#allocation6 + $0x4a0] sm:$0xff]  ;;  %3325 = vmatpush1.bf16.msra.mxu1 %v6535_v43 }
  0x6e   :  { %v6528_v45 = vcombine.high %v305_v40, %v309_v41  ;;  %v169_v46 = vld [vmem:[#allocation6 + $0x40] sm:$0xff]  ;;  %3283 = vmatprep.subr.bf16.mxu0 %v6400_v44  ;;  %v6527_v51 = vcombine.low %v305_v40, %v309_v41 }
  0x6f   :  { %v173_v47 = vld [vmem:[#allocation6 + $0x60] sm:$0xff]  ;;  %3284 = vmatpush1.bf16.msra.mxu0 %v6399_v50 }
  0x70   :  { %v297_v48 = vld [vmem:[#allocation6 + $0x440] sm:$0xff]  ;;  %v6392_v52 = vcombine.high %v169_v46, %v173_v47  ;;  %3326 = vmatprep.subr.bf16.mxu1 %v6528_v45  ;;  %v6391_v0 = vcombine.low %v169_v46, %v173_v47 }
  0x71   :  { %v301_v49 = vld [vmem:[#allocation6 + $0x460] sm:$0xff]  ;;  %3327 = vmatpush1.bf16.msra.mxu1 %v6527_v51 }
  0x72   :  { %v161_v53 = vld [vmem:[#allocation6] sm:$0xff]  ;;  %v6520_v56 = vcombine.high %v297_v48, %v301_v49  ;;  %3285 = vmatprep.subr.bf16.mxu0 %v6392_v52  ;;  %v6519_v1 = vcombine.low %v297_v48, %v301_v49 }
  0x73   :  { %v7914_v54 = vld [vmem:[#allocation3] sm:$0xff]  ;;  %3286 = vmatpush1.bf16.msra.mxu0 %v6391_v0 }
  0x74   :  { %v7916_v55 = vld [vmem:[#allocation3 + $0x20] sm:$0xff]  ;;  %3328 = vmatprep.subr.bf16.mxu1 %v6520_v56 }
  0x75   :  { %v165_v57 = vld [vmem:[#allocation6 + $0x20] sm:$0xff]  ;;  %v7920_v58 = vcombine.high %v7914_v54, %v7916_v55  ;;  %3329 = vmatpush1.bf16.msra.mxu1 %v6519_v1 }
  0x76   :  { %v289_v61 = vld [vmem:[#allocation6 + $0x400] sm:$0xff]  ;;  %v6384_v2 = vcombine.high %v161_v53, %v165_v57  ;;  %v6383_v8 = vcombine.low %v161_v53, %v165_v57 }
  0x77   :  { %v293_v62 = vld [vmem:[#allocation6 + $0x420] sm:$0xff]  ;;  %3305 = vmatprep.mubr.bf16.mxu0 %v7920_v58 }
  0x78   :  { %v6512_v3 = vcombine.high %v289_v61, %v293_v62  ;;  %v281_v4 = vld [vmem:[#allocation6 + $0x3c0] sm:$0xff]  ;;  %3287 = vmatprep.subr.bf16.mxu0 %v6384_v2  ;;  %v6511_v9 = vcombine.low %v289_v61, %v293_v62 }
  0x79   :  { %v285_v5 = vld [vmem:[#allocation6 + $0x3e0] sm:$0xff]  ;;  %3288 = vmatpush1.bf16.msra.mxu0 %v6383_v8 }
  0x7a   :  { %v409_v6 = vld [vmem:[#allocation6 + $0x7c0] sm:$0xff]  ;;  %v6504_v10 = vcombine.high %v281_v4, %v285_v5  ;;  %3330 = vmatprep.subr.bf16.mxu1 %v6512_v3  ;;  %v6503_v16 = vcombine.low %v281_v4, %v285_v5 }
  0x7b   :  { %v413_v7 = vld [vmem:[#allocation6 + $0x7e0] sm:$0xff]  ;;  %3331 = vmatpush1.bf16.msra.mxu1 %v6511_v9 }
  0x7c   :  { %v6632_v11 = vcombine.high %v409_v6, %v413_v7  ;;  %v273_v12 = vld [vmem:[#allocation6 + $0x380] sm:$0xff]  ;;  %3289 = vmatprep.subr.bf16.mxu0 %v6504_v10  ;;  %v6631_v17 = vcombine.low %v409_v6, %v413_v7 }
  0x7d   :  { %v277_v13 = vld [vmem:[#allocation6 + $0x3a0] sm:$0xff]  ;;  %3290 = vmatpush2.bf16.msra.mxu0 %v6503_v16 }
  0x7e   :  { %v401_v14 = vld [vmem:[#allocation6 + $0x780] sm:$0xff]  ;;  %v6496_v18 = vcombine.high %v273_v12, %v277_v13  ;;  %3332 = vmatprep.subr.bf16.mxu1 %v6632_v11  ;;  %v6495_v24 = vcombine.low %v273_v12, %v277_v13 }
  0x7f   :  { %v405_v15 = vld [vmem:[#allocation6 + $0x7a0] sm:$0xff]  ;;  %3333 = vmatpush2.bf16.msra.mxu1 %v6631_v17 }
  0x80   :  { %v6624_v19 = vcombine.high %v401_v14, %v405_v15  ;;  %v265_v20 = vld [vmem:[#allocation6 + $0x340] sm:$0xff]  ;;  %3291 = vmatprep.subr.bf16.mxu0 %v6496_v18  ;;  %v6623_v25 = vcombine.low %v401_v14, %v405_v15 }
  0x81   :  { %v269_v21 = vld [vmem:[#allocation6 + $0x360] sm:$0xff]  ;;  %3292 = vmatpush2.bf16.msra.mxu0 %v6495_v24  ;;  %v7938_v24 = vld [vmem:[#allocation3 + $0x30] sm:$0xff] }
  0x82   :  { %v393_v22 = vld [vmem:[#allocation6 + $0x740] sm:$0xff]  ;;  %v6488_v26 = vcombine.high %v265_v20, %v269_v21  ;;  %3334 = vmatprep.subr.bf16.mxu1 %v6624_v19  ;;  %v6487_v32 = vcombine.low %v265_v20, %v269_v21  ;;  %v7934_v21 = vcombine.low %v7914_v54, %v7916_v55 }
  0x83   :  { %v397_v23 = vld [vmem:[#allocation6 + $0x760] sm:$0xff]  ;;  %3335 = vmatpush2.bf16.msra.mxu1 %v6623_v25  ;;  %v7942_v25 = vcombine.low %v7922_v59, %v7924_v60 }
  0x84   :  { %v6616_v27 = vcombine.high %v393_v22, %v397_v23  ;;  %v257_v28 = vld [vmem:[#allocation6 + $0x300] sm:$0xff]  ;;  %3293 = vmatprep.subr.bf16.mxu0 %v6488_v26  ;;  %v6615_v33 = vcombine.low %v393_v22, %v397_v23  ;;  %v7936_v23 = vld [vmem:[#allocation3 + $0x10] sm:$0xff] }
  0x85   :  { %v261_v29 = vld [vmem:[#allocation6 + $0x320] sm:$0xff]  ;;  %3294 = vmatpush2.bf16.msra.mxu0 %v6487_v32  ;;  %v7950_v32 = vcombine.high %v7936_v23, %v7938_v24 }
  0x86   :  { %v385_v30 = vld [vmem:[#allocation6 + $0x700] sm:$0xff]  ;;  %v6480_v34 = vcombine.high %v257_v28, %v261_v29  ;;  %3336 = vmatprep.subr.bf16.mxu1 %v6616_v27  ;;  %v6479_v40 = vcombine.low %v257_v28, %v261_v29  ;;  %v7944_v27 = vld [vmem:[#allocation3 + $0x18] sm:$0xff] }
  0x87   :  { %v389_v31 = vld [vmem:[#allocation6 + $0x720] sm:$0xff]  ;;  %3337 = vmatpush2.bf16.msra.mxu1 %v6615_v33  ;;  %v7946_v28 = vld [vmem:[#allocation3 + $0x38] sm:$0xff] }
  0x88   :  { %v6608_v35 = vcombine.high %v385_v30, %v389_v31  ;;  %v249_v36 = vld [vmem:[#allocation6 + $0x2c0] sm:$0xff]  ;;  %3295 = vmatprep.subr.bf16.mxu0 %v6480_v34  ;;  %v6607_v41 = vcombine.low %v385_v30, %v389_v31  ;;  %v7955_v33 = vcombine.high %v7944_v27, %v7946_v28 }
  0x89   :  { %v253_v37 = vld [vmem:[#allocation6 + $0x2e0] sm:$0xff]  ;;  %3296 = vmatpush2.bf16.msra.mxu0 %v6479_v40 }
  0x8a   :  { %v377_v38 = vld [vmem:[#allocation6 + $0x6c0] sm:$0xff]  ;;  %v6472_v42 = vcombine.high %v249_v36, %v253_v37  ;;  %3338 = vmatprep.subr.bf16.mxu1 %v6608_v35  ;;  %v6471_v48 = vcombine.low %v249_v36, %v253_v37 }
  0x8b   :  { %v381_v39 = vld [vmem:[#allocation6 + $0x6e0] sm:$0xff]  ;;  %3339 = vmatpush2.bf16.msra.mxu1 %v6607_v41 }
  0x8c   :  { %v6600_v43 = vcombine.high %v377_v38, %v381_v39  ;;  %v241_v44 = vld [vmem:[#allocation6 + $0x280] sm:$0xff]  ;;  %3297 = vmatprep.subr.bf16.mxu0 %v6472_v42  ;;  %v6599_v49 = vcombine.low %v377_v38, %v381_v39 }
  0x8d   :  { %v245_v45 = vld [vmem:[#allocation6 + $0x2a0] sm:$0xff]  ;;  %3298 = vmatpush2.bf16.msra.mxu0 %v6471_v48 }
  0x8e   :  { %v369_v46 = vld [vmem:[#allocation6 + $0x680] sm:$0xff]  ;;  %v6464_v50 = vcombine.high %v241_v44, %v245_v45  ;;  %3340 = vmatprep.subr.bf16.mxu1 %v6600_v43  ;;  %v6463_v61 = vcombine.low %v241_v44, %v245_v45 }
  0x8f   :  { %v373_v47 = vld [vmem:[#allocation6 + $0x6a0] sm:$0xff]  ;;  %3341 = vmatpush2.bf16.msra.mxu1 %v6599_v49 }
  0x90   :  { %v6592_v51 = vcombine.high %v369_v46, %v373_v47  ;;  %v233_v52 = vld [vmem:[#allocation6 + $0x240] sm:$0xff]  ;;  %3299 = vmatprep.subr.bf16.mxu0 %v6464_v50  ;;  %v6591_v62 = vcombine.low %v369_v46, %v373_v47 }
  0x91   :  { %v237_v53 = vld [vmem:[#allocation6 + $0x260] sm:$0xff]  ;;  %3300 = vmatpush2.bf16.msra.mxu0 %v6463_v61 }
  0x92   :  { %v361_v56 = vld [vmem:[#allocation6 + $0x640] sm:$0xff]  ;;  %v6456_v0 = vcombine.high %v233_v52, %v237_v53  ;;  %3342 = vmatprep.subr.bf16.mxu1 %v6592_v51  ;;  %v6455_v6 = vcombine.low %v233_v52, %v237_v53 }
  0x93   :  { %v365_v57 = vld [vmem:[#allocation6 + $0x660] sm:$0xff]  ;;  %3343 = vmatpush2.bf16.msra.mxu1 %v6591_v62 }
  0x94   :  { %v6584_v1 = vcombine.high %v361_v56, %v365_v57  ;;  %v225_v2 = vld [vmem:[#allocation6 + $0x200] sm:$0xff]  ;;  %3301 = vmatprep.subr.bf16.mxu0 %v6456_v0  ;;  %v6583_v7 = vcombine.low %v361_v56, %v365_v57 }
  0x95   :  { %v229_v3 = vld [vmem:[#allocation6 + $0x220] sm:$0xff]  ;;  %3302 = vmatpush2.bf16.msra.mxu0 %v6455_v6 }
  0x96   :  { %v353_v4 = vld [vmem:[#allocation6 + $0x600] sm:$0xff]  ;;  %v6448_v8 = vcombine.high %v225_v2, %v229_v3  ;;  %3344 = vmatprep.subr.bf16.mxu1 %v6584_v1  ;;  %v6447_v14 = vcombine.low %v225_v2, %v229_v3 }
  0x97   :  { %v357_v5 = vld [vmem:[#allocation6 + $0x620] sm:$0xff]  ;;  %3345 = vmatpush2.bf16.msra.mxu1 %v6583_v7 }
  0x98   :  { %v6576_v9 = vcombine.high %v353_v4, %v357_v5  ;;  %v473_v10 = vld [vmem:[#allocation6 + $0x9c0] sm:$0xff]  ;;  %3303 = vmatprep.subr.bf16.mxu0 %v6448_v8  ;;  %v6575_v15 = vcombine.low %v353_v4, %v357_v5 }
  0x99   :  { %v477_v11 = vld [vmem:[#allocation6 + $0x9e0] sm:$0xff]  ;;  %3304 = vmatpush2.bf16.msra.mxu0 %v6447_v14 }
  0x9a   :  { %v601_v12 = vld [vmem:[#allocation6 + $0xdc0] sm:$0xff]  ;;  %v6696_v16 = vcombine.high %v473_v10, %v477_v11  ;;  %3346 = vmatprep.subr.bf16.mxu1 %v6576_v9  ;;  %v6695_v26 = vcombine.low %v473_v10, %v477_v11 }
  0x9b   :  { %v605_v13 = vld [vmem:[#allocation6 + $0xde0] sm:$0xff]  ;;  %3347 = vmatpush2.bf16.msra.mxu1 %v6575_v15 }
  0x9c   :  { %v6824_v17 = vcombine.high %v601_v12, %v605_v13  ;;  %v465_v18 = vld [vmem:[#allocation6 + $0x980] sm:$0xff]  ;;  %3359 = vmatprep.subr.bf16.mxu0 %v6696_v16  ;;  %v6823_v29 = vcombine.low %v601_v12, %v605_v13  ;;  %3306 = vmatmul.mubr.bf16.vlgmr.msra.gmra.mxu0 %v7934_v21 }
  0x9d   :  { %v469_v19 = vld [vmem:[#allocation6 + $0x9a0] sm:$0xff]  ;;  %3360 = vmatpush1.bf16.msra.mxu0 %v6695_v26  ;;  %3391 = vmatprep.mubr.bf16.mxu0 %v7950_v32 }
  0x9e   :  { %v593_v20 = vld [vmem:[#allocation6 + $0xd80] sm:$0xff]  ;;  %v6688_v54 = vcombine.high %v465_v18, %v469_v19  ;;  %3402 = vmatprep.subr.bf16.mxu1 %v6824_v17  ;;  %3349 = vmatmul.mubr.bf16.vlgmr.msra.gmra.mxu1 %v7942_v25  ;;  %v6687_v34 = vcombine.low %v465_v18, %v469_v19 }
  0x9f   :  { %v597_v22 = vld [vmem:[#allocation6 + $0xda0] sm:$0xff]  ;;  %3403 = vmatpush1.bf16.msra.mxu1 %v6823_v29  ;;  %3434 = vmatprep.mubr.bf16.mxu1 %v7955_v33 }
  0xa0   :  { %v6816_v55 = vcombine.high %v593_v20, %v597_v22  ;;  %v457_v30 = vld [vmem:[#allocation6 + $0x940] sm:$0xff]  ;;  %3361 = vmatprep.subr.bf16.mxu0 %v6688_v54  ;;  %v6815_v35 = vcombine.low %v593_v20, %v597_v22 }
  0xa1   :  { %v461_v31 = vld [vmem:[#allocation6 + $0x960] sm:$0xff]  ;;  %3362 = vmatpush1.bf16.msra.mxu0 %v6687_v34 }
  0xa2   :  { %v585_v59 = vld [vmem:[#allocation6 + $0xd40] sm:$0xff]  ;;  %v6680_v36 = vcombine.high %v457_v30, %v461_v31  ;;  %3404 = vmatprep.subr.bf16.mxu1 %v6816_v55  ;;  %v6679_v42 = vcombine.low %v457_v30, %v461_v31 }
  0xa3   :  { %v589_v60 = vld [vmem:[#allocation6 + $0xd60] sm:$0xff]  ;;  %3405 = vmatpush1.bf16.msra.mxu1 %v6815_v35 }
  0xa4   :  { %v449_v37 = vld [vmem:[#allocation6 + $0x900] sm:$0xff]  ;;  %v6808_v40 = vcombine.high %v585_v59, %v589_v60  ;;  %3363 = vmatprep.subr.bf16.mxu0 %v6680_v36  ;;  %v6807_v43 = vcombine.low %v585_v59, %v589_v60 }
  0xa5   :  { %v453_v38 = vld [vmem:[#allocation6 + $0x920] sm:$0xff]  ;;  %3364 = vmatpush1.bf16.msra.mxu0 %v6679_v42 }
  0xa6   :  { %v577_v39 = vld [vmem:[#allocation6 + $0xd00] sm:$0xff]  ;;  %v6672_v44 = vcombine.high %v449_v37, %v453_v38  ;;  %3406 = vmatprep.subr.bf16.mxu1 %v6808_v40  ;;  %v6671_v50 = vcombine.low %v449_v37, %v453_v38 }
  0xa7   :  { %v581_v41 = vld [vmem:[#allocation6 + $0xd20] sm:$0xff]  ;;  %3407 = vmatpush1.bf16.msra.mxu1 %v6807_v43 }
  0xa8   :  { %v441_v45 = vld [vmem:[#allocation6 + $0x8c0] sm:$0xff]  ;;  %v6800_v48 = vcombine.high %v577_v39, %v581_v41  ;;  %3365 = vmatprep.subr.bf16.mxu0 %v6672_v44  ;;  %v6799_v51 = vcombine.low %v577_v39, %v581_v41 }
  0xa9   :  { %v445_v46 = vld [vmem:[#allocation6 + $0x8e0] sm:$0xff]  ;;  %3366 = vmatpush1.bf16.msra.mxu0 %v6671_v50 }
  0xaa   :  { %v569_v47 = vld [vmem:[#allocation6 + $0xcc0] sm:$0xff]  ;;  %v6664_v52 = vcombine.high %v441_v45, %v445_v46  ;;  %3408 = vmatprep.subr.bf16.mxu1 %v6800_v48  ;;  %v6663_v0 = vcombine.low %v441_v45, %v445_v46 }
  0xab   :  { %v573_v49 = vld [vmem:[#allocation6 + $0xce0] sm:$0xff]  ;;  %3409 = vmatpush1.bf16.msra.mxu1 %v6799_v51 }
  0xac   :  { %v433_v53 = vld [vmem:[#allocation6 + $0x880] sm:$0xff]  ;;  %v6792_v61 = vcombine.high %v569_v47, %v573_v49  ;;  %3367 = vmatprep.subr.bf16.mxu0 %v6664_v52  ;;  %v6791_v1 = vcombine.low %v569_v47, %v573_v49 }
  0xad   :  { %v437_v56 = vld [vmem:[#allocation6 + $0x8a0] sm:$0xff]  ;;  %3368 = vmatpush1.bf16.msra.mxu0 %v6663_v0 }
  0xae   :  { %v561_v57 = vld [vmem:[#allocation6 + $0xc80] sm:$0xff]  ;;  %v6656_v2 = vcombine.high %v433_v53, %v437_v56  ;;  %3410 = vmatprep.subr.bf16.mxu1 %v6792_v61  ;;  %v6655_v8 = vcombine.low %v433_v53, %v437_v56 }
  0xaf   :  { %v565_v62 = vld [vmem:[#allocation6 + $0xca0] sm:$0xff]  ;;  %3411 = vmatpush1.bf16.msra.mxu1 %v6791_v1 }
  0xb0   :  { %v425_v3 = vld [vmem:[#allocation6 + $0x840] sm:$0xff]  ;;  %v6784_v6 = vcombine.high %v561_v57, %v565_v62  ;;  %3369 = vmatprep.subr.bf16.mxu0 %v6656_v2  ;;  %v6783_v9 = vcombine.low %v561_v57, %v565_v62 }
  0xb1   :  { %v429_v4 = vld [vmem:[#allocation6 + $0x860] sm:$0xff]  ;;  %3370 = vmatpush1.bf16.msra.mxu0 %v6655_v8 }
  0xb2   :  { %v553_v5 = vld [vmem:[#allocation6 + $0xc40] sm:$0xff]  ;;  %v6648_v10 = vcombine.high %v425_v3, %v429_v4  ;;  %3412 = vmatprep.subr.bf16.mxu1 %v6784_v6  ;;  %v6647_v16 = vcombine.low %v425_v3, %v429_v4 }
  0xb3   :  { %v557_v7 = vld [vmem:[#allocation6 + $0xc60] sm:$0xff]  ;;  %3413 = vmatpush1.bf16.msra.mxu1 %v6783_v9 }
  0xb4   :  { %v417_v11 = vld [vmem:[#allocation6 + $0x800] sm:$0xff]  ;;  %v6776_v14 = vcombine.high %v553_v5, %v557_v7  ;;  %3371 = vmatprep.subr.bf16.mxu0 %v6648_v10  ;;  %v6775_v17 = vcombine.low %v553_v5, %v557_v7 }
  0xb5   :  { %v421_v12 = vld [vmem:[#allocation6 + $0x820] sm:$0xff]  ;;  %3372 = vmatpush1.bf16.msra.mxu0 %v6647_v16 }
  0xb6   :  { %v545_v13 = vld [vmem:[#allocation6 + $0xc00] sm:$0xff]  ;;  %v6640_v18 = vcombine.high %v417_v11, %v421_v12  ;;  %3414 = vmatprep.subr.bf16.mxu1 %v6776_v14  ;;  %v6639_v54 = vcombine.low %v417_v11, %v421_v12 }
  0xb7   :  { %v549_v15 = vld [vmem:[#allocation6 + $0xc20] sm:$0xff]  ;;  %3415 = vmatpush1.bf16.msra.mxu1 %v6775_v17 }
  0xb8   :  { %v537_v19 = vld [vmem:[#allocation6 + $0xbc0] sm:$0xff]  ;;  %v6768_v26 = vcombine.high %v545_v13, %v549_v15  ;;  %3373 = vmatprep.subr.bf16.mxu0 %v6640_v18  ;;  %v6767_v55 = vcombine.low %v545_v13, %v549_v15 }
  0xb9   :  { %v541_v20 = vld [vmem:[#allocation6 + $0xbe0] sm:$0xff]  ;;  %3374 = vmatpush1.bf16.msra.mxu0 %v6639_v54 }
  0xba   :  { %v665_v22 = vld [vmem:[#allocation6 + $0xfc0] sm:$0xff]  ;;  %v6760_v30 = vcombine.high %v537_v19, %v541_v20  ;;  %3416 = vmatprep.subr.bf16.mxu1 %v6768_v26  ;;  %v6759_v36 = vcombine.low %v537_v19, %v541_v20 }
  0xbb   :  { %v669_v29 = vld [vmem:[#allocation6 + $0xfe0] sm:$0xff]  ;;  %3417 = vmatpush1.bf16.msra.mxu1 %v6767_v55 }
  0xbc   :  { %v529_v31 = vld [vmem:[#allocation6 + $0xb80] sm:$0xff]  ;;  %v6888_v34 = vcombine.high %v665_v22, %v669_v29  ;;  %3375 = vmatprep.subr.bf16.mxu0 %v6760_v30  ;;  %v6887_v37 = vcombine.low %v665_v22, %v669_v29 }
  0xbd   :  { %v533_v59 = vld [vmem:[#allocation6 + $0xba0] sm:$0xff]  ;;  %3376 = vmatpush2.bf16.msra.mxu0 %v6759_v36 }
  0xbe   :  { %v657_v60 = vld [vmem:[#allocation6 + $0xf80] sm:$0xff]  ;;  %v6752_v38 = vcombine.high %v529_v31, %v533_v59  ;;  %3418 = vmatprep.subr.bf16.mxu1 %v6888_v34  ;;  %v6751_v44 = vcombine.low %v529_v31, %v533_v59  ;;  %v222_v34 = vld [vmem:[#allocation6 + $0x1e8] sm:$0xff] }
  0xbf   :  { %v661_v35 = vld [vmem:[#allocation6 + $0xfa0] sm:$0xff]  ;;  %3419 = vmatpush2.bf16.msra.mxu1 %v6887_v37  ;;  %v350_v37 = vld [vmem:[#allocation6 + $0x5e8] sm:$0xff] }
  0xc0   :  { %v521_v39 = vld [vmem:[#allocation6 + $0xb40] sm:$0xff]  ;;  %v6880_v42 = vcombine.high %v657_v60, %v661_v35  ;;  %3377 = vmatprep.subr.bf16.mxu0 %v6752_v38  ;;  %v6879_v45 = vcombine.low %v657_v60, %v661_v35  ;;  %v218_v60 = vld [vmem:[#allocation6 + $0x1c8] sm:$0xff] }
  0xc1   :  { %v525_v40 = vld [vmem:[#allocation6 + $0xb60] sm:$0xff]  ;;  %3378 = vmatpush2.bf16.msra.mxu0 %v6751_v44  ;;  %v346_v35 = vld [vmem:[#allocation6 + $0x5c8] sm:$0xff] }
  0xc2   :  { %v649_v41 = vld [vmem:[#allocation6 + $0xf40] sm:$0xff]  ;;  %v6744_v46 = vcombine.high %v521_v39, %v525_v40  ;;  %3420 = vmatprep.subr.bf16.mxu1 %v6880_v42  ;;  %v6743_v52 = vcombine.low %v521_v39, %v525_v40  ;;  %v6442_v40 = vcombine.high %v218_v60, %v222_v34  ;;  %v214_v42 = vld [vmem:[#allocation6 + $0x1a8] sm:$0xff]  ;;  %v6570_v44 = vcombine.high %v346_v35, %v350_v37 }
  0xc3   :  { %v653_v43 = vld [vmem:[#allocation6 + $0xf60] sm:$0xff]  ;;  %3421 = vmatpush2.bf16.msra.mxu1 %v6879_v45  ;;  %v342_v45 = vld [vmem:[#allocation6 + $0x5a8] sm:$0xff] }
  0xc4   :  { %v513_v47 = vld [vmem:[#allocation6 + $0xb00] sm:$0xff]  ;;  %v6872_v50 = vcombine.high %v649_v41, %v653_v43  ;;  %3379 = vmatprep.subr.bf16.mxu0 %v6744_v46  ;;  %v6871_v53 = vcombine.low %v649_v41, %v653_v43  ;;  %v210_v41 = vld [vmem:[#allocation6 + $0x188] sm:$0xff]  ;;  %v7962_v46 = vcombine.low %v7936_v23, %v7938_v24 }
  0xc5   :  { %v517_v48 = vld [vmem:[#allocation6 + $0xb20] sm:$0xff]  ;;  %3380 = vmatpush2.bf16.msra.mxu0 %v6743_v52  ;;  %v338_v43 = vld [vmem:[#allocation6 + $0x588] sm:$0xff]  ;;  %v6433_v23 = vcombine.low %v210_v41, %v214_v42 }
  0xc6   :  { %v641_v49 = vld [vmem:[#allocation6 + $0xf00] sm:$0xff]  ;;  %v6736_v56 = vcombine.high %v513_v47, %v517_v48  ;;  %3422 = vmatprep.subr.bf16.mxu1 %v6872_v50  ;;  %v6735_v2 = vcombine.low %v513_v47, %v517_v48  ;;  %v7966_v47 = vcombine.low %v7944_v27, %v7946_v28  ;;  %v6441_v48 = vcombine.low %v218_v60, %v222_v34  ;;  %v206_v52 = vld [vmem:[#allocation6 + $0x168] sm:$0xff] }
  0xc7   :  { %v645_v51 = vld [vmem:[#allocation6 + $0xf20] sm:$0xff]  ;;  %3423 = vmatpush2.bf16.msra.mxu1 %v6871_v53  ;;  %v6434_v50 = vcombine.high %v210_v41, %v214_v42  ;;  %v330_v53 = vld [vmem:[#allocation6 + $0x548] sm:$0xff]  ;;  %v6561_v24 = vcombine.low %v338_v43, %v342_v45 }
  0xc8   :  { %v505_v57 = vld [vmem:[#allocation6 + $0xac0] sm:$0xff]  ;;  %v6864_v0 = vcombine.high %v641_v49, %v645_v51  ;;  %3381 = vmatprep.subr.bf16.mxu0 %v6736_v56  ;;  %v6863_v3 = vcombine.low %v641_v49, %v645_v51  ;;  %v6569_v49 = vcombine.low %v346_v35, %v350_v37  ;;  %v202_v51 = vld [vmem:[#allocation6 + $0x148] sm:$0xff]  ;;  %v6562_v56 = vcombine.high %v338_v43, %v342_v45 }
  0xc9   :  { %v509_v61 = vld [vmem:[#allocation6 + $0xae0] sm:$0xff]  ;;  %3382 = vmatpush2.bf16.msra.mxu0 %v6735_v2  ;;  %v6426_v27 = vcombine.high %v202_v51, %v206_v52  ;;  %v194_v28 = vld [vmem:[#allocation6 + $0x108] sm:$0xff]  ;;  %v6425_v2 = vcombine.low %v202_v51, %v206_v52 }
  0xca   :  { %v633_v62 = vld [vmem:[#allocation6 + $0xec0] sm:$0xff]  ;;  %v6728_v4 = vcombine.high %v505_v57, %v509_v61  ;;  %3424 = vmatprep.subr.bf16.mxu1 %v6864_v0  ;;  %v6727_v10 = vcombine.low %v505_v57, %v509_v61  ;;  %v334_v57 = vld [vmem:[#allocation6 + $0x568] sm:$0xff] }
  0xcb   :  { %v637_v1 = vld [vmem:[#allocation6 + $0xee0] sm:$0xff]  ;;  %3425 = vmatpush2.bf16.msra.mxu1 %v6863_v3  ;;  %v198_v61 = vld [vmem:[#allocation6 + $0x128] sm:$0xff]  ;;  %v6554_v0 = vcombine.high %v330_v53, %v334_v57  ;;  %v6553_v3 = vcombine.low %v330_v53, %v334_v57 }
  0xcc   :  { %v497_v5 = vld [vmem:[#allocation6 + $0xa80] sm:$0xff]  ;;  %v6856_v8 = vcombine.high %v633_v62, %v637_v1  ;;  %3383 = vmatprep.subr.bf16.mxu0 %v6728_v4  ;;  %v6855_v11 = vcombine.low %v633_v62, %v637_v1  ;;  %v322_v62 = vld [vmem:[#allocation6 + $0x508] sm:$0xff]  ;;  %v6418_v4 = vcombine.high %v194_v28, %v198_v61 }
  0xcd   :  { %v501_v6 = vld [vmem:[#allocation6 + $0xaa0] sm:$0xff]  ;;  %3384 = vmatpush2.bf16.msra.mxu0 %v6727_v10  ;;  %v326_v1 = vld [vmem:[#allocation6 + $0x528] sm:$0xff]  ;;  %v6417_v10 = vcombine.low %v194_v28, %v198_v61 }
  0xce   :  { %v625_v7 = vld [vmem:[#allocation6 + $0xe80] sm:$0xff]  ;;  %v6720_v12 = vcombine.high %v497_v5, %v501_v6  ;;  %3426 = vmatprep.subr.bf16.mxu1 %v6856_v8  ;;  %v6719_v18 = vcombine.low %v497_v5, %v501_v6  ;;  %v186_v5 = vld [vmem:[#allocation6 + $0xc8] sm:$0xff]  ;;  %v6546_v8 = vcombine.high %v322_v62, %v326_v1 }
  0xcf   :  { %v629_v9 = vld [vmem:[#allocation6 + $0xea0] sm:$0xff]  ;;  %3427 = vmatpush2.bf16.msra.mxu1 %v6855_v11  ;;  %v190_v6 = vld [vmem:[#allocation6 + $0xe8] sm:$0xff]  ;;  %v6545_v11 = vcombine.low %v322_v62, %v326_v1 }
  0xd0   :  { %v489_v13 = vld [vmem:[#allocation6 + $0xa40] sm:$0xff]  ;;  %v6848_v16 = vcombine.high %v625_v7, %v629_v9  ;;  %3385 = vmatprep.subr.bf16.mxu0 %v6720_v12  ;;  %v6847_v19 = vcombine.low %v625_v7, %v629_v9  ;;  %v314_v7 = vld [vmem:[#allocation6 + $0x4c8] sm:$0xff]  ;;  %v6410_v12 = vcombine.high %v186_v5, %v190_v6 }
  0xd1   :  { %v493_v14 = vld [vmem:[#allocation6 + $0xa60] sm:$0xff]  ;;  %3386 = vmatpush2.bf16.msra.mxu0 %v6719_v18  ;;  %v318_v9 = vld [vmem:[#allocation6 + $0x4e8] sm:$0xff]  ;;  %v6409_v18 = vcombine.low %v186_v5, %v190_v6 }
  0xd2   :  { %v617_v15 = vld [vmem:[#allocation6 + $0xe40] sm:$0xff]  ;;  %v6712_v20 = vcombine.high %v489_v13, %v493_v14  ;;  %3428 = vmatprep.subr.bf16.mxu1 %v6848_v16  ;;  %v6711_v30 = vcombine.low %v489_v13, %v493_v14  ;;  %v178_v13 = vld [vmem:[#allocation6 + $0x88] sm:$0xff]  ;;  %v6538_v16 = vcombine.high %v314_v7, %v318_v9 }
  0xd3   :  { %v621_v17 = vld [vmem:[#allocation6 + $0xe60] sm:$0xff]  ;;  %3429 = vmatpush2.bf16.msra.mxu1 %v6847_v19  ;;  %v182_v14 = vld [vmem:[#allocation6 + $0xa8] sm:$0xff]  ;;  %v6537_v19 = vcombine.low %v314_v7, %v318_v9 }
  0xd4   :  { %v481_v22 = vld [vmem:[#allocation6 + $0xa00] sm:$0xff]  ;;  %v6840_v54 = vcombine.high %v617_v15, %v621_v17  ;;  %3387 = vmatprep.subr.bf16.mxu0 %v6712_v20  ;;  %v6839_v31 = vcombine.low %v617_v15, %v621_v17  ;;  %v306_v15 = vld [vmem:[#allocation6 + $0x488] sm:$0xff]  ;;  %v6402_v20 = vcombine.high %v178_v13, %v182_v14 }
  0xd5   :  { %v485_v26 = vld [vmem:[#allocation6 + $0xa20] sm:$0xff]  ;;  %3388 = vmatpush2.bf16.msra.mxu0 %v6711_v30  ;;  %v310_v17 = vld [vmem:[#allocation6 + $0x4a8] sm:$0xff]  ;;  %v6401_v30 = vcombine.low %v178_v13, %v182_v14 }
  0xd6   :  { %v609_v29 = vld [vmem:[#allocation6 + $0xe00] sm:$0xff]  ;;  %v6704_v59 = vcombine.high %v481_v22, %v485_v26  ;;  %3430 = vmatprep.subr.bf16.mxu1 %v6840_v54  ;;  %v6703_v38 = vcombine.low %v481_v22, %v485_v26  ;;  %v170_v22 = vld [vmem:[#allocation6 + $0x48] sm:$0xff]  ;;  %v6530_v54 = vcombine.high %v306_v15, %v310_v17 }
  0xd7   :  { %v613_v55 = vld [vmem:[#allocation6 + $0xe20] sm:$0xff]  ;;  %3431 = vmatpush2.bf16.msra.mxu1 %v6839_v31  ;;  %v174_v26 = vld [vmem:[#allocation6 + $0x68] sm:$0xff]  ;;  %v6529_v31 = vcombine.low %v306_v15, %v310_v17 }
  0xd8   :  { %v6832_v36 = vcombine.high %v609_v29, %v613_v55  ;;  %3389 = vmatprep.subr.bf16.mxu0 %v6704_v59  ;;  %v6831_v39 = vcombine.low %v609_v29, %v613_v55  ;;  %v298_v29 = vld [vmem:[#allocation6 + $0x448] sm:$0xff]  ;;  %v6394_v59 = vcombine.high %v170_v22, %v174_v26 }
  0xd9   :  { %3390 = vmatpush2.bf16.msra.mxu0 %v6703_v38  ;;  %v302_v55 = vld [vmem:[#allocation6 + $0x468] sm:$0xff]  ;;  %v6393_v38 = vcombine.low %v170_v22, %v174_v26 }
  0xda   :  { %3432 = vmatprep.subr.bf16.mxu1 %v6832_v36  ;;  %3445 = vmatprep.subr.bf16.mxu0 %v6442_v40  ;;  %v162_v60 = vld [vmem:[#allocation6 + $0x8] sm:$0xff]  ;;  %v6522_v36 = vcombine.high %v298_v29, %v302_v55 }
  0xdb   :  { %3433 = vmatpush2.bf16.msra.mxu1 %v6831_v39  ;;  %v166_v34 = vld [vmem:[#allocation6 + $0x28] sm:$0xff]  ;;  %v6521_v39 = vcombine.low %v298_v29, %v302_v55 }
  0xdc   :  { %3488 = vmatprep.subr.bf16.mxu1 %v6570_v44  ;;  %3392 = vmatmul.mubr.bf16.vlgmr.msra.gmra.mxu0 %v7962_v46  ;;  %v290_v35 = vld [vmem:[#allocation6 + $0x408] sm:$0xff]  ;;  %v6386_v40 = vcombine.high %v162_v60, %v166_v34 }
  0xdd   :  { %3446 = vmatpush1.bf16.msra.mxu0 %v6441_v48  ;;  %3477 = vmatprep.mubr.bf16.mxu0 %v7920_v58  ;;  %v294_v37 = vld [vmem:[#allocation6 + $0x428] sm:$0xff]  ;;  %v6385_v48 = vcombine.low %v162_v60, %v166_v34 }
  0xde   :  { %3435 = vmatmul.mubr.bf16.vlgmr.msra.gmra.mxu1 %v7966_v47  ;;  %3447 = vmatprep.subr.bf16.mxu0 %v6434_v50  ;;  %v282_v41 = vld [vmem:[#allocation6 + $0x3c8] sm:$0xff]  ;;  %v6514_v44 = vcombine.high %v290_v35, %v294_v37 }
  0xdf   :  { %3489 = vmatpush1.bf16.msra.mxu1 %v6569_v49  ;;  %3520 = vmatprep.mubr.bf16.mxu1 %v7928_v63  ;;  %v286_v42 = vld [vmem:[#allocation6 + $0x3e8] sm:$0xff]  ;;  %v6513_v49 = vcombine.low %v290_v35, %v294_v37 }
  0xe0   :  { %3490 = vmatprep.subr.bf16.mxu1 %v6562_v56  ;;  %v410_v43 = vld [vmem:[#allocation6 + $0x7c8] sm:$0xff]  ;;  %v6506_v50 = vcombine.high %v282_v41, %v286_v42 }
  0xe1   :  { %3448 = vmatpush1.bf16.msra.mxu0 %v6433_v23  ;;  %v414_v45 = vld [vmem:[#allocation6 + $0x7e8] sm:$0xff]  ;;  %v6505_v23 = vcombine.low %v282_v41, %v286_v42 }
  0xe2   :  { %3449 = vmatprep.subr.bf16.mxu0 %v6426_v27  ;;  %v274_v51 = vld [vmem:[#allocation6 + $0x388] sm:$0xff]  ;;  %v6634_v56 = vcombine.high %v410_v43, %v414_v45 }
  0xe3   :  { %3491 = vmatpush1.bf16.msra.mxu1 %v6561_v24  ;;  %v278_v52 = vld [vmem:[#allocation6 + $0x3a8] sm:$0xff]  ;;  %v6633_v24 = vcombine.low %v410_v43, %v414_v45 }
  0xe4   :  { %3492 = vmatprep.subr.bf16.mxu1 %v6554_v0  ;;  %v402_v53 = vld [vmem:[#allocation6 + $0x788] sm:$0xff]  ;;  %v6498_v27 = vcombine.high %v274_v51, %v278_v52 }
  0xe5   :  { %3450 = vmatpush1.bf16.msra.mxu0 %v6425_v2  ;;  %v406_v57 = vld [vmem:[#allocation6 + $0x7a8] sm:$0xff]  ;;  %v6497_v2 = vcombine.low %v274_v51, %v278_v52 }
  0xe6   :  { %3451 = vmatprep.subr.bf16.mxu0 %v6418_v4  ;;  %v266_v28 = vld [vmem:[#allocation6 + $0x348] sm:$0xff]  ;;  %v6626_v0 = vcombine.high %v402_v53, %v406_v57 }
  0xe7   :  { %3493 = vmatpush1.bf16.msra.mxu1 %v6553_v3  ;;  %v270_v61 = vld [vmem:[#allocation6 + $0x368] sm:$0xff]  ;;  %v6625_v3 = vcombine.low %v402_v53, %v406_v57 }
  0xe8   :  { %3494 = vmatprep.subr.bf16.mxu1 %v6546_v8  ;;  %v394_v62 = vld [vmem:[#allocation6 + $0x748] sm:$0xff]  ;;  %v6490_v4 = vcombine.high %v266_v28, %v270_v61 }
  0xe9   :  { %3452 = vmatpush1.bf16.msra.mxu0 %v6417_v10  ;;  %v398_v1 = vld [vmem:[#allocation6 + $0x768] sm:$0xff]  ;;  %v6489_v10 = vcombine.low %v266_v28, %v270_v61 }
  0xea   :  { %3453 = vmatprep.subr.bf16.mxu0 %v6410_v12  ;;  %v258_v5 = vld [vmem:[#allocation6 + $0x308] sm:$0xff]  ;;  %v6618_v8 = vcombine.high %v394_v62, %v398_v1 }
  0xeb   :  { %3495 = vmatpush1.bf16.msra.mxu1 %v6545_v11  ;;  %v262_v6 = vld [vmem:[#allocation6 + $0x328] sm:$0xff]  ;;  %v6617_v11 = vcombine.low %v394_v62, %v398_v1 }
  0xec   :  { %3496 = vmatprep.subr.bf16.mxu1 %v6538_v16  ;;  %v386_v7 = vld [vmem:[#allocation6 + $0x708] sm:$0xff]  ;;  %v6482_v12 = vcombine.high %v258_v5, %v262_v6 }
  0xed   :  { %3454 = vmatpush1.bf16.msra.mxu0 %v6409_v18  ;;  %v390_v9 = vld [vmem:[#allocation6 + $0x728] sm:$0xff]  ;;  %v6481_v18 = vcombine.low %v258_v5, %v262_v6 }
  0xee   :  { %3455 = vmatprep.subr.bf16.mxu0 %v6402_v20  ;;  %v250_v13 = vld [vmem:[#allocation6 + $0x2c8] sm:$0xff]  ;;  %v6610_v16 = vcombine.high %v386_v7, %v390_v9 }
  0xef   :  { %3497 = vmatpush1.bf16.msra.mxu1 %v6537_v19  ;;  %v254_v14 = vld [vmem:[#allocation6 + $0x2e8] sm:$0xff]  ;;  %v6609_v19 = vcombine.low %v386_v7, %v390_v9 }
  0xf0   :  { %3498 = vmatprep.subr.bf16.mxu1 %v6530_v54  ;;  %v378_v15 = vld [vmem:[#allocation6 + $0x6c8] sm:$0xff]  ;;  %v6474_v20 = vcombine.high %v250_v13, %v254_v14 }
  0xf1   :  { %3456 = vmatpush1.bf16.msra.mxu0 %v6401_v30  ;;  %v382_v17 = vld [vmem:[#allocation6 + $0x6e8] sm:$0xff]  ;;  %v6473_v30 = vcombine.low %v250_v13, %v254_v14 }
  0xf2   :  { %3457 = vmatprep.subr.bf16.mxu0 %v6394_v59  ;;  %v242_v22 = vld [vmem:[#allocation6 + $0x288] sm:$0xff]  ;;  %v6602_v54 = vcombine.high %v378_v15, %v382_v17 }
  0xf3   :  { %3499 = vmatpush1.bf16.msra.mxu1 %v6529_v31  ;;  %v246_v26 = vld [vmem:[#allocation6 + $0x2a8] sm:$0xff]  ;;  %v6601_v31 = vcombine.low %v378_v15, %v382_v17 }
  0xf4   :  { %3500 = vmatprep.subr.bf16.mxu1 %v6522_v36  ;;  %v370_v29 = vld [vmem:[#allocation6 + $0x688] sm:$0xff]  ;;  %v6466_v59 = vcombine.high %v242_v22, %v246_v26 }
  0xf5   :  { %3458 = vmatpush1.bf16.msra.mxu0 %v6393_v38  ;;  %v374_v55 = vld [vmem:[#allocation6 + $0x6a8] sm:$0xff]  ;;  %v6465_v38 = vcombine.low %v242_v22, %v246_v26 }
  0xf6   :  { %3459 = vmatprep.subr.bf16.mxu0 %v6386_v40  ;;  %v234_v60 = vld [vmem:[#allocation6 + $0x248] sm:$0xff]  ;;  %v6594_v36 = vcombine.high %v370_v29, %v374_v55 }
  0xf7   :  { %3501 = vmatpush1.bf16.msra.mxu1 %v6521_v39  ;;  %v238_v34 = vld [vmem:[#allocation6 + $0x268] sm:$0xff]  ;;  %v6593_v39 = vcombine.low %v370_v29, %v374_v55 }
  0xf8   :  { %3502 = vmatprep.subr.bf16.mxu1 %v6514_v44  ;;  %v362_v35 = vld [vmem:[#allocation6 + $0x648] sm:$0xff]  ;;  %v6458_v40 = vcombine.high %v234_v60, %v238_v34 }
  0xf9   :  { %3460 = vmatpush1.bf16.msra.mxu0 %v6385_v48  ;;  %v366_v37 = vld [vmem:[#allocation6 + $0x668] sm:$0xff]  ;;  %v6457_v48 = vcombine.low %v234_v60, %v238_v34 }
  0xfa   :  { %3461 = vmatprep.subr.bf16.mxu0 %v6506_v50  ;;  %v226_v41 = vld [vmem:[#allocation6 + $0x208] sm:$0xff]  ;;  %v6586_v44 = vcombine.high %v362_v35, %v366_v37 }
  0xfb   :  { %3503 = vmatpush1.bf16.msra.mxu1 %v6513_v49  ;;  %v230_v42 = vld [vmem:[#allocation6 + $0x228] sm:$0xff]  ;;  %v6585_v49 = vcombine.low %v362_v35, %v366_v37 }
  0xfc   :  { %3504 = vmatprep.subr.bf16.mxu1 %v6634_v56  ;;  %v354_v43 = vld [vmem:[#allocation6 + $0x608] sm:$0xff]  ;;  %v6450_v50 = vcombine.high %v226_v41, %v230_v42 }
  0xfd   :  { %3462 = vmatpush2.bf16.msra.mxu0 %v6505_v23  ;;  %v358_v45 = vld [vmem:[#allocation6 + $0x628] sm:$0xff]  ;;  %v6449_v23 = vcombine.low %v226_v41, %v230_v42 }
  0xfe   :  { %3463 = vmatprep.subr.bf16.mxu0 %v6498_v27  ;;  %v474_v51 = vld [vmem:[#allocation6 + $0x9c8] sm:$0xff]  ;;  %v6578_v56 = vcombine.high %v354_v43, %v358_v45 }
  0xff   :  { %3505 = vmatpush2.bf16.msra.mxu1 %v6633_v24  ;;  %v478_v52 = vld [vmem:[#allocation6 + $0x9e8] sm:$0xff]  ;;  %v6577_v24 = vcombine.low %v354_v43, %v358_v45 }
 0x100   :  { %3506 = vmatprep.subr.bf16.mxu1 %v6626_v0  ;;  %v602_v53 = vld [vmem:[#allocation6 + $0xdc8] sm:$0xff]  ;;  %v6698_v27 = vcombine.high %v474_v51, %v478_v52 }
 0x101   :  { %3464 = vmatpush2.bf16.msra.mxu0 %v6497_v2  ;;  %v606_v57 = vld [vmem:[#allocation6 + $0xde8] sm:$0xff]  ;;  %v6697_v2 = vcombine.low %v474_v51, %v478_v52 }
 0x102   :  { %3465 = vmatprep.subr.bf16.mxu0 %v6490_v4  ;;  %v466_v28 = vld [vmem:[#allocation6 + $0x988] sm:$0xff]  ;;  %v6826_v0 = vcombine.high %v602_v53, %v606_v57 }
 0x103   :  { %3507 = vmatpush2.bf16.msra.mxu1 %v6625_v3  ;;  %v470_v61 = vld [vmem:[#allocation6 + $0x9a8] sm:$0xff]  ;;  %v6825_v3 = vcombine.low %v602_v53, %v606_v57 }
 0x104   :  { %3508 = vmatprep.subr.bf16.mxu1 %v6618_v8  ;;  %v594_v62 = vld [vmem:[#allocation6 + $0xd88] sm:$0xff]  ;;  %v6690_v4 = vcombine.high %v466_v28, %v470_v61 }
 0x105   :  { %3466 = vmatpush2.bf16.msra.mxu0 %v6489_v10  ;;  %v598_v1 = vld [vmem:[#allocation6 + $0xda8] sm:$0xff]  ;;  %v6689_v10 = vcombine.low %v466_v28, %v470_v61 }
 0x106   :  { %3467 = vmatprep.subr.bf16.mxu0 %v6482_v12  ;;  %v458_v5 = vld [vmem:[#allocation6 + $0x948] sm:$0xff]  ;;  %v6818_v8 = vcombine.high %v594_v62, %v598_v1 }
 0x107   :  { %3509 = vmatpush2.bf16.msra.mxu1 %v6617_v11  ;;  %v462_v6 = vld [vmem:[#allocation6 + $0x968] sm:$0xff]  ;;  %v6817_v11 = vcombine.low %v594_v62, %v598_v1 }
 0x108   :  { %3510 = vmatprep.subr.bf16.mxu1 %v6610_v16  ;;  %v586_v7 = vld [vmem:[#allocation6 + $0xd48] sm:$0xff]  ;;  %v6682_v12 = vcombine.high %v458_v5, %v462_v6 }
 0x109   :  { %3468 = vmatpush2.bf16.msra.mxu0 %v6481_v18  ;;  %v590_v9 = vld [vmem:[#allocation6 + $0xd68] sm:$0xff]  ;;  %v6681_v18 = vcombine.low %v458_v5, %v462_v6 }
 0x10a   :  { %3469 = vmatprep.subr.bf16.mxu0 %v6474_v20  ;;  %v450_v13 = vld [vmem:[#allocation6 + $0x908] sm:$0xff]  ;;  %v6810_v14 = vcombine.high %v586_v7, %v590_v9 }
 0x10b   :  { %3511 = vmatpush2.bf16.msra.mxu1 %v6609_v19  ;;  %v454_v15 = vld [vmem:[#allocation6 + $0x928] sm:$0xff]  ;;  %v6809_v19 = vcombine.low %v586_v7, %v590_v9 }
 0x10c   :  { %3512 = vmatprep.subr.bf16.mxu1 %v6602_v54  ;;  %v578_v16 = vld [vmem:[#allocation6 + $0xd08] sm:$0xff]  ;;  %v6674_v20 = vcombine.high %v450_v13, %v454_v15 }
 0x10d   :  { %3470 = vmatpush2.bf16.msra.mxu0 %v6473_v30  ;;  %v582_v17 = vld [vmem:[#allocation6 + $0xd28] sm:$0xff]  ;;  %v6673_v30 = vcombine.low %v450_v13, %v454_v15 }
 0x10e   :  { %3471 = vmatprep.subr.bf16.mxu0 %v6466_v59  ;;  %v442_v22 = vld [vmem:[#allocation6 + $0x8c8] sm:$0xff]  ;;  %v6802_v54 = vcombine.high %v578_v16, %v582_v17 }
 0x10f   :  { %3513 = vmatpush2.bf16.msra.mxu1 %v6601_v31  ;;  %v446_v26 = vld [vmem:[#allocation6 + $0x8e8] sm:$0xff]  ;;  %v6801_v31 = vcombine.low %v578_v16, %v582_v17 }
 0x110   :  { %3514 = vmatprep.subr.bf16.mxu1 %v6594_v36  ;;  %v570_v29 = vld [vmem:[#allocation6 + $0xcc8] sm:$0xff]  ;;  %v6666_v59 = vcombine.high %v442_v22, %v446_v26 }
 0x111   :  { %3472 = vmatpush2.bf16.msra.mxu0 %v6465_v38  ;;  %v574_v55 = vld [vmem:[#allocation6 + $0xce8] sm:$0xff]  ;;  %v6665_v38 = vcombine.low %v442_v22, %v446_v26 }
 0x112   :  { %3473 = vmatprep.subr.bf16.mxu0 %v6458_v40  ;;  %v434_v60 = vld [vmem:[#allocation6 + $0x888] sm:$0xff]  ;;  %v6794_v36 = vcombine.high %v570_v29, %v574_v55 }
 0x113   :  { %3515 = vmatpush2.bf16.msra.mxu1 %v6593_v39  ;;  %v438_v34 = vld [vmem:[#allocation6 + $0x8a8] sm:$0xff]  ;;  %v6793_v39 = vcombine.low %v570_v29, %v574_v55 }
 0x114   :  { %3516 = vmatprep.subr.bf16.mxu1 %v6586_v44  ;;  %v562_v35 = vld [vmem:[#allocation6 + $0xc88] sm:$0xff]  ;;  %v6658_v40 = vcombine.high %v434_v60, %v438_v34 }
 0x115   :  { %3474 = vmatpush2.bf16.msra.mxu0 %v6457_v48  ;;  %v566_v37 = vld [vmem:[#allocation6 + $0xca8] sm:$0xff]  ;;  %v6657_v48 = vcombine.low %v434_v60, %v438_v34 }
 0x116   :  { %3475 = vmatprep.subr.bf16.mxu0 %v6450_v50  ;;  %v426_v41 = vld [vmem:[#allocation6 + $0x848] sm:$0xff]  ;;  %v6786_v44 = vcombine.high %v562_v35, %v566_v37 }
 0x117   :  { %3517 = vmatpush2.bf16.msra.mxu1 %v6585_v49  ;;  %v430_v42 = vld [vmem:[#allocation6 + $0x868] sm:$0xff]  ;;  %v6785_v49 = vcombine.low %v562_v35, %v566_v37 }
 0x118   :  { %3518 = vmatprep.subr.bf16.mxu1 %v6578_v56  ;;  %v554_v43 = vld [vmem:[#allocation6 + $0xc48] sm:$0xff]  ;;  %v6650_v50 = vcombine.high %v426_v41, %v430_v42 }
 0x119   :  { %3476 = vmatpush2.bf16.msra.mxu0 %v6449_v23  ;;  %v558_v45 = vld [vmem:[#allocation6 + $0xc68] sm:$0xff]  ;;  %v6649_v23 = vcombine.low %v426_v41, %v430_v42 }
 0x11a   :  { %3531 = vmatprep.subr.bf16.mxu0 %v6698_v27  ;;  %v418_v51 = vld [vmem:[#allocation6 + $0x808] sm:$0xff]  ;;  %v6778_v56 = vcombine.high %v554_v43, %v558_v45 }
 0x11b   :  { %3519 = vmatpush2.bf16.msra.mxu1 %v6577_v24  ;;  %v422_v52 = vld [vmem:[#allocation6 + $0x828] sm:$0xff]  ;;  %v6777_v24 = vcombine.low %v554_v43, %v558_v45 }
 0x11c   :  { %3574 = vmatprep.subr.bf16.mxu1 %v6826_v0  ;;  %3478 = vmatmul.mubr.bf16.vlgmr.msra.gmra.mxu0 %v7934_v21  ;;  %v546_v53 = vld [vmem:[#allocation6 + $0xc08] sm:$0xff]  ;;  %v6642_v27 = vcombine.high %v418_v51, %v422_v52 }
 0x11d   :  { %3532 = vmatpush1.bf16.msra.mxu0 %v6697_v2  ;;  %3563 = vmatprep.mubr.bf16.mxu0 %v7950_v32  ;;  %v550_v57 = vld [vmem:[#allocation6 + $0xc28] sm:$0xff]  ;;  %v6641_v2 = vcombine.low %v418_v51, %v422_v52 }
 0x11e   :  { %3521 = vmatmul.mubr.bf16.vlgmr.msra.gmra.mxu1 %v7942_v25  ;;  %3533 = vmatprep.subr.bf16.mxu0 %v6690_v4  ;;  %v538_v28 = vld [vmem:[#allocation6 + $0xbc8] sm:$0xff]  ;;  %v6770_v0 = vcombine.high %v546_v53, %v550_v57 }
 0x11f   :  { %3575 = vmatpush1.bf16.msra.mxu1 %v6825_v3  ;;  %3606 = vmatprep.mubr.bf16.mxu1 %v7955_v33  ;;  %v542_v61 = vld [vmem:[#allocation6 + $0xbe8] sm:$0xff]  ;;  %v6769_v3 = vcombine.low %v546_v53, %v550_v57 }
 0x120   :  { %3576 = vmatprep.subr.bf16.mxu1 %v6818_v8  ;;  %v666_v62 = vld [vmem:[#allocation6 + $0xfc8] sm:$0xff]  ;;  %v6762_v4 = vcombine.high %v538_v28, %v542_v61 }
 0x121   :  { %3534 = vmatpush1.bf16.msra.mxu0 %v6689_v10  ;;  %v670_v1 = vld [vmem:[#allocation6 + $0xfe8] sm:$0xff]  ;;  %v6761_v10 = vcombine.low %v538_v28, %v542_v61 }
 0x122   :  { %3535 = vmatprep.subr.bf16.mxu0 %v6682_v12  ;;  %v530_v5 = vld [vmem:[#allocation6 + $0xb88] sm:$0xff]  ;;  %v6890_v8 = vcombine.high %v666_v62, %v670_v1 }
 0x123   :  { %3577 = vmatpush1.bf16.msra.mxu1 %v6817_v11  ;;  %v534_v6 = vld [vmem:[#allocation6 + $0xba8] sm:$0xff]  ;;  %v6889_v11 = vcombine.low %v666_v62, %v670_v1 }
 0x124   :  { %3578 = vmatprep.subr.bf16.mxu1 %v6810_v14  ;;  %v658_v7 = vld [vmem:[#allocation6 + $0xf88] sm:$0xff]  ;;  %v6754_v12 = vcombine.high %v530_v5, %v534_v6 }
 0x125   :  { %3536 = vmatpush1.bf16.msra.mxu0 %v6681_v18  ;;  %v662_v9 = vld [vmem:[#allocation6 + $0xfa8] sm:$0xff]  ;;  %v6753_v18 = vcombine.low %v530_v5, %v534_v6  ;;  %v219_v6 = vld [vmem:[#allocation6 + $0x1d0] sm:$0xff] }
 0x126   :  { %3537 = vmatprep.subr.bf16.mxu0 %v6674_v20  ;;  %v522_v13 = vld [vmem:[#allocation6 + $0xb48] sm:$0xff]  ;;  %v6882_v16 = vcombine.high %v658_v7, %v662_v9 }
 0x127   :  { %3579 = vmatpush1.bf16.msra.mxu1 %v6809_v19  ;;  %v526_v14 = vld [vmem:[#allocation6 + $0xb68] sm:$0xff]  ;;  %v6881_v19 = vcombine.low %v658_v7, %v662_v9  ;;  %v223_v7 = vld [vmem:[#allocation6 + $0x1f0] sm:$0xff] }
 0x128   :  { %3580 = vmatprep.subr.bf16.mxu1 %v6802_v54  ;;  %v650_v15 = vld [vmem:[#allocation6 + $0xf48] sm:$0xff]  ;;  %v6746_v20 = vcombine.high %v522_v13, %v526_v14  ;;  %v351_v9 = vld [vmem:[#allocation6 + $0x5f0] sm:$0xff] }
 0x129   :  { %3538 = vmatpush1.bf16.msra.mxu0 %v6673_v30  ;;  %v654_v17 = vld [vmem:[#allocation6 + $0xf68] sm:$0xff]  ;;  %v6745_v30 = vcombine.low %v522_v13, %v526_v14  ;;  %v211_v14 = vld [vmem:[#allocation6 + $0x190] sm:$0xff] }
 0x12a   :  { %3539 = vmatprep.subr.bf16.mxu0 %v6666_v59  ;;  %v6874_v22 = vcombine.high %v650_v15, %v654_v17  ;;  %v514_v26 = vld [vmem:[#allocation6 + $0xb08] sm:$0xff] }
 0x12b   :  { %3581 = vmatpush1.bf16.msra.mxu1 %v6801_v31  ;;  %v518_v29 = vld [vmem:[#allocation6 + $0xb28] sm:$0xff]  ;;  %v6873_v31 = vcombine.low %v650_v15, %v654_v17  ;;  %v215_v15 = vld [vmem:[#allocation6 + $0x1b0] sm:$0xff] }
 0x12c   :  { %3582 = vmatprep.subr.bf16.mxu1 %v6794_v36  ;;  %v642_v54 = vld [vmem:[#allocation6 + $0xf08] sm:$0xff]  ;;  %v6738_v59 = vcombine.high %v514_v26, %v518_v29  ;;  %v343_v17 = vld [vmem:[#allocation6 + $0x5b0] sm:$0xff] }
 0x12d   :  { %3540 = vmatpush1.bf16.msra.mxu0 %v6665_v38  ;;  %v646_v55 = vld [vmem:[#allocation6 + $0xf28] sm:$0xff]  ;;  %v6737_v38 = vcombine.low %v514_v26, %v518_v29  ;;  %v203_v26 = vld [vmem:[#allocation6 + $0x150] sm:$0xff] }
 0x12e   :  { %3541 = vmatprep.subr.bf16.mxu0 %v6658_v40  ;;  %v6866_v60 = vcombine.high %v642_v54, %v646_v55  ;;  %v506_v34 = vld [vmem:[#allocation6 + $0xac8] sm:$0xff]  ;;  %v207_v29 = vld [vmem:[#allocation6 + $0x170] sm:$0xff] }
 0x12f   :  { %3583 = vmatpush1.bf16.msra.mxu1 %v6793_v39  ;;  %v510_v35 = vld [vmem:[#allocation6 + $0xae8] sm:$0xff]  ;;  %v6865_v39 = vcombine.low %v642_v54, %v646_v55  ;;  %v331_v55 = vld [vmem:[#allocation6 + $0x550] sm:$0xff] }
 0x130   :  { %3584 = vmatprep.subr.bf16.mxu1 %v6786_v44  ;;  %v634_v36 = vld [vmem:[#allocation6 + $0xec8] sm:$0xff]  ;;  %v6730_v40 = vcombine.high %v506_v34, %v510_v35 }
 0x131   :  { %3542 = vmatpush1.bf16.msra.mxu0 %v6657_v48  ;;  %v638_v37 = vld [vmem:[#allocation6 + $0xee8] sm:$0xff]  ;;  %v6729_v48 = vcombine.low %v506_v34, %v510_v35 }
 0x132   :  { %3543 = vmatprep.subr.bf16.mxu0 %v6650_v50  ;;  %v6858_v41 = vcombine.high %v634_v36, %v638_v37  ;;  %v498_v42 = vld [vmem:[#allocation6 + $0xa88] sm:$0xff] }
 0x133   :  { %3585 = vmatpush1.bf16.msra.mxu1 %v6785_v49  ;;  %v502_v43 = vld [vmem:[#allocation6 + $0xaa8] sm:$0xff]  ;;  %v6857_v49 = vcombine.low %v634_v36, %v638_v37  ;;  %v6428_v36 = vcombine.high %v203_v26, %v207_v29 }
 0x134   :  { %3586 = vmatprep.subr.bf16.mxu1 %v6778_v56  ;;  %v626_v44 = vld [vmem:[#allocation6 + $0xe88] sm:$0xff]  ;;  %v6722_v50 = vcombine.high %v498_v42, %v502_v43 }
 0x135   :  { %3544 = vmatpush1.bf16.msra.mxu0 %v6649_v23  ;;  %v630_v45 = vld [vmem:[#allocation6 + $0xea8] sm:$0xff]  ;;  %v6721_v23 = vcombine.low %v498_v42, %v502_v43  ;;  %v323_v42 = vld [vmem:[#allocation6 + $0x510] sm:$0xff] }
 0x136   :  { %3545 = vmatprep.subr.bf16.mxu0 %v6642_v27  ;;  %v6850_v51 = vcombine.high %v626_v44, %v630_v45  ;;  %v490_v52 = vld [vmem:[#allocation6 + $0xa48] sm:$0xff]  ;;  %v327_v43 = vld [vmem:[#allocation6 + $0x530] sm:$0xff] }
 0x137   :  { %3587 = vmatpush1.bf16.msra.mxu1 %v6777_v24  ;;  %v494_v53 = vld [vmem:[#allocation6 + $0xa68] sm:$0xff]  ;;  %v6849_v24 = vcombine.low %v626_v44, %v630_v45  ;;  %v6427_v45 = vcombine.low %v203_v26, %v207_v29  ;;  %v283_v26 = vld [vmem:[#allocation6 + $0x3d0] sm:$0xff] }
 0x138   :  { %3588 = vmatprep.subr.bf16.mxu1 %v6770_v0  ;;  %v618_v56 = vld [vmem:[#allocation6 + $0xe48] sm:$0xff]  ;;  %v6714_v27 = vcombine.high %v490_v52, %v494_v53  ;;  %v287_v29 = vld [vmem:[#allocation6 + $0x3f0] sm:$0xff] }
 0x139   :  { %3546 = vmatpush1.bf16.msra.mxu0 %v6641_v2  ;;  %v622_v57 = vld [vmem:[#allocation6 + $0xe68] sm:$0xff]  ;;  %v6713_v2 = vcombine.low %v490_v52, %v494_v53  ;;  %v187_v52 = vld [vmem:[#allocation6 + $0xd0] sm:$0xff] }
 0x13a   :  { %3547 = vmatprep.subr.bf16.mxu0 %v6762_v4  ;;  %v6842_v28 = vcombine.high %v618_v56, %v622_v57  ;;  %v482_v61 = vld [vmem:[#allocation6 + $0xa08] sm:$0xff]  ;;  %v191_v53 = vld [vmem:[#allocation6 + $0xf0] sm:$0xff] }
 0x13b   :  { %3589 = vmatpush1.bf16.msra.mxu1 %v6769_v3  ;;  %v486_v62 = vld [vmem:[#allocation6 + $0xa28] sm:$0xff]  ;;  %v6841_v3 = vcombine.low %v618_v56, %v622_v57  ;;  %v315_v56 = vld [vmem:[#allocation6 + $0x4d0] sm:$0xff] }
 0x13c   :  { %3590 = vmatprep.subr.bf16.mxu1 %v6890_v8  ;;  %v610_v0 = vld [vmem:[#allocation6 + $0xe08] sm:$0xff]  ;;  %v6706_v4 = vcombine.high %v482_v61, %v486_v62  ;;  %v347_v8 = vld [vmem:[#allocation6 + $0x5d0] sm:$0xff] }
 0x13d   :  { %3548 = vmatpush2.bf16.msra.mxu0 %v6761_v10  ;;  %v614_v1 = vld [vmem:[#allocation6 + $0xe28] sm:$0xff]  ;;  %v6705_v10 = vcombine.low %v482_v61, %v486_v62  ;;  %v6572_v13 = vcombine.high %v347_v8, %v351_v9  ;;  %v319_v57 = vld [vmem:[#allocation6 + $0x4f0] sm:$0xff] }
 0x13e   :  { %3549 = vmatprep.subr.bf16.mxu0 %v6754_v12  ;;  %v6834_v5 = vcombine.high %v610_v0, %v614_v1  ;;  %v6444_v12 = vcombine.high %v219_v6, %v223_v7  ;;  %v179_v61 = vld [vmem:[#allocation6 + $0x90] sm:$0xff] }
 0x13f   :  { %3591 = vmatpush2.bf16.msra.mxu1 %v6889_v11  ;;  %v6833_v11 = vcombine.low %v610_v0, %v614_v1  ;;  %v183_v62 = vld [vmem:[#allocation6 + $0xb0] sm:$0xff] }
 0x140   :  { %3592 = vmatprep.subr.bf16.mxu1 %v6882_v16  ;;  %v339_v16 = vld [vmem:[#allocation6 + $0x590] sm:$0xff] }
 0x141   :  { %3550 = vmatpush2.bf16.msra.mxu0 %v6753_v18  ;;  %v6443_v18 = vcombine.low %v219_v6, %v223_v7  ;;  %v6563_v35 = vcombine.low %v339_v16, %v343_v17  ;;  %v307_v0 = vld [vmem:[#allocation6 + $0x490] sm:$0xff] }
 0x142   :  { %3551 = vmatprep.subr.bf16.mxu0 %v6746_v20  ;;  %v6436_v20 = vcombine.high %v211_v14, %v215_v15  ;;  %v311_v1 = vld [vmem:[#allocation6 + $0x4b0] sm:$0xff] }
 0x143   :  { %3593 = vmatpush2.bf16.msra.mxu1 %v6881_v19  ;;  %v6571_v19 = vcombine.low %v347_v8, %v351_v9  ;;  %v171_v6 = vld [vmem:[#allocation6 + $0x50] sm:$0xff] }
 0x144   :  { %3594 = vmatprep.subr.bf16.mxu1 %v6874_v22  ;;  %v6564_v22 = vcombine.high %v339_v16, %v343_v17  ;;  %v175_v7 = vld [vmem:[#allocation6 + $0x70] sm:$0xff] }
 0x145   :  { %3552 = vmatpush2.bf16.msra.mxu0 %v6745_v30  ;;  %v335_v30 = vld [vmem:[#allocation6 + $0x570] sm:$0xff] }
 0x146   :  { %3553 = vmatprep.subr.bf16.mxu0 %v6738_v59  ;;  %v6435_v59 = vcombine.low %v211_v14, %v215_v15  ;;  %v299_v8 = vld [vmem:[#allocation6 + $0x450] sm:$0xff] }
 0x147   :  { %3595 = vmatpush2.bf16.msra.mxu1 %v6873_v31  ;;  %v303_v9 = vld [vmem:[#allocation6 + $0x470] sm:$0xff] }
 0x148   :  { %3596 = vmatprep.subr.bf16.mxu1 %v6866_v60  ;;  %v163_v14 = vld [vmem:[#allocation6 + $0x10] sm:$0xff] }
 0x149   :  { %3554 = vmatpush2.bf16.msra.mxu0 %v6737_v38  ;;  %v6556_v38 = vcombine.high %v331_v55, %v335_v30  ;;  %v167_v15 = vld [vmem:[#allocation6 + $0x30] sm:$0xff] }
 0x14a   :  { %3555 = vmatprep.subr.bf16.mxu0 %v6730_v40  ;;  %v199_v40 = vld [vmem:[#allocation6 + $0x130] sm:$0xff] }
 0x14b   :  { %3597 = vmatpush2.bf16.msra.mxu1 %v6865_v39  ;;  %v195_v39 = vld [vmem:[#allocation6 + $0x110] sm:$0xff] }
 0x14c   :  { %3598 = vmatprep.subr.bf16.mxu1 %v6858_v41  ;;  %v291_v16 = vld [vmem:[#allocation6 + $0x410] sm:$0xff] }
 0x14d   :  { %3556 = vmatpush2.bf16.msra.mxu0 %v6729_v48  ;;  %v295_v17 = vld [vmem:[#allocation6 + $0x430] sm:$0xff] }
 0x14e   :  { %3557 = vmatprep.subr.bf16.mxu0 %v6722_v50  ;;  %v6420_v50 = vcombine.high %v195_v39, %v199_v40 }
 0x14f   :  { %3599 = vmatpush2.bf16.msra.mxu1 %v6857_v49  ;;  %v6555_v49 = vcombine.low %v331_v55, %v335_v30  ;;  %v415_v55 = vld [vmem:[#allocation6 + $0x7f0] sm:$0xff]  ;;  %v6387_v30 = vcombine.low %v163_v14, %v167_v15 }
 0x150   :  { %3600 = vmatprep.subr.bf16.mxu1 %v6850_v51  ;;  %v6548_v51 = vcombine.high %v323_v42, %v327_v43 }
 0x151   :  { %3558 = vmatpush2.bf16.msra.mxu0 %v6721_v23  ;;  %v6419_v23 = vcombine.low %v195_v39, %v199_v40  ;;  %v403_v39 = vld [vmem:[#allocation6 + $0x790] sm:$0xff] }
 0x152   :  { %3559 = vmatprep.subr.bf16.mxu0 %v6714_v27  ;;  %v6412_v27 = vcombine.high %v187_v52, %v191_v53  ;;  %v407_v40 = vld [vmem:[#allocation6 + $0x7b0] sm:$0xff] }
 0x153   :  { %3601 = vmatpush2.bf16.msra.mxu1 %v6849_v24  ;;  %v6547_v24 = vcombine.low %v323_v42, %v327_v43 }
 0x154   :  { %3602 = vmatprep.subr.bf16.mxu1 %v6842_v28  ;;  %v6540_v28 = vcombine.high %v315_v56, %v319_v57 }
 0x155   :  { %3560 = vmatpush2.bf16.msra.mxu0 %v6713_v2  ;;  %v6411_v2 = vcombine.low %v187_v52, %v191_v53  ;;  %v6627_v53 = vcombine.low %v403_v39, %v407_v40 }
 0x156   :  { %3561 = vmatprep.subr.bf16.mxu0 %v6706_v4  ;;  %v6404_v4 = vcombine.high %v179_v61, %v183_v62 }
 0x157   :  { %3603 = vmatpush2.bf16.msra.mxu1 %v6841_v3  ;;  %v6539_v3 = vcombine.low %v315_v56, %v319_v57 }
 0x158   :  { %3604 = vmatprep.subr.bf16.mxu1 %v6834_v5  ;;  %v6532_v5 = vcombine.high %v307_v0, %v311_v1 }
 0x159   :  { %3562 = vmatpush2.bf16.msra.mxu0 %v6705_v10  ;;  %v6403_v10 = vcombine.low %v179_v61, %v183_v62 }
 0x15a   :  { %3617 = vmatprep.subr.bf16.mxu0 %v6444_v12  ;;  %v6396_v12 = vcombine.high %v171_v6, %v175_v7 }
 0x15b   :  { %3605 = vmatpush2.bf16.msra.mxu1 %v6833_v11  ;;  %v6531_v11 = vcombine.low %v307_v0, %v311_v1 }
 0x15c   :  { %3660 = vmatprep.subr.bf16.mxu1 %v6572_v13  ;;  %v3307_v54 = vpop.f32.mrf.mxu0  ;;  %3564 = vmatmul.mubr.bf16.vlgmr.msra.gmra.mxu0 %v7962_v46  ;;  %v6524_v13 = vcombine.high %v299_v8, %v303_v9 }
 0x15d   :  { %3618 = vmatpush1.bf16.msra.mxu0 %v6443_v18  ;;  %3649 = vmatprep.mubr.bf16.mxu0 %v7920_v58  ;;  %v6395_v18 = vcombine.low %v171_v6, %v175_v7 }
 0x15e   :  { %v3350_v31 = vpop.f32.mrf.mxu1  ;;  %3607 = vmatmul.mubr.bf16.vlgmr.msra.gmra.mxu1 %v7966_v47  ;;  %v7980_v34 = vpop.f32.mrf.mxu0  ;;  %3619 = vmatprep.subr.bf16.mxu0 %v6436_v20  ;;  %v6388_v20 = vcombine.high %v163_v14, %v167_v15 }
 0x15f   :  { %v7978_v60 = vadd.f32 %v3350_v31, %v3307_v54  ;;  %3661 = vmatpush1.bf16.msra.mxu1 %v6571_v19  ;;  %3692 = vmatprep.mubr.bf16.mxu1 %v7928_v63  ;;  %v6523_v19 = vcombine.low %v299_v8, %v303_v9  ;;  %v411_v54 = vld [vmem:[#allocation6 + $0x7d0] sm:$0xff]  ;;  %v6515_v31 = vcombine.low %v291_v16, %v295_v17 }
 0x160   :  { %v7982_v37 = vpop.f32.mrf.mxu1  ;;  %3662 = vmatprep.subr.bf16.mxu1 %v6564_v22  ;;  %v3311_v41 = vpop.f32.mrf.mxu0  ;;  %v6516_v22 = vcombine.high %v291_v16, %v295_v17  ;;  %v6635_v42 = vcombine.low %v411_v54, %v415_v55 }
 0x161   :  { %3620 = vmatpush1.bf16.msra.mxu0 %v6435_v59  ;;  %v6508_v59 = vcombine.high %v283_v26, %v287_v29 }
 0x162   :  { %v3354_v44 = vpop.f32.mrf.mxu1  ;;  %3621 = vmatprep.subr.bf16.mxu0 %v6428_v36  ;;  %v275_v36 = vld [vmem:[#allocation6 + $0x390] sm:$0xff] }
 0x163   :  { %v7986_v48 = vadd.f32 %v3354_v44, %v3311_v41  ;;  %3663 = vmatpush1.bf16.msra.mxu1 %v6563_v35  ;;  %v6636_v35 = vcombine.high %v411_v54, %v415_v55  ;;  %v6507_v41 = vcombine.low %v283_v26, %v287_v29  ;;  %v6628_v44 = vcombine.high %v403_v39, %v407_v40 }
 0x164   :  { %3664 = vmatprep.subr.bf16.mxu1 %v6556_v38  ;;  %v279_v38 = vld [vmem:[#allocation6 + $0x3b0] sm:$0xff] }
 0x165   :  { %3622 = vmatpush1.bf16.msra.mxu0 %v6427_v45  ;;  %v6500_v43 = vcombine.high %v275_v36, %v279_v38  ;;  %v267_v45 = vld [vmem:[#allocation6 + $0x350] sm:$0xff]  ;;  %v6499_v52 = vcombine.low %v275_v36, %v279_v38 }
 0x166   :  { %3623 = vmatprep.subr.bf16.mxu0 %v6420_v50  ;;  %v395_v50 = vld [vmem:[#allocation6 + $0x750] sm:$0xff] }
 0x167   :  { %3665 = vmatpush1.bf16.msra.mxu1 %v6555_v49  ;;  %v271_v49 = vld [vmem:[#allocation6 + $0x370] sm:$0xff] }
 0x168   :  { %3666 = vmatprep.subr.bf16.mxu1 %v6548_v51  ;;  %v399_v51 = vld [vmem:[#allocation6 + $0x770] sm:$0xff]  ;;  %v6492_v56 = vcombine.high %v267_v45, %v271_v49  ;;  %v6491_v61 = vcombine.low %v267_v45, %v271_v49 }
 0x169   :  { %3624 = vmatpush1.bf16.msra.mxu0 %v6419_v23  ;;  %v6620_v57 = vcombine.high %v395_v50, %v399_v51  ;;  %v259_v23 = vld [vmem:[#allocation6 + $0x310] sm:$0xff]  ;;  %v6619_v62 = vcombine.low %v395_v50, %v399_v51 }
 0x16a   :  { %3625 = vmatprep.subr.bf16.mxu0 %v6412_v27  ;;  %v387_v27 = vld [vmem:[#allocation6 + $0x710] sm:$0xff] }
 0x16b   :  { %3667 = vmatpush1.bf16.msra.mxu1 %v6547_v24  ;;  %v263_v24 = vld [vmem:[#allocation6 + $0x330] sm:$0xff] }
 0x16c   :  { %3668 = vmatprep.subr.bf16.mxu1 %v6540_v28  ;;  %v391_v28 = vld [vmem:[#allocation6 + $0x730] sm:$0xff]  ;;  %v6484_v0 = vcombine.high %v259_v23, %v263_v24  ;;  %v6483_v6 = vcombine.low %v259_v23, %v263_v24 }
 0x16d   :  { %3626 = vmatpush1.bf16.msra.mxu0 %v6411_v2  ;;  %v6612_v1 = vcombine.high %v387_v27, %v391_v28  ;;  %v251_v2 = vld [vmem:[#allocation6 + $0x2d0] sm:$0xff]  ;;  %v6611_v7 = vcombine.low %v387_v27, %v391_v28  ;;  %v7990_v28 = vpop.f32.mrf.mxu0 }
 0x16e   :  { %3627 = vmatprep.subr.bf16.mxu0 %v6404_v4  ;;  %v379_v4 = vld [vmem:[#allocation6 + $0x6d0] sm:$0xff] }
 0x16f   :  { %3669 = vmatpush1.bf16.msra.mxu1 %v6539_v3  ;;  %v255_v3 = vld [vmem:[#allocation6 + $0x2f0] sm:$0xff] }
 0x170   :  { %3670 = vmatprep.subr.bf16.mxu1 %v6532_v5  ;;  %v383_v5 = vld [vmem:[#allocation6 + $0x6f0] sm:$0xff]  ;;  %v6476_v8 = vcombine.high %v251_v2, %v255_v3  ;;  %v6475_v14 = vcombine.low %v251_v2, %v255_v3 }
 0x171   :  { %3628 = vmatpush1.bf16.msra.mxu0 %v6403_v10  ;;  %v6604_v9 = vcombine.high %v379_v4, %v383_v5  ;;  %v243_v10 = vld [vmem:[#allocation6 + $0x290] sm:$0xff]  ;;  %v6603_v15 = vcombine.low %v379_v4, %v383_v5 }
 0x172   :  { %3629 = vmatprep.subr.bf16.mxu0 %v6396_v12  ;;  %v371_v12 = vld [vmem:[#allocation6 + $0x690] sm:$0xff] }
 0x173   :  { %3671 = vmatpush1.bf16.msra.mxu1 %v6531_v11  ;;  %v247_v11 = vld [vmem:[#allocation6 + $0x2b0] sm:$0xff] }
 0x174   :  { %3672 = vmatprep.subr.bf16.mxu1 %v6524_v13  ;;  %v375_v13 = vld [vmem:[#allocation6 + $0x6b0] sm:$0xff]  ;;  %v6468_v16 = vcombine.high %v243_v10, %v247_v11  ;;  %v6467_v26 = vcombine.low %v243_v10, %v247_v11 }
 0x175   :  { %3630 = vmatpush1.bf16.msra.mxu0 %v6395_v18  ;;  %v6596_v17 = vcombine.high %v371_v12, %v375_v13  ;;  %v235_v18 = vld [vmem:[#allocation6 + $0x250] sm:$0xff]  ;;  %v6595_v29 = vcombine.low %v371_v12, %v375_v13 }
 0x176   :  { %3631 = vmatprep.subr.bf16.mxu0 %v6388_v20  ;;  %v363_v20 = vld [vmem:[#allocation6 + $0x650] sm:$0xff] }
 0x177   :  { %3673 = vmatpush1.bf16.msra.mxu1 %v6523_v19  ;;  %v239_v19 = vld [vmem:[#allocation6 + $0x270] sm:$0xff] }
 0x178   :  { %3674 = vmatprep.subr.bf16.mxu1 %v6516_v22  ;;  %v367_v22 = vld [vmem:[#allocation6 + $0x670] sm:$0xff]  ;;  %v6460_v54 = vcombine.high %v235_v18, %v239_v19  ;;  %v6459_v36 = vcombine.low %v235_v18, %v239_v19 }
 0x179   :  { %3632 = vmatpush1.bf16.msra.mxu0 %v6387_v30  ;;  %v6588_v55 = vcombine.high %v363_v20, %v367_v22  ;;  %v227_v30 = vld [vmem:[#allocation6 + $0x210] sm:$0xff]  ;;  %v6587_v38 = vcombine.low %v363_v20, %v367_v22 }
 0x17a   :  { %3633 = vmatprep.subr.bf16.mxu0 %v6508_v59  ;;  %v355_v59 = vld [vmem:[#allocation6 + $0x610] sm:$0xff] }
 0x17b   :  { %3675 = vmatpush1.bf16.msra.mxu1 %v6515_v31  ;;  %v231_v31 = vld [vmem:[#allocation6 + $0x230] sm:$0xff] }
 0x17c   :  { %3676 = vmatprep.subr.bf16.mxu1 %v6636_v35  ;;  %v359_v35 = vld [vmem:[#allocation6 + $0x630] sm:$0xff]  ;;  %v6452_v39 = vcombine.high %v227_v30, %v231_v31  ;;  %v6451_v49 = vcombine.low %v227_v30, %v231_v31 }
 0x17d   :  { %3634 = vmatpush2.bf16.msra.mxu0 %v6507_v41  ;;  %v6580_v40 = vcombine.high %v355_v59, %v359_v35  ;;  %v4014_v41 = vlaneseq  ;;  %v607_v45 = vld [vmem:[#allocation6 + $0xdf0] sm:$0xff]  ;;  %v6579_v50 = vcombine.low %v355_v59, %v359_v35 }
 0x17e   :  { %3635 = vmatprep.subr.bf16.mxu0 %v6500_v43  ;;  %v479_v43 = vld [vmem:[#allocation6 + $0x9f0] sm:$0xff] }
 0x17f   :  { %3677 = vmatpush2.bf16.msra.mxu1 %v6635_v42  ;;  %v475_v42 = vld [vmem:[#allocation6 + $0x9d0] sm:$0xff] }
 0x180   :  { %3678 = vmatprep.subr.bf16.mxu1 %v6628_v44  ;;  %v603_v44 = vld [vmem:[#allocation6 + $0xdd0] sm:$0xff]  ;;  %v6700_v51 = vcombine.high %v475_v42, %v479_v43  ;;  %v6699_v27 = vcombine.low %v475_v42, %v479_v43 }
 0x181   :  { %3636 = vmatpush2.bf16.msra.mxu0 %v6499_v52  ;;  %v7988_v52 = vshrl.u32 %v4014_v41, 7  ;;  %v595_v23 = vld [vmem:[#allocation6 + $0xd90] sm:$0xff] }
 0x182   :  { %3637 = vmatprep.subr.bf16.mxu0 %v6492_v56  ;;  %v467_v56 = vld [vmem:[#allocation6 + $0x990] sm:$0xff] }
 0x183   :  { %3679 = vmatpush2.bf16.msra.mxu1 %v6627_v53  ;;  %v6828_v53 = vcombine.high %v603_v44, %v607_v45  ;;  %v599_v24 = vld [vmem:[#allocation6 + $0xdb0] sm:$0xff] }
 0x184   :  { %3680 = vmatprep.subr.bf16.mxu1 %v6620_v57  ;;  %v471_v57 = vld [vmem:[#allocation6 + $0x9b0] sm:$0xff]  ;;  %v6820_v2 = vcombine.high %v595_v23, %v599_v24  ;;  %v6819_v13 = vcombine.low %v595_v23, %v599_v24 }
 0x185   :  { %3638 = vmatpush2.bf16.msra.mxu0 %v6491_v61  ;;  %v6827_v61 = vcombine.low %v603_v44, %v607_v45  ;;  %v459_v3 = vld [vmem:[#allocation6 + $0x950] sm:$0xff]  ;;  %v6691_v11 = vcombine.low %v467_v56, %v471_v57 }
 0x186   :  { %3639 = vmatprep.subr.bf16.mxu0 %v6484_v0  ;;  %v7992_v0 = vpop.f32.mrf.mxu1  ;;  %v463_v4 = vld [vmem:[#allocation6 + $0x970] sm:$0xff] }
 0x187   :  { %3681 = vmatpush2.bf16.msra.mxu1 %v6619_v62  ;;  %v6692_v62 = vcombine.high %v467_v56, %v471_v57  ;;  %v451_v18 = vld [vmem:[#allocation6 + $0x910] sm:$0xff] }
 0x188   :  { %3682 = vmatprep.subr.bf16.mxu1 %v6612_v1  ;;  %v4016_v1 = vsub.s32 0, %v7988_v52  ;;  %v455_v19 = vld [vmem:[#allocation6 + $0x930] sm:$0xff] }
 0x189   :  { %3640 = vmatpush2.bf16.msra.mxu0 %v6483_v6  ;;  %v7995_v6 = vld [vmem:[#allocation8] sm:$0xff]  ;;  %v579_v22 = vld [vmem:[#allocation6 + $0xd10] sm:$0xff]  ;;  %v6676_v31 = vcombine.high %v451_v18, %v455_v19  ;;  %v6675_v43 = vcombine.low %v451_v18, %v455_v19 }
 0x18a   :  { %3641 = vmatprep.subr.bf16.mxu0 %v6476_v8  ;;  %v591_v8 = vld [vmem:[#allocation6 + $0xd70] sm:$0xff] }
 0x18b   :  { %3683 = vmatpush2.bf16.msra.mxu1 %v6611_v7  ;;  %v587_v7 = vld [vmem:[#allocation6 + $0xd50] sm:$0xff] }
 0x18c   :  { %3684 = vmatprep.subr.bf16.mxu1 %v6604_v9  ;;  %v6811_v30 = vcombine.low %v587_v7, %v591_v8  ;;  %v575_v41 = vld [vmem:[#allocation6 + $0xcf0] sm:$0xff] }
 0x18d   :  { %3642 = vmatpush2.bf16.msra.mxu0 %v6475_v14  ;;  %v6684_v14 = vcombine.high %v459_v3, %v463_v4  ;;  %v563_v56 = vld [vmem:[#allocation6 + $0xc90] sm:$0xff] }
 0x18e   :  { %3643 = vmatprep.subr.bf16.mxu0 %v6468_v16  ;;  %v4017_v16 = vrot.slane %v7995_v6, %v4016_v1  ;;  %v567_v57 = vld [vmem:[#allocation6 + $0xcb0] sm:$0xff] }
 0x18f   :  { %3685 = vmatpush2.bf16.msra.mxu1 %v6603_v15 }
 0x190   :  { %3686 = vmatprep.subr.bf16.mxu1 %v6596_v17 }
 0x191   :  { %3644 = vmatpush2.bf16.msra.mxu0 %v6467_v26  ;;  %v583_v26 = vld [vmem:[#allocation6 + $0xd30] sm:$0xff] }
 0x192   :  { %3645 = vmatprep.subr.bf16.mxu0 %v6460_v54  ;;  %v6683_v54 = vcombine.low %v459_v3, %v463_v4  ;;  %v431_v3 = vld [vmem:[#allocation6 + $0x870] sm:$0xff] }
 0x193   :  { %3687 = vmatpush2.bf16.msra.mxu1 %v6595_v29  ;;  %v555_v4 = vld [vmem:[#allocation6 + $0xc50] sm:$0xff] }
 0x194   :  { %3688 = vmatprep.subr.bf16.mxu1 %v6588_v55 }
 0x195   :  { %3646 = vmatpush2.bf16.msra.mxu0 %v6459_v36  ;;  %v6804_v36 = vcombine.high %v579_v22, %v583_v26 }
 0x196   :  { %3647 = vmatprep.subr.bf16.mxu0 %v6452_v39  ;;  %v447_v39 = vld [vmem:[#allocation6 + $0x8f0] sm:$0xff] }
 0x197   :  { %3689 = vmatpush2.bf16.msra.mxu1 %v6587_v38  ;;  %v443_v38 = vld [vmem:[#allocation6 + $0x8d0] sm:$0xff] }
 0x198   :  { %3690 = vmatprep.subr.bf16.mxu1 %v6580_v40  ;;  %v571_v40 = vld [vmem:[#allocation6 + $0xcd0] sm:$0xff]  ;;  %v6668_v44 = vcombine.high %v443_v38, %v447_v39  ;;  %v6667_v24 = vcombine.low %v443_v38, %v447_v39 }
 0x199   :  { %3648 = vmatpush2.bf16.msra.mxu0 %v6451_v49  ;;  %v663_v38 = vld [vmem:[#allocation6 + $0xfb0] sm:$0xff] }
 0x19a   :  { %3703 = vmatprep.subr.bf16.mxu0 %v6700_v51  ;;  %v435_v51 = vld [vmem:[#allocation6 + $0x890] sm:$0xff] }
 0x19b   :  { %3691 = vmatpush2.bf16.msra.mxu1 %v6579_v50  ;;  %v6796_v50 = vcombine.high %v571_v40, %v575_v41 }
 0x19c   :  { %3746 = vmatprep.subr.bf16.mxu1 %v6828_v53  ;;  %v3393_v5 = vpop.f32.mrf.mxu0  ;;  %3650 = vmatmul.mubr.bf16.vlgmr.msra.gmra.mxu0 %v7934_v21  ;;  %v439_v53 = vld [vmem:[#allocation6 + $0x8b0] sm:$0xff] }
 0x19d   :  { %v3394_v9 = vadd.f32 %v3393_v5, %v7978_v60  ;;  %3704 = vmatpush1.bf16.msra.mxu0 %v6699_v27  ;;  %v6812_v60 = vcombine.high %v587_v7, %v591_v8  ;;  %3735 = vmatprep.mubr.bf16.mxu0 %v7950_v32  ;;  %v6795_v27 = vcombine.low %v571_v40, %v575_v41  ;;  %v559_v5 = vld [vmem:[#allocation6 + $0xc70] sm:$0xff] }
 0x19e   :  { %v3436_v10 = vpop.f32.mrf.mxu1  ;;  %3693 = vmatmul.mubr.bf16.vlgmr.msra.gmra.mxu1 %v7942_v25  ;;  %v8000_v12 = vpop.f32.mrf.mxu0  ;;  %3705 = vmatprep.subr.bf16.mxu0 %v6692_v62  ;;  %v6788_v62 = vcombine.high %v563_v56, %v567_v57  ;;  %v6659_v7 = vcombine.low %v435_v51, %v439_v53  ;;  %v6787_v8 = vcombine.low %v563_v56, %v567_v57  ;;  %v515_v56 = vld [vmem:[#allocation6 + $0xb10] sm:$0xff] }
 0x19f   :  { %3747 = vmatpush1.bf16.msra.mxu1 %v6827_v61  ;;  %v3437_v15 = vadd.f32 %v3436_v10, %v3394_v9  ;;  %3778 = vmatprep.mubr.bf16.mxu1 %v7955_v33  ;;  %v6660_v61 = vcombine.high %v435_v51, %v439_v53  ;;  %v6780_v10 = vcombine.high %v555_v4, %v559_v5  ;;  %v519_v57 = vld [vmem:[#allocation6 + $0xb30] sm:$0xff] }
 0x1a0   :  { %v8005_v17 = vpop.f32.mrf.mxu1  ;;  %3748 = vmatprep.subr.bf16.mxu1 %v6820_v2  ;;  %v3397_v20 = vpop.f32.mrf.mxu0  ;;  %v427_v2 = vld [vmem:[#allocation6 + $0x850] sm:$0xff] }
 0x1a1   :  { %v3398_v29 = vadd.f32 %v3397_v20, %v7986_v48  ;;  %3706 = vmatpush1.bf16.msra.mxu0 %v6691_v11  ;;  %v4054_v59 = vadd.f32 %v4017_v16, %v3437_v15  ;;  %v6803_v48 = vcombine.low %v579_v22, %v583_v26  ;;  %v6652_v9 = vcombine.high %v427_v2, %v431_v3  ;;  %v419_v11 = vld [vmem:[#allocation6 + $0x810] sm:$0xff] }
 0x1a2   :  { %v3440_v55 = vpop.f32.mrf.mxu1  ;;  %3707 = vmatprep.subr.bf16.mxu0 %v6684_v14  ;;  %v547_v14 = vld [vmem:[#allocation6 + $0xc10] sm:$0xff] }
 0x1a3   :  { %3749 = vmatpush1.bf16.msra.mxu1 %v6819_v13  ;;  %v3441_v35 = vadd.f32 %v3440_v55, %v3398_v29  ;;  %v4070_v45 = vmax.f32 %v4054_v59, 0.0  ;;  %v423_v13 = vld [vmem:[#allocation6 + $0x830] sm:$0xff] }
 0x1a4   :  { %3750 = vmatprep.subr.bf16.mxu1 %v6812_v60  ;;  %v551_v15 = vld [vmem:[#allocation6 + $0xc30] sm:$0xff]  ;;  %v6779_v60 = vcombine.low %v555_v4, %v559_v5  ;;  %v6644_v18 = vcombine.high %v419_v11, %v423_v13 }
 0x1a5   :  { %v4062_v42 = vadd.f32 %v4017_v16, %v3441_v35  ;;  %3708 = vmatpush1.bf16.msra.mxu0 %v6683_v54  ;;  %v6651_v16 = vcombine.low %v427_v2, %v431_v3  ;;  %v6772_v19 = vcombine.high %v547_v14, %v551_v15  ;;  %v539_v20 = vld [vmem:[#allocation6 + $0xbd0] sm:$0xff]  ;;  %v6643_v54 = vcombine.low %v419_v11, %v423_v13 }
 0x1a6   :  { %3709 = vmatprep.subr.bf16.mxu0 %v6676_v31  ;;  %v543_v22 = vld [vmem:[#allocation6 + $0xbf0] sm:$0xff]  ;;  %v6771_v55 = vcombine.low %v547_v14, %v551_v15  ;;  %v6740_v2 = vcombine.high %v515_v56, %v519_v57 }
 0x1a7   :  { %3751 = vmatpush1.bf16.msra.mxu1 %v6811_v30  ;;  %v4078_v49 = vmax.f32 %v4062_v42, 0.0  ;;  %v667_v26 = vld [vmem:[#allocation6 + $0xfd0] sm:$0xff]  ;;  %v6764_v30 = vcombine.high %v539_v20, %v543_v22  ;;  %v6763_v39 = vcombine.low %v539_v20, %v543_v22 }
 0x1a8   :  { %3752 = vmatprep.subr.bf16.mxu1 %v6804_v36  ;;  %v671_v29 = vld [vmem:[#allocation6 + $0xff0] sm:$0xff] }
 0x1a9   :  { %v8010_v23 = vpack.c.bf16 %v4078_v49, %v4070_v45  ;;  %3710 = vmatpush1.bf16.msra.mxu0 %v6675_v43  ;;  %v6892_v31 = vcombine.high %v667_v26, %v671_v29  ;;  %v531_v59 = vld [vmem:[#allocation6 + $0xb90] sm:$0xff]  ;;  %v6891_v40 = vcombine.low %v667_v26, %v671_v29 }
 0x1aa   :  { %3711 = vmatprep.subr.bf16.mxu0 %v6668_v44  ;;  %v535_v35 = vld [vmem:[#allocation6 + $0xbb0] sm:$0xff] }
 0x1ab   :  { %3753 = vmatpush1.bf16.msra.mxu1 %v6803_v48  ;;  %v659_v36 = vld [vmem:[#allocation6 + $0xf90] sm:$0xff]  ;;  %v6756_v41 = vcombine.high %v531_v59, %v535_v35  ;;  %v6755_v49 = vcombine.low %v531_v59, %v535_v35 }
 0x1ac   :  { %3754 = vmatprep.subr.bf16.mxu1 %v6796_v50  ;;  %v6884_v42 = vcombine.high %v659_v36, %v663_v38  ;;  %v523_v43 = vld [vmem:[#allocation6 + $0xb50] sm:$0xff]  ;;  %v6883_v50 = vcombine.low %v659_v36, %v663_v38 }
 0x1ad   :  { %3712 = vmatpush1.bf16.msra.mxu0 %v6667_v24  ;;  %v527_v48 = vld [vmem:[#allocation6 + $0xb70] sm:$0xff] }
 0x1ae   :  { %3713 = vmatprep.subr.bf16.mxu0 %v6660_v61  ;;  %v651_v44 = vld [vmem:[#allocation6 + $0xf50] sm:$0xff]  ;;  %v6748_v51 = vcombine.high %v523_v43, %v527_v48  ;;  %v6747_v61 = vcombine.low %v523_v43, %v527_v48 }
 0x1af   :  { %3755 = vmatpush1.bf16.msra.mxu1 %v6795_v27  ;;  %v655_v45 = vld [vmem:[#allocation6 + $0xf70] sm:$0xff] }
 0x1b0   :  { %3756 = vmatprep.subr.bf16.mxu1 %v6788_v62  ;;  %v6876_v53 = vcombine.high %v651_v44, %v655_v45  ;;  %v643_v24 = vld [vmem:[#allocation6 + $0xf10] sm:$0xff]  ;;  %v6875_v62 = vcombine.low %v651_v44, %v655_v45  ;;  %v220_v44 = vld [vmem:[#allocation6 + $0x1d8] sm:$0xff] }
 0x1b1   :  { %3714 = vmatpush1.bf16.msra.mxu0 %v6659_v7  ;;  %v647_v27 = vld [vmem:[#allocation6 + $0xf30] sm:$0xff]  ;;  %v224_v45 = vld [vmem:[#allocation6 + $0x1f8] sm:$0xff] }
 0x1b2   :  { %3715 = vmatprep.subr.bf16.mxu0 %v6652_v9  ;;  %v6868_v3 = vcombine.high %v643_v24, %v647_v27  ;;  %v507_v4 = vld [vmem:[#allocation6 + $0xad0] sm:$0xff]  ;;  %v6739_v9 = vcombine.low %v515_v56, %v519_v57  ;;  %v6446_v56 = vcombine.high %v220_v44, %v224_v45 }
 0x1b3   :  { %3757 = vmatpush1.bf16.msra.mxu1 %v6787_v8  ;;  %v511_v5 = vld [vmem:[#allocation6 + $0xaf0] sm:$0xff] }
 0x1b4   :  { %3758 = vmatprep.subr.bf16.mxu1 %v6780_v10  ;;  %v635_v7 = vld [vmem:[#allocation6 + $0xed0] sm:$0xff]  ;;  %v6867_v10 = vcombine.low %v643_v24, %v647_v27  ;;  %v6732_v11 = vcombine.high %v507_v4, %v511_v5  ;;  %v212_v24 = vld [vmem:[#allocation6 + $0x198] sm:$0xff] }
 0x1b5   :  { %3716 = vmatpush1.bf16.msra.mxu0 %v6651_v16  ;;  %v639_v8 = vld [vmem:[#allocation6 + $0xef0] sm:$0xff]  ;;  %v216_v27 = vld [vmem:[#allocation6 + $0x1b8] sm:$0xff] }
 0x1b6   :  { %3717 = vmatprep.subr.bf16.mxu0 %v6644_v18  ;;  %v6860_v13 = vcombine.high %v635_v7, %v639_v8  ;;  %v499_v14 = vld [vmem:[#allocation6 + $0xa90] sm:$0xff]  ;;  %v6731_v18 = vcombine.low %v507_v4, %v511_v5  ;;  %v6438_v5 = vcombine.high %v212_v24, %v216_v27 }
 0x1b7   :  { %3759 = vmatpush1.bf16.msra.mxu1 %v6779_v60  ;;  %v503_v15 = vld [vmem:[#allocation6 + $0xab0] sm:$0xff] }
 0x1b8   :  { %3760 = vmatprep.subr.bf16.mxu1 %v6772_v19  ;;  %v627_v16 = vld [vmem:[#allocation6 + $0xe90] sm:$0xff]  ;;  %v6859_v19 = vcombine.low %v635_v7, %v639_v8  ;;  %v6724_v20 = vcombine.high %v499_v14, %v503_v15  ;;  %v8014_v7 = vpop.f32.mrf.mxu1 }
 0x1b9   :  { %3718 = vmatpush1.bf16.msra.mxu0 %v6643_v54  ;;  %v631_v60 = vld [vmem:[#allocation6 + $0xeb0] sm:$0xff] }
 0x1ba   :  { %3719 = vmatprep.subr.bf16.mxu0 %v6764_v30  ;;  %v6852_v22 = vcombine.high %v627_v16, %v631_v60  ;;  %v491_v26 = vld [vmem:[#allocation6 + $0xa50] sm:$0xff]  ;;  %v6723_v30 = vcombine.low %v499_v14, %v503_v15  ;;  %v336_v14 = vld [vmem:[#allocation6 + $0x578] sm:$0xff] }
 0x1bb   :  { %3761 = vmatpush1.bf16.msra.mxu1 %v6771_v55  ;;  %v495_v29 = vld [vmem:[#allocation6 + $0xa70] sm:$0xff] }
 0x1bc   :  { %3762 = vmatprep.subr.bf16.mxu1 %v6892_v31  ;;  %v619_v54 = vld [vmem:[#allocation6 + $0xe50] sm:$0xff]  ;;  %v6851_v31 = vcombine.low %v627_v16, %v631_v60  ;;  %v6716_v59 = vcombine.high %v491_v26, %v495_v29  ;;  %v6437_v16 = vcombine.low %v212_v24, %v216_v27 }
 0x1bd   :  { %3720 = vmatpush2.bf16.msra.mxu0 %v6763_v39  ;;  %v623_v55 = vld [vmem:[#allocation6 + $0xe70] sm:$0xff] }
 0x1be   :  { %3721 = vmatprep.subr.bf16.mxu0 %v6756_v41  ;;  %v6844_v35 = vcombine.high %v619_v54, %v623_v55  ;;  %v483_v36 = vld [vmem:[#allocation6 + $0xa10] sm:$0xff]  ;;  %v6715_v41 = vcombine.low %v491_v26, %v495_v29  ;;  %v196_v29 = vld [vmem:[#allocation6 + $0x118] sm:$0xff] }
 0x1bf   :  { %3763 = vmatpush2.bf16.msra.mxu1 %v6891_v40  ;;  %v487_v38 = vld [vmem:[#allocation6 + $0xa30] sm:$0xff] }
 0x1c0   :  { %3764 = vmatprep.subr.bf16.mxu1 %v6884_v42  ;;  %v611_v39 = vld [vmem:[#allocation6 + $0xe10] sm:$0xff]  ;;  %v6843_v42 = vcombine.low %v619_v54, %v623_v55  ;;  %v6708_v43 = vcombine.high %v483_v36, %v487_v38  ;;  %v200_v54 = vld [vmem:[#allocation6 + $0x138] sm:$0xff] }
 0x1c1   :  { %3722 = vmatpush2.bf16.msra.mxu0 %v6755_v49  ;;  %v615_v40 = vld [vmem:[#allocation6 + $0xe30] sm:$0xff]  ;;  %v348_v49 = vld [vmem:[#allocation6 + $0x5d8] sm:$0xff] }
 0x1c2   :  { %3723 = vmatprep.subr.bf16.mxu0 %v6748_v51  ;;  %v6836_v48 = vcombine.high %v611_v39, %v615_v40  ;;  %v6707_v51 = vcombine.low %v483_v36, %v487_v38 }
 0x1c3   :  { %3765 = vmatpush2.bf16.msra.mxu1 %v6883_v50  ;;  %v352_v50 = vld [vmem:[#allocation6 + $0x5f8] sm:$0xff] }
 0x1c4   :  { %3766 = vmatprep.subr.bf16.mxu1 %v6876_v53  ;;  %v6835_v53 = vcombine.low %v611_v39, %v615_v40  ;;  %v6574_v57 = vcombine.high %v348_v49, %v352_v50  ;;  %v6573_v4 = vcombine.low %v348_v49, %v352_v50  ;;  %v6422_v39 = vcombine.high %v196_v29, %v200_v54  ;;  %v180_v49 = vld [vmem:[#allocation6 + $0x98] sm:$0xff] }
 0x1c5   :  { %3724 = vmatpush2.bf16.msra.mxu0 %v6747_v61  ;;  %v340_v61 = vld [vmem:[#allocation6 + $0x598] sm:$0xff] }
 0x1c6   :  { %3725 = vmatprep.subr.bf16.mxu0 %v6740_v2  ;;  %v6445_v2 = vcombine.low %v220_v44, %v224_v45  ;;  %v184_v50 = vld [vmem:[#allocation6 + $0xb8] sm:$0xff] }
 0x1c7   :  { %3767 = vmatpush2.bf16.msra.mxu1 %v6875_v62  ;;  %v344_v62 = vld [vmem:[#allocation6 + $0x5b8] sm:$0xff]  ;;  %v6406_v24 = vcombine.high %v180_v49, %v184_v50 }
 0x1c8   :  { %3768 = vmatprep.subr.bf16.mxu1 %v6868_v3  ;;  %v8012_v3 = vpop.f32.mrf.mxu0  ;;  %v6566_v8 = vcombine.high %v340_v61, %v344_v62 }
 0x1c9   :  { %3726 = vmatpush2.bf16.msra.mxu0 %v6739_v9  ;;  %v204_v9 = vld [vmem:[#allocation6 + $0x158] sm:$0xff] }
 0x1ca   :  { %3727 = vmatprep.subr.bf16.mxu0 %v6732_v11 }
 0x1cb   :  { %3769 = vmatpush2.bf16.msra.mxu1 %v6867_v10  ;;  %v208_v10 = vld [vmem:[#allocation6 + $0x178] sm:$0xff] }
 0x1cc   :  { %3770 = vmatprep.subr.bf16.mxu1 %v6860_v13  ;;  %v332_v13 = vld [vmem:[#allocation6 + $0x558] sm:$0xff] }
 0x1cd   :  { %3728 = vmatpush2.bf16.msra.mxu0 %v6731_v18  ;;  %v6558_v26 = vcombine.high %v332_v13, %v336_v14  ;;  %v6557_v38 = vcombine.low %v332_v13, %v336_v14  ;;  %v168_v13 = vld [vmem:[#allocation6 + $0x38] sm:$0xff] }
 0x1ce   :  { %3729 = vmatprep.subr.bf16.mxu0 %v6724_v20  ;;  %v6430_v20 = vcombine.high %v204_v9, %v208_v10  ;;  %v292_v14 = vld [vmem:[#allocation6 + $0x418] sm:$0xff] }
 0x1cf   :  { %3771 = vmatpush2.bf16.msra.mxu1 %v6859_v19  ;;  %v6565_v19 = vcombine.low %v340_v61, %v344_v62  ;;  %v172_v61 = vld [vmem:[#allocation6 + $0x58] sm:$0xff] }
 0x1d0   :  { %3772 = vmatprep.subr.bf16.mxu1 %v6852_v22  ;;  %v176_v62 = vld [vmem:[#allocation6 + $0x78] sm:$0xff] }
 0x1d1   :  { %3730 = vmatpush2.bf16.msra.mxu0 %v6723_v30  ;;  %v324_v30 = vld [vmem:[#allocation6 + $0x518] sm:$0xff] }
 0x1d2   :  { %3731 = vmatprep.subr.bf16.mxu0 %v6716_v59 }
 0x1d3   :  { %3773 = vmatpush2.bf16.msra.mxu1 %v6851_v31  ;;  %v328_v31 = vld [vmem:[#allocation6 + $0x538] sm:$0xff] }
 0x1d4   :  { %3774 = vmatprep.subr.bf16.mxu1 %v6844_v35  ;;  %v6429_v35 = vcombine.low %v204_v9, %v208_v10  ;;  %v6550_v40 = vcombine.high %v324_v30, %v328_v31  ;;  %v6398_v9 = vcombine.high %v172_v61, %v176_v62 }
 0x1d5   :  { %3732 = vmatpush2.bf16.msra.mxu0 %v6715_v41  ;;  %v188_v41 = vld [vmem:[#allocation6 + $0xd8] sm:$0xff] }
 0x1d6   :  { %3733 = vmatprep.subr.bf16.mxu0 %v6708_v43  ;;  %v316_v43 = vld [vmem:[#allocation6 + $0x4d8] sm:$0xff] }
 0x1d7   :  { %3775 = vmatpush2.bf16.msra.mxu1 %v6843_v42  ;;  %v192_v42 = vld [vmem:[#allocation6 + $0xf8] sm:$0xff] }
 0x1d8   :  { %3776 = vmatprep.subr.bf16.mxu1 %v6836_v48  ;;  %v6421_v48 = vcombine.low %v196_v29, %v200_v54  ;;  %v6414_v44 = vcombine.high %v188_v41, %v192_v42  ;;  %v284_v29 = vld [vmem:[#allocation6 + $0x3d8] sm:$0xff] }
 0x1d9   :  { %3734 = vmatpush2.bf16.msra.mxu0 %v6707_v51  ;;  %v308_v51 = vld [vmem:[#allocation6 + $0x498] sm:$0xff] }
 0x1da   :  { %3789 = vmatprep.subr.bf16.mxu0 %v6446_v56  ;;  %v6413_v56 = vcombine.low %v188_v41, %v192_v42  ;;  %v288_v54 = vld [vmem:[#allocation6 + $0x3f8] sm:$0xff] }
 0x1db   :  { %3777 = vmatpush2.bf16.msra.mxu1 %v6835_v53  ;;  %v312_v53 = vld [vmem:[#allocation6 + $0x4b8] sm:$0xff] }
 0x1dc   :  { %3832 = vmatprep.subr.bf16.mxu1 %v6574_v57  ;;  %v3479_v11 = vpop.f32.mrf.mxu0  ;;  %3736 = vmatmul.mubr.bf16.vlgmr.msra.gmra.mxu0 %v7962_v46  ;;  %v6534_v27 = vcombine.high %v308_v51, %v312_v53  ;;  %v404_v41 = vld [vmem:[#allocation6 + $0x798] sm:$0xff] }
 0x1dd   :  { %3790 = vmatpush1.bf16.msra.mxu0 %v6445_v2  ;;  %3821 = vmatprep.mubr.bf16.mxu0 %v7920_v58  ;;  %v320_v58 = vld [vmem:[#allocation6 + $0x4f8] sm:$0xff] }
 0x1de   :  { %v3522_v15 = vpop.f32.mrf.mxu1  ;;  %3779 = vmatmul.mubr.bf16.vlgmr.msra.gmra.mxu1 %v7966_v47  ;;  %v8020_v18 = vpop.f32.mrf.mxu0  ;;  %3791 = vmatprep.subr.bf16.mxu0 %v6438_v5  ;;  %v6542_v45 = vcombine.high %v316_v43, %v320_v58  ;;  %v6541_v57 = vcombine.low %v316_v43, %v320_v58  ;;  %v300_v2 = vld [vmem:[#allocation6 + $0x458] sm:$0xff]  ;;  %v6405_v5 = vcombine.low %v180_v49, %v184_v50 }
 0x1df   :  { %v8018_v60 = vadd.f32 %v3522_v15, %v3479_v11  ;;  %3833 = vmatpush1.bf16.msra.mxu1 %v6573_v4  ;;  %3864 = vmatprep.mubr.bf16.mxu1 %v7928_v63  ;;  %v6549_v63 = vcombine.low %v324_v30, %v328_v31  ;;  %v304_v4 = vld [vmem:[#allocation6 + $0x478] sm:$0xff]  ;;  %v6509_v43 = vcombine.low %v284_v29, %v288_v54 }
 0x1e0   :  { %v8022_v22 = vpop.f32.mrf.mxu1  ;;  %3834 = vmatprep.subr.bf16.mxu1 %v6566_v8  ;;  %v3483_v55 = vpop.f32.mrf.mxu0  ;;  %v6533_v8 = vcombine.low %v308_v51, %v312_v53  ;;  %v6526_v10 = vcombine.high %v300_v2, %v304_v4  ;;  %v164_v11 = vld [vmem:[#allocation6 + $0x18] sm:$0xff] }
 0x1e1   :  { %3792 = vmatpush1.bf16.msra.mxu0 %v6437_v16  ;;  %v296_v15 = vld [vmem:[#allocation6 + $0x438] sm:$0xff]  ;;  %v6397_v16 = vcombine.low %v172_v61, %v176_v62  ;;  %v6389_v31 = vcombine.low %v164_v11, %v168_v13 }
 0x1e2   :  { %v3526_v59 = vpop.f32.mrf.mxu1  ;;  %3793 = vmatprep.subr.bf16.mxu0 %v6430_v20  ;;  %v6390_v20 = vcombine.high %v164_v11, %v168_v13  ;;  %v416_v30 = vld [vmem:[#allocation6 + $0x7f8] sm:$0xff] }
 0x1e3   :  { %v8026_v36 = vadd.f32 %v3526_v59, %v3483_v55  ;;  %3835 = vmatpush1.bf16.msra.mxu1 %v6565_v19  ;;  %v6525_v19 = vcombine.low %v300_v2, %v304_v4  ;;  %v412_v55 = vld [vmem:[#allocation6 + $0x7d8] sm:$0xff]  ;;  %v6517_v59 = vcombine.low %v292_v14, %v296_v15 }
 0x1e4   :  { %3836 = vmatprep.subr.bf16.mxu1 %v6558_v26  ;;  %v6518_v26 = vcombine.high %v292_v14, %v296_v15  ;;  %v408_v42 = vld [vmem:[#allocation6 + $0x7b8] sm:$0xff]  ;;  %v6637_v58 = vcombine.low %v412_v55, %v416_v30 }
 0x1e5   :  { %3794 = vmatpush1.bf16.msra.mxu0 %v6429_v35  ;;  %v6510_v35 = vcombine.high %v284_v29, %v288_v54  ;;  %v396_v49 = vld [vmem:[#allocation6 + $0x758] sm:$0xff]  ;;  %v6629_v53 = vcombine.low %v404_v41, %v408_v42 }
 0x1e6   :  { %3795 = vmatprep.subr.bf16.mxu0 %v6422_v39  ;;  %v276_v39 = vld [vmem:[#allocation6 + $0x398] sm:$0xff] }
 0x1e7   :  { %3837 = vmatpush1.bf16.msra.mxu1 %v6557_v38  ;;  %v6638_v38 = vcombine.high %v412_v55, %v416_v30  ;;  %v400_v50 = vld [vmem:[#allocation6 + $0x778] sm:$0xff] }
 0x1e8   :  { %3838 = vmatprep.subr.bf16.mxu1 %v6550_v40  ;;  %v280_v40 = vld [vmem:[#allocation6 + $0x3b8] sm:$0xff]  ;;  %v6621_v4 = vcombine.low %v396_v49, %v400_v50 }
 0x1e9   :  { %3796 = vmatpush1.bf16.msra.mxu0 %v6421_v48  ;;  %v6502_v48 = vcombine.high %v276_v39, %v280_v40  ;;  %v6501_v51 = vcombine.low %v276_v39, %v280_v40  ;;  %v388_v61 = vld [vmem:[#allocation6 + $0x718] sm:$0xff] }
 0x1ea   :  { %3797 = vmatprep.subr.bf16.mxu0 %v6414_v44  ;;  %v268_v44 = vld [vmem:[#allocation6 + $0x358] sm:$0xff] }
 0x1eb   :  { %3839 = vmatpush1.bf16.msra.mxu1 %v6549_v63  ;;  %v6630_v63 = vcombine.high %v404_v41, %v408_v42  ;;  %v392_v62 = vld [vmem:[#allocation6 + $0x738] sm:$0xff] }
 0x1ec   :  { %3840 = vmatprep.subr.bf16.mxu1 %v6542_v45  ;;  %v272_v45 = vld [vmem:[#allocation6 + $0x378] sm:$0xff]  ;;  %v6613_v15 = vcombine.low %v388_v61, %v392_v62 }
 0x1ed   :  { %3798 = vmatpush1.bf16.msra.mxu0 %v6413_v56  ;;  %v6494_v56 = vcombine.high %v268_v44, %v272_v45  ;;  %v6493_v2 = vcombine.low %v268_v44, %v272_v45  ;;  %v380_v11 = vld [vmem:[#allocation6 + $0x6d8] sm:$0xff] }
 0x1ee   :  { %3799 = vmatprep.subr.bf16.mxu0 %v6406_v24  ;;  %v260_v24 = vld [vmem:[#allocation6 + $0x318] sm:$0xff] }
 0x1ef   :  { %3841 = vmatpush1.bf16.msra.mxu1 %v6541_v57  ;;  %v6622_v57 = vcombine.high %v396_v49, %v400_v50  ;;  %v384_v13 = vld [vmem:[#allocation6 + $0x6f8] sm:$0xff] }
 0x1f0   :  { %3842 = vmatprep.subr.bf16.mxu1 %v6534_v27  ;;  %v264_v27 = vld [vmem:[#allocation6 + $0x338] sm:$0xff]  ;;  %v6605_v30 = vcombine.low %v380_v11, %v384_v13 }
 0x1f1   :  { %3800 = vmatpush1.bf16.msra.mxu0 %v6405_v5  ;;  %v6486_v5 = vcombine.high %v260_v24, %v264_v27  ;;  %v6485_v14 = vcombine.low %v260_v24, %v264_v27  ;;  %v372_v29 = vld [vmem:[#allocation6 + $0x698] sm:$0xff] }
 0x1f2   :  { %3801 = vmatprep.subr.bf16.mxu0 %v6398_v9  ;;  %v252_v9 = vld [vmem:[#allocation6 + $0x2d8] sm:$0xff] }
 0x1f3   :  { %3843 = vmatpush1.bf16.msra.mxu1 %v6533_v8  ;;  %v6614_v8 = vcombine.high %v388_v61, %v392_v62  ;;  %v376_v54 = vld [vmem:[#allocation6 + $0x6b8] sm:$0xff] }
 0x1f4   :  { %3844 = vmatprep.subr.bf16.mxu1 %v6526_v10  ;;  %v256_v10 = vld [vmem:[#allocation6 + $0x2f8] sm:$0xff]  ;;  %v6597_v42 = vcombine.low %v372_v29, %v376_v54 }
 0x1f5   :  { %3802 = vmatpush1.bf16.msra.mxu0 %v6397_v16  ;;  %v6478_v16 = vcombine.high %v252_v9, %v256_v10  ;;  %v6477_v55 = vcombine.low %v252_v9, %v256_v10  ;;  %v364_v39 = vld [vmem:[#allocation6 + $0x658] sm:$0xff] }
 0x1f6   :  { %3803 = vmatprep.subr.bf16.mxu0 %v6390_v20  ;;  %v244_v20 = vld [vmem:[#allocation6 + $0x298] sm:$0xff] }
 0x1f7   :  { %3845 = vmatpush1.bf16.msra.mxu1 %v6525_v19  ;;  %v6606_v19 = vcombine.high %v380_v11, %v384_v13  ;;  %v368_v40 = vld [vmem:[#allocation6 + $0x678] sm:$0xff]  ;;  %v8028_v13 = vpop.f32.mrf.mxu0 }
 0x1f8   :  { %3846 = vmatprep.subr.bf16.mxu1 %v6518_v26  ;;  %v248_v26 = vld [vmem:[#allocation6 + $0x2b8] sm:$0xff]  ;;  %v6589_v50 = vcombine.low %v364_v39, %v368_v40 }
 0x1f9   :  { %3804 = vmatpush1.bf16.msra.mxu0 %v6389_v31  ;;  %v6470_v31 = vcombine.high %v244_v20, %v248_v26  ;;  %v6469_v41 = vcombine.low %v244_v20, %v248_v26  ;;  %v356_v44 = vld [vmem:[#allocation6 + $0x618] sm:$0xff] }
 0x1fa   :  { %3805 = vmatprep.subr.bf16.mxu0 %v6510_v35  ;;  %v236_v35 = vld [vmem:[#allocation6 + $0x258] sm:$0xff] }
 0x1fb   :  { %3847 = vmatpush1.bf16.msra.mxu1 %v6517_v59  ;;  %v6598_v59 = vcombine.high %v372_v29, %v376_v54  ;;  %v360_v45 = vld [vmem:[#allocation6 + $0x638] sm:$0xff] }
 0x1fc   :  { %3848 = vmatprep.subr.bf16.mxu1 %v6638_v38  ;;  %v240_v38 = vld [vmem:[#allocation6 + $0x278] sm:$0xff]  ;;  %v6581_v62 = vcombine.low %v356_v44, %v360_v45 }
 0x1fd   :  { %3806 = vmatpush2.bf16.msra.mxu0 %v6509_v43  ;;  %v6462_v43 = vcombine.high %v236_v35, %v240_v38  ;;  %v6461_v49 = vcombine.low %v236_v35, %v240_v38  ;;  %v604_v24 = vld [vmem:[#allocation6 + $0xdd8] sm:$0xff] }
 0x1fe   :  { %3807 = vmatprep.subr.bf16.mxu0 %v6502_v48  ;;  %v228_v48 = vld [vmem:[#allocation6 + $0x218] sm:$0xff] }
 0x1ff   :  { %3849 = vmatpush2.bf16.msra.mxu1 %v6637_v58  ;;  %v6590_v58 = vcombine.high %v364_v39, %v368_v40  ;;  %v608_v27 = vld [vmem:[#allocation6 + $0xdf8] sm:$0xff] }
 0x200   :  { %3850 = vmatprep.subr.bf16.mxu1 %v6630_v63  ;;  %v232_v63 = vld [vmem:[#allocation6 + $0x238] sm:$0xff] }
 0x201   :  { %3808 = vmatpush2.bf16.msra.mxu0 %v6501_v51  ;;  %v6454_v51 = vcombine.high %v228_v48, %v232_v63  ;;  %v6453_v61 = vcombine.low %v228_v48, %v232_v63  ;;  %v596_v9 = vld [vmem:[#allocation6 + $0xd98] sm:$0xff] }
 0x202   :  { %3809 = vmatprep.subr.bf16.mxu0 %v6494_v56  ;;  %v476_v56 = vld [vmem:[#allocation6 + $0x9d8] sm:$0xff] }
 0x203   :  { %3851 = vmatpush2.bf16.msra.mxu1 %v6629_v53  ;;  %v6582_v53 = vcombine.high %v356_v44, %v360_v45  ;;  %v600_v10 = vld [vmem:[#allocation6 + $0xdb8] sm:$0xff] }
 0x204   :  { %3852 = vmatprep.subr.bf16.mxu1 %v6622_v57  ;;  %v480_v57 = vld [vmem:[#allocation6 + $0x9f8] sm:$0xff]  ;;  %v6822_v20 = vcombine.high %v596_v9, %v600_v10  ;;  %v6821_v39 = vcombine.low %v596_v9, %v600_v10 }
 0x205   :  { %3810 = vmatpush2.bf16.msra.mxu0 %v6493_v2  ;;  %v6702_v2 = vcombine.high %v476_v56, %v480_v57  ;;  %v6701_v11 = vcombine.low %v476_v56, %v480_v57  ;;  %v460_v26 = vld [vmem:[#allocation6 + $0x958] sm:$0xff] }
 0x206   :  { %3811 = vmatprep.subr.bf16.mxu0 %v6486_v5  ;;  %v468_v5 = vld [vmem:[#allocation6 + $0x998] sm:$0xff] }
 0x207   :  { %3853 = vmatpush2.bf16.msra.mxu1 %v6621_v4  ;;  %v6830_v4 = vcombine.high %v604_v24, %v608_v27  ;;  %v464_v29 = vld [vmem:[#allocation6 + $0x978] sm:$0xff] }
 0x208   :  { %3854 = vmatprep.subr.bf16.mxu1 %v6614_v8  ;;  %v472_v8 = vld [vmem:[#allocation6 + $0x9b8] sm:$0xff]  ;;  %v6686_v40 = vcombine.high %v460_v26, %v464_v29  ;;  %v6685_v45 = vcombine.low %v460_v26, %v464_v29 }
 0x209   :  { %3812 = vmatpush2.bf16.msra.mxu0 %v6485_v14  ;;  %v6829_v14 = vcombine.low %v604_v24, %v608_v27  ;;  %v6693_v35 = vcombine.low %v468_v5, %v472_v8  ;;  %v580_v48 = vld [vmem:[#allocation6 + $0xd18] sm:$0xff] }
 0x20a   :  { %3813 = vmatprep.subr.bf16.mxu0 %v6478_v16  ;;  %v8030_v16 = vpop.f32.mrf.mxu1  ;;  %v584_v63 = vld [vmem:[#allocation6 + $0xd38] sm:$0xff] }
 0x20b   :  { %3855 = vmatpush2.bf16.msra.mxu1 %v6613_v15  ;;  %v6694_v15 = vcombine.high %v468_v5, %v472_v8  ;;  %v6806_v56 = vcombine.high %v580_v48, %v584_v63  ;;  %v444_v57 = vld [vmem:[#allocation6 + $0x8d8] sm:$0xff] }
 0x20c   :  { %3856 = vmatprep.subr.bf16.mxu1 %v6606_v19  ;;  %v4024_v19 = vsub.s32 2, %v7988_v52  ;;  %v572_v24 = vld [vmem:[#allocation6 + $0xcd8] sm:$0xff] }
 0x20d   :  { %3814 = vmatpush2.bf16.msra.mxu0 %v6477_v55  ;;  %v588_v55 = vld [vmem:[#allocation6 + $0xd58] sm:$0xff] }
 0x20e   :  { %3815 = vmatprep.subr.bf16.mxu0 %v6470_v31  ;;  %v576_v27 = vld [vmem:[#allocation6 + $0xcf8] sm:$0xff] }
 0x20f   :  { %3857 = vmatpush2.bf16.msra.mxu1 %v6605_v30  ;;  %v592_v30 = vld [vmem:[#allocation6 + $0xd78] sm:$0xff]  ;;  %v6798_v5 = vcombine.high %v572_v24, %v576_v27 }
 0x210   :  { %3858 = vmatprep.subr.bf16.mxu1 %v6598_v59  ;;  %v436_v8 = vld [vmem:[#allocation6 + $0x898] sm:$0xff] }
 0x211   :  { %3816 = vmatpush2.bf16.msra.mxu0 %v6469_v41  ;;  %v440_v9 = vld [vmem:[#allocation6 + $0x8b8] sm:$0xff] }
 0x212   :  { %3817 = vmatprep.subr.bf16.mxu0 %v6462_v43  ;;  %v452_v43 = vld [vmem:[#allocation6 + $0x918] sm:$0xff]  ;;  %v6662_v26 = vcombine.high %v436_v8, %v440_v9 }
 0x213   :  { %3859 = vmatpush2.bf16.msra.mxu1 %v6597_v42  ;;  %v564_v10 = vld [vmem:[#allocation6 + $0xc98] sm:$0xff] }
 0x214   :  { %3860 = vmatprep.subr.bf16.mxu1 %v6590_v58  ;;  %v456_v58 = vld [vmem:[#allocation6 + $0x938] sm:$0xff] }
 0x215   :  { %3818 = vmatpush2.bf16.msra.mxu0 %v6461_v49 }
 0x216   :  { %3819 = vmatprep.subr.bf16.mxu0 %v6454_v51 }
 0x217   :  { %3861 = vmatpush2.bf16.msra.mxu1 %v6589_v50  ;;  %v6678_v50 = vcombine.high %v452_v43, %v456_v58 }
 0x218   :  { %3862 = vmatprep.subr.bf16.mxu1 %v6582_v53 }
 0x219   :  { %3820 = vmatpush2.bf16.msra.mxu0 %v6453_v61 }
 0x21a   :  { %3875 = vmatprep.subr.bf16.mxu0 %v6702_v2 }
 0x21b   :  { %3863 = vmatpush2.bf16.msra.mxu1 %v6581_v62 }
 0x21c   :  { %3918 = vmatprep.subr.bf16.mxu1 %v6830_v4  ;;  %v3565_v54 = vpop.f32.mrf.mxu0  ;;  %3822 = vmatmul.mubr.bf16.vlgmr.msra.gmra.mxu0 %v7934_v21  ;;  %v4025_v21 = vrot.slane %v7995_v6, %v4024_v19  ;;  %v6813_v6 = vcombine.low %v588_v55, %v592_v30 }
 0x21d   :  { %v3566_v31 = vadd.f32 %v3565_v54, %v8018_v60  ;;  %3876 = vmatpush1.bf16.msra.mxu0 %v6701_v11  ;;  %v6814_v60 = vcombine.high %v588_v55, %v592_v30  ;;  %3907 = vmatprep.mubr.bf16.mxu0 %v7950_v32  ;;  %v448_v32 = vld [vmem:[#allocation6 + $0x8f8] sm:$0xff] }
 0x21e   :  { %v3608_v59 = vpop.f32.mrf.mxu1  ;;  %3865 = vmatmul.mubr.bf16.vlgmr.msra.gmra.mxu1 %v7942_v25  ;;  %v8036_v38 = vpop.f32.mrf.mxu0  ;;  %3877 = vmatprep.subr.bf16.mxu0 %v6694_v15  ;;  %v6670_v62 = vcombine.high %v444_v57, %v448_v32  ;;  %v568_v11 = vld [vmem:[#allocation6 + $0xcb8] sm:$0xff]  ;;  %v6669_v15 = vcombine.low %v444_v57, %v448_v32 }
 0x21f   :  { %3919 = vmatpush1.bf16.msra.mxu1 %v6829_v14  ;;  %v3609_v41 = vadd.f32 %v3608_v59, %v3566_v31  ;;  %3950 = vmatprep.mubr.bf16.mxu1 %v7955_v33  ;;  %v6677_v33 = vcombine.low %v452_v43, %v456_v58  ;;  %v6790_v29 = vcombine.high %v564_v10, %v568_v11  ;;  %v428_v54 = vld [vmem:[#allocation6 + $0x858] sm:$0xff] }
 0x220   :  { %v8041_v42 = vpop.f32.mrf.mxu1  ;;  %3920 = vmatprep.subr.bf16.mxu1 %v6822_v20  ;;  %v3569_v25 = vpop.f32.mrf.mxu0  ;;  %v6797_v20 = vcombine.low %v572_v24, %v576_v27  ;;  %v432_v55 = vld [vmem:[#allocation6 + $0x878] sm:$0xff]  ;;  %v6661_v59 = vcombine.low %v436_v8, %v440_v9 }
 0x221   :  { %v3570_v44 = vadd.f32 %v3569_v25, %v8026_v36  ;;  %3878 = vmatpush1.bf16.msra.mxu0 %v6693_v35  ;;  %v4056_v51 = vadd.f32 %v4025_v21, %v3609_v41  ;;  %v6805_v36 = vcombine.low %v580_v48, %v584_v63  ;;  %v556_v30 = vld [vmem:[#allocation6 + $0xc58] sm:$0xff]  ;;  %v6789_v35 = vcombine.low %v564_v10, %v568_v11 }
 0x222   :  { %v3612_v49 = vpop.f32.mrf.mxu1  ;;  %3879 = vmatprep.subr.bf16.mxu0 %v6686_v40  ;;  %v560_v31 = vld [vmem:[#allocation6 + $0xc78] sm:$0xff]  ;;  %v6653_v58 = vcombine.low %v428_v54, %v432_v55 }
 0x223   :  { %3921 = vmatpush1.bf16.msra.mxu1 %v6821_v39  ;;  %v3613_v53 = vadd.f32 %v3612_v49, %v3570_v44  ;;  %v4072_v2 = vmax.f32 %v4056_v51, 0.0  ;;  %v6654_v39 = vcombine.high %v428_v54, %v432_v55  ;;  %v6782_v40 = vcombine.high %v556_v30, %v560_v31  ;;  %v420_v41 = vld [vmem:[#allocation6 + $0x818] sm:$0xff] }
 0x224   :  { %3922 = vmatprep.subr.bf16.mxu1 %v6814_v60  ;;  %v548_v60 = vld [vmem:[#allocation6 + $0xc18] sm:$0xff]  ;;  %v6781_v25 = vcombine.low %v556_v30, %v560_v31 }
 0x225   :  { %v4064_v61 = vadd.f32 %v4025_v21, %v3613_v53  ;;  %3880 = vmatpush1.bf16.msra.mxu0 %v6685_v45  ;;  %v424_v21 = vld [vmem:[#allocation6 + $0x838] sm:$0xff] }
 0x226   :  { %3881 = vmatprep.subr.bf16.mxu0 %v6678_v50  ;;  %v552_v43 = vld [vmem:[#allocation6 + $0xc38] sm:$0xff]  ;;  %v6646_v48 = vcombine.high %v420_v41, %v424_v21  ;;  %v6645_v50 = vcombine.low %v420_v41, %v424_v21 }
 0x227   :  { %3923 = vmatpush1.bf16.msra.mxu1 %v6813_v6  ;;  %v4080_v4 = vmax.f32 %v4064_v61, 0.0  ;;  %v6774_v63 = vcombine.high %v548_v60, %v552_v43  ;;  %v540_v44 = vld [vmem:[#allocation6 + $0xbd8] sm:$0xff]  ;;  %v6773_v51 = vcombine.low %v548_v60, %v552_v43 }
 0x228   :  { %3924 = vmatprep.subr.bf16.mxu1 %v6806_v56  ;;  %v544_v45 = vld [vmem:[#allocation6 + $0xbf8] sm:$0xff] }
 0x229   :  { %v8046_v14 = vpack.c.bf16 %v4080_v4, %v4072_v2  ;;  %3882 = vmatpush1.bf16.msra.mxu0 %v6677_v33  ;;  %v668_v49 = vld [vmem:[#allocation6 + $0xfd8] sm:$0xff]  ;;  %v6766_v53 = vcombine.high %v540_v44, %v544_v45  ;;  %v6765_v61 = vcombine.low %v540_v44, %v544_v45 }
 0x22a   :  { %3883 = vmatprep.subr.bf16.mxu0 %v6670_v62  ;;  %v672_v6 = vld [vmem:[#allocation6 + $0xff8] sm:$0xff] }
 0x22b   :  { %3925 = vmatpush1.bf16.msra.mxu1 %v6805_v36  ;;  %v6894_v56 = vcombine.high %v668_v49, %v672_v6  ;;  %v532_v57 = vld [vmem:[#allocation6 + $0xb98] sm:$0xff]  ;;  %v6893_v33 = vcombine.low %v668_v49, %v672_v6  ;;  %v3357_v49 = vadd.f32 %v7992_v0, %v7990_v28  ;;  %v3571_v6 = vpop.f32.mrf.mxu0  ;;  %v4020_v28 = vsub.s32 1, %v7988_v52 }
 0x22c   :  { %3926 = vmatprep.subr.bf16.mxu1 %v6798_v5  ;;  %v536_v32 = vld [vmem:[#allocation6 + $0xbb8] sm:$0xff]  ;;  %v3525_v0 = vadd.f32 %v8022_v22, %v8020_v18  ;;  %v3614_v18 = vpop.f32.mrf.mxu1 }
 0x22d   :  { %3884 = vmatpush1.bf16.msra.mxu0 %v6669_v15  ;;  %v660_v24 = vld [vmem:[#allocation6 + $0xf98] sm:$0xff]  ;;  %v6758_v36 = vcombine.high %v532_v57, %v536_v32  ;;  %v6757_v9 = vcombine.low %v532_v57, %v536_v32 }
 0x22e   :  { %3885 = vmatprep.subr.bf16.mxu0 %v6662_v26  ;;  %v664_v27 = vld [vmem:[#allocation6 + $0xfb8] sm:$0xff] }
 0x22f   :  { %3927 = vmatpush1.bf16.msra.mxu1 %v6797_v20  ;;  %v6886_v62 = vcombine.high %v660_v24, %v664_v27  ;;  %v524_v2 = vld [vmem:[#allocation6 + $0xb58] sm:$0xff]  ;;  %v6885_v10 = vcombine.low %v660_v24, %v664_v27  ;;  %v3353_v24 = vadd.f32 %v7982_v37, %v7980_v34  ;;  %v3400_v27 = vadd.f32 %v8012_v3, %v3357_v49 }
 0x230   :  { %3928 = vmatprep.subr.bf16.mxu1 %v6790_v29  ;;  %v528_v4 = vld [vmem:[#allocation6 + $0xb78] sm:$0xff]  ;;  %v3568_v34 = vadd.f32 %v8036_v38, %v3525_v0  ;;  %v4028_v37 = vsub.s32 3, %v7988_v52 }
 0x231   :  { %3886 = vmatpush1.bf16.msra.mxu0 %v6661_v59  ;;  %v652_v5 = vld [vmem:[#allocation6 + $0xf58] sm:$0xff]  ;;  %v6750_v11 = vcombine.high %v524_v2, %v528_v4  ;;  %v6749_v55 = vcombine.low %v524_v2, %v528_v4 }
 0x232   :  { %3887 = vmatprep.subr.bf16.mxu0 %v6654_v39  ;;  %v656_v8 = vld [vmem:[#allocation6 + $0xf78] sm:$0xff] }
 0x233   :  { %3929 = vmatpush1.bf16.msra.mxu1 %v6789_v35  ;;  %v6878_v15 = vcombine.high %v652_v5, %v656_v8  ;;  %v516_v20 = vld [vmem:[#allocation6 + $0xb18] sm:$0xff]  ;;  %v6877_v30 = vcombine.low %v652_v5, %v656_v8  ;;  %v3443_v8 = vadd.f32 %v8014_v7, %v3400_v27  ;;  %v3611_v7 = vadd.f32 %v8041_v42, %v3568_v34 }
 0x234   :  { %3930 = vmatprep.subr.bf16.mxu1 %v6782_v40  ;;  %v520_v26 = vld [vmem:[#allocation6 + $0xb38] sm:$0xff] }
 0x235   :  { %3888 = vmatpush1.bf16.msra.mxu0 %v6653_v58  ;;  %v644_v29 = vld [vmem:[#allocation6 + $0xf18] sm:$0xff]  ;;  %v6742_v31 = vcombine.high %v516_v20, %v520_v26  ;;  %v6741_v21 = vcombine.low %v516_v20, %v520_v26 }
 0x236   :  { %3889 = vmatprep.subr.bf16.mxu0 %v6646_v48  ;;  %v648_v54 = vld [vmem:[#allocation6 + $0xf38] sm:$0xff] }
 0x237   :  { %3931 = vmatpush1.bf16.msra.mxu1 %v6781_v25  ;;  %v6870_v59 = vcombine.high %v644_v29, %v648_v54  ;;  %v508_v35 = vld [vmem:[#allocation6 + $0xad8] sm:$0xff]  ;;  %v6869_v60 = vcombine.low %v644_v29, %v648_v54 }
 0x238   :  { %3932 = vmatprep.subr.bf16.mxu1 %v6774_v63  ;;  %v512_v39 = vld [vmem:[#allocation6 + $0xaf8] sm:$0xff] }
 0x239   :  { %3890 = vmatpush1.bf16.msra.mxu0 %v6645_v50  ;;  %v636_v40 = vld [vmem:[#allocation6 + $0xed8] sm:$0xff]  ;;  %v6734_v43 = vcombine.high %v508_v35, %v512_v39  ;;  %v6733_v45 = vcombine.low %v508_v35, %v512_v39 }
 0x23a   :  { %3891 = vmatprep.subr.bf16.mxu0 %v6766_v53  ;;  %v640_v41 = vld [vmem:[#allocation6 + $0xef8] sm:$0xff]  ;;  %v3529_v53 = vadd.f32 %v8030_v16, %v8028_v13  ;;  %v3396_v13 = vadd.f32 %v8000_v12, %v3353_v24 }
 0x23b   :  { %3933 = vmatpush1.bf16.msra.mxu1 %v6773_v51  ;;  %v6862_v58 = vcombine.high %v636_v40, %v640_v41  ;;  %v500_v25 = vld [vmem:[#allocation6 + $0xa98] sm:$0xff]  ;;  %v6861_v50 = vcombine.low %v636_v40, %v640_v41 }
 0x23c   :  { %3934 = vmatprep.subr.bf16.mxu1 %v6894_v56  ;;  %v504_v48 = vld [vmem:[#allocation6 + $0xab8] sm:$0xff] }
 0x23d   :  { %3892 = vmatpush2.bf16.msra.mxu0 %v6765_v61  ;;  %v628_v63 = vld [vmem:[#allocation6 + $0xe98] sm:$0xff]  ;;  %v6726_v51 = vcombine.high %v500_v25, %v504_v48 }
 0x23e   :  { %3893 = vmatprep.subr.bf16.mxu0 %v6758_v36  ;;  %v632_v44 = vld [vmem:[#allocation6 + $0xeb8] sm:$0xff]  ;;  %v3572_v36 = vadd.f32 %v3571_v6, %v3529_v53 }
 0x23f   :  { %3935 = vmatpush2.bf16.msra.mxu1 %v6893_v33  ;;  %v6854_v56 = vcombine.high %v628_v63, %v632_v44  ;;  %v492_v57 = vld [vmem:[#allocation6 + $0xa58] sm:$0xff]  ;;  %v6853_v16 = vcombine.low %v628_v63, %v632_v44 }
 0x240   :  { %3936 = vmatprep.subr.bf16.mxu1 %v6886_v62  ;;  %v496_v32 = vld [vmem:[#allocation6 + $0xa78] sm:$0xff]  ;;  %v6725_v62 = vcombine.low %v500_v25, %v504_v48 }
 0x241   :  { %3894 = vmatpush2.bf16.msra.mxu0 %v6757_v9  ;;  %v620_v61 = vld [vmem:[#allocation6 + $0xe58] sm:$0xff]  ;;  %v6718_v2 = vcombine.high %v492_v57, %v496_v32  ;;  %v6717_v38 = vcombine.low %v492_v57, %v496_v32 }
 0x242   :  { %3895 = vmatprep.subr.bf16.mxu0 %v6750_v11  ;;  %v624_v33 = vld [vmem:[#allocation6 + $0xe78] sm:$0xff]  ;;  %v3615_v11 = vadd.f32 %v3614_v18, %v3572_v36 }
 0x243   :  { %3937 = vmatpush2.bf16.msra.mxu1 %v6885_v10  ;;  %v6846_v3 = vcombine.high %v620_v61, %v624_v33  ;;  %v484_v4 = vld [vmem:[#allocation6 + $0xa18] sm:$0xff]  ;;  %v8062_v10 = vld [vmem:[#allocation8] sm:$0xff]  ;;  %v6845_v20 = vcombine.low %v620_v61, %v624_v33 }
 0x244   :  { %3938 = vmatprep.subr.bf16.mxu1 %v6878_v15  ;;  %v488_v5 = vld [vmem:[#allocation6 + $0xa38] sm:$0xff]  ;;  %v4021_v12 = vrot.slane %v8062_v10, %v4020_v28  ;;  %v3439_v15 = vadd.f32 %v8005_v17, %v3396_v13  ;;  %v4029_v29 = vrot.slane %v8062_v10, %v4028_v37 }
 0x245   :  { %3896 = vmatpush2.bf16.msra.mxu0 %v6749_v55  ;;  %v612_v22 = vld [vmem:[#allocation6 + $0xe18] sm:$0xff]  ;;  %v6710_v26 = vcombine.high %v484_v4, %v488_v5 }
 0x246   :  { %3897 = vmatprep.subr.bf16.mxu0 %v6742_v31  ;;  %v616_v9 = vld [vmem:[#allocation6 + $0xe38] sm:$0xff]  ;;  %v4063_v55 = vadd.f32 %v4021_v12, %v3443_v8  ;;  %v6709_v31 = vcombine.low %v484_v4, %v488_v5  ;;  %v4057_v39 = vadd.f32 %v4029_v29, %v3611_v7 }
 0x247   :  { %3939 = vmatpush2.bf16.msra.mxu1 %v6877_v30  ;;  %v6838_v54 = vcombine.high %v612_v22, %v616_v9  ;;  %v4065_v30 = vadd.f32 %v4029_v29, %v3615_v11  ;;  %v6837_v17 = vcombine.low %v612_v22, %v616_v9  ;;  %v7246_v35 = vld [vmem:[#allocation9 + $0xe4] ss:$16 sps:$4 sm:$0xff]   ;;  %v7253_v49 = vld [vmem:[#allocation9 + $0x2c0] ss:$16 sps:$4 sm:$0xff]  }
 0x248   :  { %3940 = vmatprep.subr.bf16.mxu1 %v6870_v59  ;;  %v4055_v59 = vadd.f32 %v4021_v12, %v3439_v15  ;;  %v7249_v40 = vld [vmem:[#allocation9 + $0x2e4] ss:$16 sps:$4 sm:$0xff]   ;;  %v4079_v41 = vmax.f32 %v4063_v55, 0.0  ;;  %v7265_v57 = vld [vmem:[#allocation9 + $0x280] ss:$16 sps:$4 sm:$0xff]  }
 0x249   :  { %3898 = vmatpush2.bf16.msra.mxu0 %v6741_v21  ;;  %v4081_v42 = vmax.f32 %v4065_v30, 0.0  ;;  %v7244_v21 = vld [vmem:[#allocation9 + $0xe0] ss:$16 sps:$4 sm:$0xff]   ;;  %v7252_v25 = vld [vmem:[#allocation9 + $0xc4] ss:$16 sps:$4 sm:$0xff]  }
 0x24a   :  { %3899 = vmatprep.subr.bf16.mxu0 %v6734_v43  ;;  %v7247_v43 = vld [vmem:[#allocation9 + $0x2e0] ss:$16 sps:$4 sm:$0xff]   ;;  %v7255_v63 = vld [vmem:[#allocation9 + $0x2c4] ss:$16 sps:$4 sm:$0xff]  }
 0x24b   :  { %3941 = vmatpush2.bf16.msra.mxu1 %v6869_v60  ;;  %v4071_v60 = vmax.f32 %v4055_v59, 0.0  ;;  %v7258_v6 = vld [vmem:[#allocation9 + $0xa4] ss:$16 sps:$4 sm:$0xff]   ;;  %v7268_v27 = vld [vmem:[#allocation9 + $0x60] ss:$16 sps:$4 sm:$0xff]  }
 0x24c   :  { %3942 = vmatprep.subr.bf16.mxu1 %v6862_v58  ;;  %v4073_v58 = vmax.f32 %v4057_v39, 0.0  ;;  %v7267_v53 = vld [vmem:[#allocation9 + $0x284] ss:$16 sps:$4 sm:$0xff]   ;;  %v7271_v61 = vld [vmem:[#allocation9 + $0x260] ss:$16 sps:$4 sm:$0xff]  }
 0x24d   :  { %3900 = vmatpush2.bf16.msra.mxu0 %v6733_v45  ;;  %v8073_v48 = vpack.c.bf16 %v4079_v41, %v4071_v60  ;;  %v7250_v45 = vld [vmem:[#allocation9 + $0xc0] ss:$16 sps:$4 sm:$0xff]   ;;  %v7270_v32 = vld [vmem:[#allocation9 + $0x64] ss:$16 sps:$4 sm:$0xff]  }
 0x24e   :  { %3901 = vmatprep.subr.bf16.mxu0 %v6726_v51  ;;  %v8076_v44 = vpack.c.bf16 %v4081_v42, %v4073_v58  ;;  %v7259_v51 = vld [vmem:[#allocation9 + $0x2a0] ss:$16 sps:$4 sm:$0xff]   ;;  %v7273_v24 = vld [vmem:[#allocation9 + $0x264] ss:$16 sps:$4 sm:$0xff]  }
 0x24f   :  { %3943 = vmatpush2.bf16.msra.mxu1 %v6861_v50  ;;  %v7261_v50 = vld [vmem:[#allocation9 + $0x2a4] ss:$16 sps:$4 sm:$0xff]   ;;  %v7274_v36 = vld [vmem:[#allocation9 + $0x40] ss:$16 sps:$4 sm:$0xff]  }
 0x250   :  { %3944 = vmatprep.subr.bf16.mxu1 %v6854_v56  ;;  %v7262_v56 = vld [vmem:[#allocation9 + $0x80] ss:$16 sps:$4 sm:$0xff]   ;;  %v7276_v33 = vld [vmem:[#allocation9 + $0x44] ss:$16 sps:$4 sm:$0xff]  }
 0x251   :  { %3902 = vmatpush2.bf16.msra.mxu0 %v6725_v62  ;;  %v7279_v0 = vld [vmem:[#allocation9 + $0x244] ss:$16 sps:$4 sm:$0xff]   ;;  %v7277_v62 = vld [vmem:[#allocation9 + $0x240] ss:$16 sps:$4 sm:$0xff]  }
 0x252   :  { %3903 = vmatprep.subr.bf16.mxu0 %v6718_v2  ;;  %v7282_v13 = vld [vmem:[#allocation9 + $0x24] ss:$16 sps:$4 sm:$0xff]   ;;  %v7280_v2 = vld [vmem:[#allocation9 + $0x20] ss:$16 sps:$4 sm:$0xff]  }
 0x253   :  { %3945 = vmatpush2.bf16.msra.mxu1 %v6853_v16  ;;  %v7285_v16 = vld [vmem:[#allocation9 + $0x224] ss:$16 sps:$4 sm:$0xff]   ;;  %v7283_v34 = vld [vmem:[#allocation9 + $0x220] ss:$16 sps:$4 sm:$0xff]  }
 0x254   :  { %3946 = vmatprep.subr.bf16.mxu1 %v6846_v3  ;;  %v7288_v3 = vld [vmem:[#allocation9 + $0x4] ss:$16 sps:$4 sm:$0xff]   ;;  %v7286_v5 = vld [vmem:[#allocation9] ss:$16 sps:$4 sm:$0xff]  }
 0x255   :  { %3904 = vmatpush2.bf16.msra.mxu0 %v6717_v38  ;;  %v7291_v4 = vld [vmem:[#allocation9 + $0x204] ss:$16 sps:$4 sm:$0xff]   ;;  %v7289_v8 = vld [vmem:[#allocation9 + $0x200] ss:$16 sps:$4 sm:$0xff]  }
 0x256   :  { %3905 = vmatprep.subr.bf16.mxu0 %v6710_v26  ;;  %v7294_v18 = vld [vmem:[#allocation9 + $0x1e4] ss:$16 sps:$4 sm:$0xff]   ;;  %v7292_v9 = vld [vmem:[#allocation9 + $0x1e0] ss:$16 sps:$4 sm:$0xff]  }
 0x257   :  { %3947 = vmatpush2.bf16.msra.mxu1 %v6845_v20  ;;  %v7297_v22 = vld [vmem:[#allocation9 + $0x3e4] ss:$16 sps:$4 sm:$0xff]   ;;  %v7295_v12 = vld [vmem:[#allocation9 + $0x3e0] ss:$16 sps:$4 sm:$0xff]  }
 0x258   :  { %3948 = vmatprep.subr.bf16.mxu1 %v6838_v54  ;;  %v7300_v11 = vld [vmem:[#allocation9 + $0x1c4] ss:$16 sps:$4 sm:$0xff]   ;;  %v7298_v15 = vld [vmem:[#allocation9 + $0x1c0] ss:$16 sps:$4 sm:$0xff]  }
 0x259   :  { %3906 = vmatpush2.bf16.msra.mxu0 %v6709_v31  ;;  %v7303_v38 = vld [vmem:[#allocation9 + $0x3c4] ss:$16 sps:$4 sm:$0xff]   ;;  %v7301_v20 = vld [vmem:[#allocation9 + $0x3c0] ss:$16 sps:$4 sm:$0xff]  }
 0x25a   :  { %5652 = vmatprep.subr.bf16.mxu0 %v7246_v35  ;;  %v7306_v26 = vld [vmem:[#allocation9 + $0x1a4] ss:$16 sps:$4 sm:$0xff]   ;;  %v7304_v29 = vld [vmem:[#allocation9 + $0x1a0] ss:$16 sps:$4 sm:$0xff]  }
 0x25b   :  { %3949 = vmatpush2.bf16.msra.mxu1 %v6837_v17  ;;  %v7309_v7 = vld [vmem:[#allocation9 + $0x3a4] ss:$16 sps:$4 sm:$0xff]   ;;  %v7307_v54 = vld [vmem:[#allocation9 + $0x3a0] ss:$16 sps:$4 sm:$0xff]  }
 0x25c   :  { %5695 = vmatprep.subr.bf16.mxu1 %v7249_v40  ;;  %3908 = vmatmul.mubr.bf16.vlgmr.msra.gmra.mxu0 %v7962_v46  ;;  %v7256_v46 = vld [vmem:[#allocation9 + $0xa0] ss:$16 sps:$4 sm:$0xff]   ;;  %v7312_v55 = vld [vmem:[#allocation9 + $0x184] ss:$16 sps:$4 sm:$0xff]   ;;  %v8080_v60 = vpop.f32.mrf.mxu0 }
 0x25d   :  { %5653 = vmatpush1.bf16.msra.mxu0 %v7244_v21  ;;  %5684 = vmatprep.mubr.bf16.mxu0 %v8073_v48  ;;  %v7315_v30 = vld [vmem:[#allocation9 + $0x384] ss:$16 sps:$4 sm:$0xff]   ;;  %v7310_v31 = vld [vmem:[#allocation9 + $0x180] ss:$16 sps:$4 sm:$0xff]  }
 0x25e   :  { %3951 = vmatmul.mubr.bf16.vlgmr.msra.gmra.mxu1 %v7966_v47  ;;  %5654 = vmatprep.subr.bf16.mxu0 %v7252_v25  ;;  %v7264_v47 = vld [vmem:[#allocation9 + $0x84] ss:$16 sps:$4 sm:$0xff]   ;;  %v7313_v59 = vld [vmem:[#allocation9 + $0x380] ss:$16 sps:$4 sm:$0xff]   ;;  %v8082_v25 = vpop.f32.mrf.mxu1 }
 0x25f   :  { %5696 = vmatpush1.bf16.msra.mxu1 %v7247_v43  ;;  %5727 = vmatprep.mubr.bf16.mxu1 %v8076_v44  ;;  %v7318_v17 = vld [vmem:[#allocation9 + $0x164] ss:$16 sps:$4 sm:$0xff]   ;;  %v7316_v39 = vld [vmem:[#allocation9 + $0x160] ss:$16 sps:$4 sm:$0xff]  }
 0x260   :  { %5697 = vmatprep.subr.bf16.mxu1 %v7255_v63  ;;  %v7321_v35 = vld [vmem:[#allocation9 + $0x364] ss:$16 sps:$4 sm:$0xff]   ;;  %v7319_v40 = vld [vmem:[#allocation9 + $0x360] ss:$16 sps:$4 sm:$0xff]  }
 0x261   :  { %5655 = vmatpush1.bf16.msra.mxu0 %v7250_v45  ;;  %v7324_v41 = vld [vmem:[#allocation9 + $0x144] ss:$16 sps:$4 sm:$0xff]   ;;  %v7322_v21 = vld [vmem:[#allocation9 + $0x140] ss:$16 sps:$4 sm:$0xff]  }
 0x262   :  { %5656 = vmatprep.subr.bf16.mxu0 %v7258_v6  ;;  %v7327_v42 = vld [vmem:[#allocation9 + $0x344] ss:$16 sps:$4 sm:$0xff]   ;;  %v7325_v43 = vld [vmem:[#allocation9 + $0x340] ss:$16 sps:$4 sm:$0xff]  }
 0x263   :  { %5698 = vmatpush1.bf16.msra.mxu1 %v7253_v49  ;;  %v7330_v58 = vld [vmem:[#allocation9 + $0x124] ss:$16 sps:$4 sm:$0xff]   ;;  %v7328_v45 = vld [vmem:[#allocation9 + $0x120] ss:$16 sps:$4 sm:$0xff]   ;;  %v3653_v49 = vpop.f32.mrf.mxu0 }
 0x264   :  { %5699 = vmatprep.subr.bf16.mxu1 %v7261_v50  ;;  %v7333_v63 = vld [vmem:[#allocation9 + $0x324] ss:$16 sps:$4 sm:$0xff]   ;;  %v7331_v6 = vld [vmem:[#allocation9 + $0x320] ss:$16 sps:$4 sm:$0xff]  }
 0x265   :  { %5657 = vmatpush1.bf16.msra.mxu0 %v7256_v46  ;;  %v7336_v50 = vld [vmem:[#allocation9 + $0x104] ss:$16 sps:$4 sm:$0xff]   ;;  %v3696_v46 = vpop.f32.mrf.mxu1 }
 0x266   :  { %5658 = vmatprep.subr.bf16.mxu0 %v7264_v47  ;;  %v7334_v47 = vld [vmem:[#allocation9 + $0x100] ss:$16 sps:$4 sm:$0xff]  }
 0x267   :  { %5700 = vmatpush1.bf16.msra.mxu1 %v7259_v51  ;;  %v7339_v51 = vld [vmem:[#allocation9 + $0x304] ss:$16 sps:$4 sm:$0xff]  }
 0x268   :  { %5701 = vmatprep.subr.bf16.mxu1 %v7267_v53  ;;  %v8084_v53 = vpop.f32.mrf.mxu0 }
 0x269   :  { %5659 = vmatpush1.bf16.msra.mxu0 %v7262_v56  ;;  %v7337_v56 = vld [vmem:[#allocation9 + $0x300] ss:$16 sps:$4 sm:$0xff]  }
 0x26a   :  { %5660 = vmatprep.subr.bf16.mxu0 %v7270_v32  ;;  %v8086_v32 = vpop.f32.mrf.mxu1 }
 0x26b   :  { %5702 = vmatpush1.bf16.msra.mxu1 %v7265_v57  ;;  %v7342_v57 = vld [vmem:[#allocation9 + $0x4e4] ss:$16 sps:$4 sm:$0xff]  }
 0x26c   :  { %5703 = vmatprep.subr.bf16.mxu1 %v7273_v24  ;;  %v7405_v24 = vld [vmem:[#allocation9 + $0x6e4] ss:$16 sps:$4 sm:$0xff]  }
 0x26d   :  { %5661 = vmatpush1.bf16.msra.mxu0 %v7268_v27  ;;  %v7340_v27 = vld [vmem:[#allocation9 + $0x4e0] ss:$16 sps:$4 sm:$0xff]  }
 0x26e   :  { %5662 = vmatprep.subr.bf16.mxu0 %v7276_v33  ;;  %v7345_v33 = vld [vmem:[#allocation9 + $0x4c4] ss:$16 sps:$4 sm:$0xff]  }
 0x26f   :  { %5704 = vmatpush1.bf16.msra.mxu1 %v7271_v61  ;;  %v3657_v61 = vpop.f32.mrf.mxu0 }
 0x270   :  { %5705 = vmatprep.subr.bf16.mxu1 %v7279_v0  ;;  %v7403_v0 = vld [vmem:[#allocation9 + $0x6e0] ss:$16 sps:$4 sm:$0xff]  }
 0x271   :  { %5663 = vmatpush1.bf16.msra.mxu0 %v7274_v36  ;;  %v3700_v36 = vpop.f32.mrf.mxu1 }
 0x272   :  { %5664 = vmatprep.subr.bf16.mxu0 %v7282_v13 }
 0x273   :  { %5706 = vmatpush1.bf16.msra.mxu1 %v7277_v62  ;;  %v7411_v62 = vld [vmem:[#allocation9 + $0x6c4] ss:$16 sps:$4 sm:$0xff]  }
 0x274   :  { %5707 = vmatprep.subr.bf16.mxu1 %v7285_v16  ;;  %v3697_v16 = vadd.f32 %v3696_v46, %v3653_v49  ;;  %v7360_v46 = vld [vmem:[#allocation9 + $0x424] ss:$16 sps:$4 sm:$0xff]  }
 0x275   :  { %5665 = vmatpush1.bf16.msra.mxu0 %v7280_v2 }
 0x276   :  { %5666 = vmatprep.subr.bf16.mxu0 %v7288_v3  ;;  %v7343_v3 = vld [vmem:[#allocation9 + $0x4c0] ss:$16 sps:$4 sm:$0xff]  }
 0x277   :  { %5708 = vmatpush1.bf16.msra.mxu1 %v7283_v34  ;;  %v4036_v34 = vsub.s32 5, %v7988_v52 }
 0x278   :  { %5709 = vmatprep.subr.bf16.mxu1 %v7291_v4 }
 0x279   :  { %5667 = vmatpush1.bf16.msra.mxu0 %v7286_v5  ;;  %v7348_v5 = vld [vmem:[#allocation9 + $0x4a4] ss:$16 sps:$4 sm:$0xff]  }
 0x27a   :  { %5668 = vmatprep.subr.bf16.mxu0 %v7294_v18 }
 0x27b   :  { %5710 = vmatpush1.bf16.msra.mxu1 %v7289_v8  ;;  %v7409_v8 = vld [vmem:[#allocation9 + $0x6c0] ss:$16 sps:$4 sm:$0xff]  }
 0x27c   :  { %5711 = vmatprep.subr.bf16.mxu1 %v7297_v22 }
 0x27d   :  { %5669 = vmatpush2.bf16.msra.mxu0 %v7292_v9  ;;  %v7417_v9 = vld [vmem:[#allocation9 + $0x6a4] ss:$16 sps:$4 sm:$0xff]  }
 0x27e   :  { %5670 = vmatprep.subr.bf16.mxu0 %v7300_v11  ;;  %v3701_v11 = vadd.f32 %v3700_v36, %v3657_v61  ;;  %v7361_v61 = vld [vmem:[#allocation9 + $0x400] ss:$16 sps:$4 sm:$0xff]   ;;  %v7453_v36 = vld [vmem:[#allocation9 + $0x7e4] ss:$16 sps:$4 sm:$0xff]  }
 0x27f   :  { %5712 = vmatpush2.bf16.msra.mxu1 %v7295_v12 }
 0x280   :  { %5713 = vmatprep.subr.bf16.mxu1 %v7303_v38 }
 0x281   :  { %5671 = vmatpush2.bf16.msra.mxu0 %v7298_v15  ;;  %v4037_v15 = vrot.slane %v8062_v10, %v4036_v34  ;;  %v7451_v34 = vld [vmem:[#allocation9 + $0x7e0] ss:$16 sps:$4 sm:$0xff]  }
 0x282   :  { %5672 = vmatprep.subr.bf16.mxu0 %v7306_v26  ;;  %v7346_v26 = vld [vmem:[#allocation9 + $0x4a0] ss:$16 sps:$4 sm:$0xff]  }
 0x283   :  { %5714 = vmatpush2.bf16.msra.mxu1 %v7301_v20 }
 0x284   :  { %5715 = vmatprep.subr.bf16.mxu1 %v7309_v7 }
 0x285   :  { %5673 = vmatpush2.bf16.msra.mxu0 %v7304_v29  ;;  %v7351_v29 = vld [vmem:[#allocation9 + $0x484] ss:$16 sps:$4 sm:$0xff]  }
 0x286   :  { %5674 = vmatprep.subr.bf16.mxu0 %v7312_v55 }
 0x287   :  { %5716 = vmatpush2.bf16.msra.mxu1 %v7307_v54  ;;  %v7415_v54 = vld [vmem:[#allocation9 + $0x6a0] ss:$16 sps:$4 sm:$0xff]  }
 0x288   :  { %5717 = vmatprep.subr.bf16.mxu1 %v7315_v30  ;;  %v7423_v30 = vld [vmem:[#allocation9 + $0x684] ss:$16 sps:$4 sm:$0xff]  }
 0x289   :  { %5675 = vmatpush2.bf16.msra.mxu0 %v7310_v31 }
 0x28a   :  { %5676 = vmatprep.subr.bf16.mxu0 %v7318_v17 }
 0x28b   :  { %5718 = vmatpush2.bf16.msra.mxu1 %v7313_v59 }
 0x28c   :  { %5719 = vmatprep.subr.bf16.mxu1 %v7321_v35  ;;  %v7349_v35 = vld [vmem:[#allocation9 + $0x480] ss:$16 sps:$4 sm:$0xff]  }
 0x28d   :  { %5677 = vmatpush2.bf16.msra.mxu0 %v7316_v39  ;;  %v7354_v39 = vld [vmem:[#allocation9 + $0x464] ss:$16 sps:$4 sm:$0xff]  }
 0x28e   :  { %5678 = vmatprep.subr.bf16.mxu0 %v7324_v41 }
 0x28f   :  { %5720 = vmatpush2.bf16.msra.mxu1 %v7319_v40  ;;  %v7421_v40 = vld [vmem:[#allocation9 + $0x680] ss:$16 sps:$4 sm:$0xff]  }
 0x290   :  { %5721 = vmatprep.subr.bf16.mxu1 %v7327_v42  ;;  %v7429_v42 = vld [vmem:[#allocation9 + $0x664] ss:$16 sps:$4 sm:$0xff]  }
 0x291   :  { %5679 = vmatpush2.bf16.msra.mxu0 %v7322_v21 }
 0x292   :  { %5680 = vmatprep.subr.bf16.mxu0 %v7330_v58  ;;  %v7352_v58 = vld [vmem:[#allocation9 + $0x460] ss:$16 sps:$4 sm:$0xff]  }
 0x293   :  { %5722 = vmatpush2.bf16.msra.mxu1 %v7325_v43 }
 0x294   :  { %5723 = vmatprep.subr.bf16.mxu1 %v7333_v63  ;;  %v7357_v63 = vld [vmem:[#allocation9 + $0x444] ss:$16 sps:$4 sm:$0xff]  }
 0x295   :  { %5681 = vmatpush2.bf16.msra.mxu0 %v7328_v45  ;;  %v7427_v45 = vld [vmem:[#allocation9 + $0x660] ss:$16 sps:$4 sm:$0xff]  }
 0x296   :  { %5682 = vmatprep.subr.bf16.mxu0 %v7336_v50  ;;  %v7355_v50 = vld [vmem:[#allocation9 + $0x440] ss:$16 sps:$4 sm:$0xff]  }
 0x297   :  { %5724 = vmatpush2.bf16.msra.mxu1 %v7331_v6  ;;  %v7435_v6 = vld [vmem:[#allocation9 + $0x644] ss:$16 sps:$4 sm:$0xff]  }
 0x298   :  { %5725 = vmatprep.subr.bf16.mxu1 %v7339_v51  ;;  %v7433_v51 = vld [vmem:[#allocation9 + $0x640] ss:$16 sps:$4 sm:$0xff]  }
 0x299   :  { %5683 = vmatpush2.bf16.msra.mxu0 %v7334_v47  ;;  %v7441_v47 = vld [vmem:[#allocation9 + $0x624] ss:$16 sps:$4 sm:$0xff]  }
 0x29a   :  { %5738 = vmatprep.subr.bf16.mxu0 %v7342_v57  ;;  %v7363_v57 = vld [vmem:[#allocation9 + $0x404] ss:$16 sps:$4 sm:$0xff]  }
 0x29b   :  { %5726 = vmatpush2.bf16.msra.mxu1 %v7337_v56  ;;  %v7358_v56 = vld [vmem:[#allocation9 + $0x420] ss:$16 sps:$4 sm:$0xff]  }
 0x29c   :  { %5781 = vmatprep.subr.bf16.mxu1 %v7405_v24  ;;  %v8088_v13 = vpop.f32.mrf.mxu0  ;;  %5685 = vmatmul.mubr.bf16.vlgmr.msra.gmra.mxu0 %v8010_v23  ;;  %v7439_v24 = vld [vmem:[#allocation9 + $0x620] ss:$16 sps:$4 sm:$0xff]  }
 0x29d   :  { %5739 = vmatpush1.bf16.msra.mxu0 %v7340_v27  ;;  %v7447_v27 = vld [vmem:[#allocation9 + $0x604] ss:$16 sps:$4 sm:$0xff]  }
 0x29e   :  { %v8091_v2 = vpop.f32.mrf.mxu1  ;;  %5728 = vmatmul.mubr.bf16.vlgmr.msra.gmra.mxu1 %v8046_v14  ;;  %v3739_v4 = vpop.f32.mrf.mxu0  ;;  %5740 = vmatprep.subr.bf16.mxu0 %v7345_v33  ;;  %v7366_v33 = vld [vmem:[#allocation9 + $0x5e4] ss:$16 sps:$4 sm:$0xff]  }
 0x29f   :  { %5782 = vmatpush1.bf16.msra.mxu1 %v7403_v0  ;;  %v3740_v18 = vadd.f32 %v3739_v4, %v3697_v16  ;;  %v7445_v0 = vld [vmem:[#allocation9 + $0x600] ss:$16 sps:$4 sm:$0xff]   ;;  %v7369_v16 = vld [vmem:[#allocation9 + $0x5c4] ss:$16 sps:$4 sm:$0xff]  }
 0x2a0   :  { %v3782_v22 = vpop.f32.mrf.mxu1  ;;  %5783 = vmatprep.subr.bf16.mxu1 %v7411_v62  ;;  %v8095_v12 = vpop.f32.mrf.mxu0  ;;  %v7364_v62 = vld [vmem:[#allocation9 + $0x5e0] ss:$16 sps:$4 sm:$0xff]  }
 0x2a1   :  { %v3783_v38 = vadd.f32 %v3782_v22, %v3740_v18  ;;  %5741 = vmatpush1.bf16.msra.mxu0 %v7343_v3  ;;  %v7459_v3 = vld [vmem:[#allocation9 + $0x7c4] ss:$16 sps:$4 sm:$0xff]   ;;  %v7367_v4 = vld [vmem:[#allocation9 + $0x5c0] ss:$16 sps:$4 sm:$0xff]  }
 0x2a2   :  { %v8098_v20 = vpop.f32.mrf.mxu1  ;;  %v3743_v7 = vpop.f32.mrf.mxu0  ;;  %5742 = vmatprep.subr.bf16.mxu0 %v7348_v5  ;;  %v7372_v5 = vld [vmem:[#allocation9 + $0x5a4] ss:$16 sps:$4 sm:$0xff]   ;;  %v7370_v22 = vld [vmem:[#allocation9 + $0x5a0] ss:$16 sps:$4 sm:$0xff]  }
 0x2a3   :  { %5784 = vmatpush1.bf16.msra.mxu1 %v7409_v8  ;;  %v3744_v55 = vadd.f32 %v3743_v7, %v3701_v11  ;;  %v4059_v59 = vadd.f32 %v4037_v15, %v3783_v38  ;;  %v7457_v8 = vld [vmem:[#allocation9 + $0x7c0] ss:$16 sps:$4 sm:$0xff]   ;;  %v7465_v18 = vld [vmem:[#allocation9 + $0x7a4] ss:$16 sps:$4 sm:$0xff]  }
 0x2a4   :  { %5785 = vmatprep.subr.bf16.mxu1 %v7417_v9  ;;  %v3786_v31 = vpop.f32.mrf.mxu1  ;;  %v7375_v9 = vld [vmem:[#allocation9 + $0x584] ss:$16 sps:$4 sm:$0xff]   ;;  %v7463_v11 = vld [vmem:[#allocation9 + $0x7a0] ss:$16 sps:$4 sm:$0xff]  }
 0x2a5   :  { %v3787_v17 = vadd.f32 %v3786_v31, %v3744_v55  ;;  %5743 = vmatpush1.bf16.msra.mxu0 %v7346_v26  ;;  %v4075_v21 = vmax.f32 %v4059_v59, 0.0  ;;  %v7471_v38 = vld [vmem:[#allocation9 + $0x784] ss:$16 sps:$4 sm:$0xff]   ;;  %v7469_v7 = vld [vmem:[#allocation9 + $0x780] ss:$16 sps:$4 sm:$0xff]  }
 0x2a6   :  { %5744 = vmatprep.subr.bf16.mxu0 %v7351_v29  ;;  %v7378_v26 = vld [vmem:[#allocation9 + $0x564] ss:$16 sps:$4 sm:$0xff]   ;;  %v7376_v55 = vld [vmem:[#allocation9 + $0x560] ss:$16 sps:$4 sm:$0xff]  }
 0x2a7   :  { %5786 = vmatpush1.bf16.msra.mxu1 %v7415_v54  ;;  %v4067_v41 = vadd.f32 %v4037_v15, %v3787_v17  ;;  %v7373_v15 = vld [vmem:[#allocation9 + $0x580] ss:$16 sps:$4 sm:$0xff]   ;;  %v7477_v29 = vld [vmem:[#allocation9 + $0x764] ss:$16 sps:$4 sm:$0xff]   ;;  %v3699_v54 = vadd.f32 %v8086_v32, %v8084_v53 }
 0x2a8   :  { %5787 = vmatprep.subr.bf16.mxu1 %v7423_v30  ;;  %v3695_v30 = vadd.f32 %v8082_v25, %v8080_v60  ;;  %v7381_v59 = vld [vmem:[#allocation9 + $0x544] ss:$16 sps:$4 sm:$0xff]   ;;  %v7475_v17 = vld [vmem:[#allocation9 + $0x760] ss:$16 sps:$4 sm:$0xff]  }
 0x2a9   :  { %v4083_v43 = vmax.f32 %v4067_v41, 0.0  ;;  %5745 = vmatpush1.bf16.msra.mxu0 %v7349_v35  ;;  %v3742_v31 = vadd.f32 %v8095_v12, %v3699_v54  ;;  %v7483_v35 = vld [vmem:[#allocation9 + $0x744] ss:$16 sps:$4 sm:$0xff]   ;;  %v7379_v41 = vld [vmem:[#allocation9 + $0x540] ss:$16 sps:$4 sm:$0xff]  }
 0x2aa   :  { %5746 = vmatprep.subr.bf16.mxu0 %v7354_v39  ;;  %v3738_v39 = vadd.f32 %v8088_v13, %v3695_v30  ;;  %v7384_v32 = vld [vmem:[#allocation9 + $0x524] ss:$16 sps:$4 sm:$0xff]   ;;  %v7481_v60 = vld [vmem:[#allocation9 + $0x740] ss:$16 sps:$4 sm:$0xff]   ;;  %v7456_v54 = vld [vmem:[#allocation9 + $0x14c] ss:$16 sps:$4 sm:$0xff]  }
 0x2ab   :  { %5788 = vmatpush1.bf16.msra.mxu1 %v7421_v40  ;;  %v8100_v49 = vpack.c.bf16 %v4083_v43, %v4075_v21  ;;  %v4032_v40 = vsub.s32 4, %v7988_v52  ;;  %v3785_v53 = vadd.f32 %v8098_v20, %v3742_v31  ;;  %v7489_v25 = vld [vmem:[#allocation9 + $0x724] ss:$16 sps:$4 sm:$0xff]   ;;  %v7382_v21 = vld [vmem:[#allocation9 + $0x520] ss:$16 sps:$4 sm:$0xff]  }
 0x2ac   :  { %5789 = vmatprep.subr.bf16.mxu1 %v7429_v42  ;;  %v3781_v12 = vadd.f32 %v8091_v2, %v3738_v39  ;;  %v7387_v13 = vld [vmem:[#allocation9 + $0x504] ss:$16 sps:$4 sm:$0xff]   ;;  %v7501_v2 = vld [vmem:[#allocation9 + $0x2ec] ss:$16 sps:$4 sm:$0xff]  }
 0x2ad   :  { %5747 = vmatpush1.bf16.msra.mxu0 %v7352_v58  ;;  %5770 = vmatprep.mubr.bf16.mxu0 %v8100_v49  ;;  %v4033_v42 = vrot.slane %v8062_v10, %v4032_v40  ;;  %v7487_v58 = vld [vmem:[#allocation9 + $0x720] ss:$16 sps:$4 sm:$0xff]   ;;  %v7462_v31 = vld [vmem:[#allocation9 + $0x12c] ss:$16 sps:$4 sm:$0xff]  }
 0x2ae   :  { %5748 = vmatprep.subr.bf16.mxu0 %v7357_v63  ;;  %v7495_v63 = vld [vmem:[#allocation9 + $0x704] ss:$16 sps:$4 sm:$0xff]   ;;  %v7468_v39 = vld [vmem:[#allocation9 + $0x10c] ss:$16 sps:$4 sm:$0xff]  }
 0x2af   :  { %5790 = vmatpush1.bf16.msra.mxu1 %v7427_v45  ;;  %v4066_v43 = vadd.f32 %v4033_v42, %v3785_v53  ;;  %v4058_v20 = vadd.f32 %v4033_v42, %v3781_v12  ;;  %v7385_v45 = vld [vmem:[#allocation9 + $0x500] ss:$16 sps:$4 sm:$0xff]   ;;  %v7480_v42 = vld [vmem:[#allocation9 + $0x4cc] ss:$16 sps:$4 sm:$0xff]  }
 0x2b0   :  { %5791 = vmatprep.subr.bf16.mxu1 %v7435_v6 }
 0x2b1   :  { %5749 = vmatpush1.bf16.msra.mxu0 %v7355_v50  ;;  %v4082_v6 = vmax.f32 %v4066_v43, 0.0  ;;  %v7390_v50 = vld [vmem:[#allocation9 + $0xec] ss:$16 sps:$4 sm:$0xff]  }
 0x2b2   :  { %5750 = vmatprep.subr.bf16.mxu0 %v7360_v46  ;;  %v7493_v46 = vld [vmem:[#allocation9 + $0x700] ss:$16 sps:$4 sm:$0xff]  }
 0x2b3   :  { %5792 = vmatpush1.bf16.msra.mxu1 %v7433_v51  ;;  %v4074_v51 = vmax.f32 %v4058_v20, 0.0  ;;  %v4044_v20 = vsub.s32 7, %v7988_v52 }
 0x2b4   :  { %5793 = vmatprep.subr.bf16.mxu1 %v7441_v47  ;;  %v7388_v47 = vld [vmem:[#allocation9 + $0xe8] ss:$16 sps:$4 sm:$0xff]  }
 0x2b5   :  { %5751 = vmatpush1.bf16.msra.mxu0 %v7358_v56  ;;  %v8113_v56 = vpack.c.bf16 %v4082_v6, %v4074_v51 }
 0x2b6   :  { %5752 = vmatprep.subr.bf16.mxu0 %v7363_v57  ;;  %v7393_v57 = vld [vmem:[#allocation9 + $0xcc] ss:$16 sps:$4 sm:$0xff]  }
 0x2b7   :  { %5794 = vmatpush1.bf16.msra.mxu1 %v7439_v24  ;;  %v7391_v24 = vld [vmem:[#allocation9 + $0xc8] ss:$16 sps:$4 sm:$0xff]  }
 0x2b8   :  { %5795 = vmatprep.subr.bf16.mxu1 %v7447_v27  ;;  %v7396_v27 = vld [vmem:[#allocation9 + $0xac] ss:$16 sps:$4 sm:$0xff]  }
 0x2b9   :  { %5753 = vmatpush1.bf16.msra.mxu0 %v7361_v61  ;;  %v7394_v61 = vld [vmem:[#allocation9 + $0xa8] ss:$16 sps:$4 sm:$0xff]  }
 0x2ba   :  { %5754 = vmatprep.subr.bf16.mxu0 %v7366_v33  ;;  %v7399_v33 = vld [vmem:[#allocation9 + $0x8c] ss:$16 sps:$4 sm:$0xff]  }
 0x2bb   :  { %5796 = vmatpush1.bf16.msra.mxu1 %v7445_v0  ;;  %v7397_v0 = vld [vmem:[#allocation9 + $0x88] ss:$16 sps:$4 sm:$0xff]  }
 0x2bc   :  { %5797 = vmatprep.subr.bf16.mxu1 %v7453_v36  ;;  %v7402_v36 = vld [vmem:[#allocation9 + $0x6c] ss:$16 sps:$4 sm:$0xff]  }
 0x2bd   :  { %5755 = vmatpush2.bf16.msra.mxu0 %v7364_v62  ;;  %v7400_v62 = vld [vmem:[#allocation9 + $0x68] ss:$16 sps:$4 sm:$0xff]  }
 0x2be   :  { %5756 = vmatprep.subr.bf16.mxu0 %v7369_v16  ;;  %v7408_v16 = vld [vmem:[#allocation9 + $0x4c] ss:$16 sps:$4 sm:$0xff]  }
 0x2bf   :  { %5798 = vmatpush2.bf16.msra.mxu1 %v7451_v34  ;;  %v7406_v34 = vld [vmem:[#allocation9 + $0x48] ss:$16 sps:$4 sm:$0xff]  }
 0x2c0   :  { %5799 = vmatprep.subr.bf16.mxu1 %v7459_v3  ;;  %v7414_v3 = vld [vmem:[#allocation9 + $0x2c] ss:$16 sps:$4 sm:$0xff]  }
 0x2c1   :  { %5757 = vmatpush2.bf16.msra.mxu0 %v7367_v4  ;;  %v7420_v4 = vld [vmem:[#allocation9 + $0xc] ss:$16 sps:$4 sm:$0xff]  }
 0x2c2   :  { %5758 = vmatprep.subr.bf16.mxu0 %v7372_v5  ;;  %v7418_v5 = vld [vmem:[#allocation9 + $0x8] ss:$16 sps:$4 sm:$0xff]  }
 0x2c3   :  { %5800 = vmatpush2.bf16.msra.mxu1 %v7457_v8  ;;  %v7426_v8 = vld [vmem:[#allocation9 + $0x1ec] ss:$16 sps:$4 sm:$0xff]  }
 0x2c4   :  { %5801 = vmatprep.subr.bf16.mxu1 %v7465_v18  ;;  %v7424_v18 = vld [vmem:[#allocation9 + $0x1e8] ss:$16 sps:$4 sm:$0xff]  }
 0x2c5   :  { %5759 = vmatpush2.bf16.msra.mxu0 %v7370_v22  ;;  %v7432_v22 = vld [vmem:[#allocation9 + $0x1cc] ss:$16 sps:$4 sm:$0xff]  }
 0x2c6   :  { %5760 = vmatprep.subr.bf16.mxu0 %v7375_v9  ;;  %v7430_v9 = vld [vmem:[#allocation9 + $0x1c8] ss:$16 sps:$4 sm:$0xff]  }
 0x2c7   :  { %5802 = vmatpush2.bf16.msra.mxu1 %v7463_v11  ;;  %v7438_v11 = vld [vmem:[#allocation9 + $0x1ac] ss:$16 sps:$4 sm:$0xff]  }
 0x2c8   :  { %5803 = vmatprep.subr.bf16.mxu1 %v7471_v38  ;;  %v7436_v38 = vld [vmem:[#allocation9 + $0x1a8] ss:$16 sps:$4 sm:$0xff]  }
 0x2c9   :  { %5761 = vmatpush2.bf16.msra.mxu0 %v7373_v15  ;;  %v7444_v15 = vld [vmem:[#allocation9 + $0x18c] ss:$16 sps:$4 sm:$0xff]  }
 0x2ca   :  { %5762 = vmatprep.subr.bf16.mxu0 %v7378_v26  ;;  %v7442_v26 = vld [vmem:[#allocation9 + $0x188] ss:$16 sps:$4 sm:$0xff]  }
 0x2cb   :  { %5804 = vmatpush2.bf16.msra.mxu1 %v7469_v7  ;;  %v7450_v7 = vld [vmem:[#allocation9 + $0x16c] ss:$16 sps:$4 sm:$0xff]  }
 0x2cc   :  { %5805 = vmatprep.subr.bf16.mxu1 %v7477_v29  ;;  %v7448_v29 = vld [vmem:[#allocation9 + $0x168] ss:$16 sps:$4 sm:$0xff]  }
 0x2cd   :  { %5763 = vmatpush2.bf16.msra.mxu0 %v7376_v55  ;;  %v7454_v55 = vld [vmem:[#allocation9 + $0x148] ss:$16 sps:$4 sm:$0xff]  }
 0x2ce   :  { %5764 = vmatprep.subr.bf16.mxu0 %v7381_v59 }
 0x2cf   :  { %5806 = vmatpush2.bf16.msra.mxu1 %v7475_v17  ;;  %v7460_v17 = vld [vmem:[#allocation9 + $0x128] ss:$16 sps:$4 sm:$0xff]  }
 0x2d0   :  { %5807 = vmatprep.subr.bf16.mxu1 %v7483_v35 }
 0x2d1   :  { %5765 = vmatpush2.bf16.msra.mxu0 %v7379_v41  ;;  %v7466_v41 = vld [vmem:[#allocation9 + $0x108] ss:$16 sps:$4 sm:$0xff]  }
 0x2d2   :  { %5766 = vmatprep.subr.bf16.mxu0 %v7384_v32  ;;  %v7474_v32 = vld [vmem:[#allocation9 + $0x4ec] ss:$16 sps:$4 sm:$0xff]  }
 0x2d3   :  { %5808 = vmatpush2.bf16.msra.mxu1 %v7481_v60 }
 0x2d4   :  { %5809 = vmatprep.subr.bf16.mxu1 %v7489_v25  ;;  %v7472_v25 = vld [vmem:[#allocation9 + $0x4e8] ss:$16 sps:$4 sm:$0xff]  }
 0x2d5   :  { %5767 = vmatpush2.bf16.msra.mxu0 %v7382_v21 }
 0x2d6   :  { %5768 = vmatprep.subr.bf16.mxu0 %v7387_v13 }
 0x2d7   :  { %5810 = vmatpush2.bf16.msra.mxu1 %v7487_v58 }
 0x2d8   :  { %5811 = vmatprep.subr.bf16.mxu1 %v7495_v63 }
 0x2d9   :  { %5769 = vmatpush2.bf16.msra.mxu0 %v7385_v45  ;;  %v7478_v45 = vld [vmem:[#allocation9 + $0x4c8] ss:$16 sps:$4 sm:$0xff]  }
 0x2da   :  { %5824 = vmatprep.subr.bf16.mxu0 %v7390_v50  ;;  %v4040_v50 = vsub.s32 6, %v7988_v52 }
 0x2db   :  { %5812 = vmatpush2.bf16.msra.mxu1 %v7493_v46 }
 0x2dc   :  { %5867 = vmatprep.subr.bf16.mxu1 %v7501_v2  ;;  %5771 = vmatmul.mubr.bf16.vlgmr.msra.gmra.mxu0 %v8113_v56  ;;  %v3823_v30 = vpop.f32.mrf.mxu0  ;;  %v7486_v2 = vld [vmem:[#allocation9 + $0x4ac] ss:$16 sps:$4 sm:$0xff]  }
 0x2dd   :  { %5825 = vmatpush1.bf16.msra.mxu0 %v7388_v47  ;;  %5856 = vmatprep.mubr.bf16.mxu0 %v8073_v48  ;;  %v7412_v48 = vld [vmem:[#allocation9 + $0x28] ss:$16 sps:$4 sm:$0xff]  }
 0x2de   :  { %5826 = vmatprep.subr.bf16.mxu0 %v7393_v57  ;;  %v3866_v59 = vpop.f32.mrf.mxu1  ;;  %v3825_v35 = vpop.f32.mrf.mxu0 }
 0x2df   :  { %v3867_v43 = vadd.f32 %v3866_v59, %v3823_v30  ;;  %v7499_v30 = vld [vmem:[#allocation9 + $0x2e8] ss:$16 sps:$4 sm:$0xff]   ;;  %v7507_v59 = vld [vmem:[#allocation9 + $0x2cc] ss:$16 sps:$4 sm:$0xff]  }
 0x2e0   :  { %v3868_v40 = vpop.f32.mrf.mxu1  ;;  %v3827_v53 = vpop.f32.mrf.mxu0 }
 0x2e1   :  { %5827 = vmatpush1.bf16.msra.mxu0 %v7391_v24  ;;  %v3869_v58 = vadd.f32 %v3868_v40, %v3825_v35  ;;  %v7510_v35 = vld [vmem:[#allocation9 + $0x42c] ss:$16 sps:$4 sm:$0xff]  }
 0x2e2   :  { %5828 = vmatprep.subr.bf16.mxu0 %v7396_v27  ;;  %v3870_v60 = vpop.f32.mrf.mxu1  ;;  %v3829_v12 = vpop.f32.mrf.mxu0  ;;  %v7513_v40 = vld [vmem:[#allocation9 + $0x2ac] ss:$16 sps:$4 sm:$0xff]  }
 0x2e3   :  { %v3871_v51 = vadd.f32 %v3870_v60, %v3827_v53  ;;  %v7516_v53 = vld [vmem:[#allocation9 + $0x40c] ss:$16 sps:$4 sm:$0xff]  }
 0x2e4   :  { %v3872_v21 = vpop.f32.mrf.mxu1  ;;  %v7519_v60 = vld [vmem:[#allocation9 + $0x28c] ss:$16 sps:$4 sm:$0xff]  }
 0x2e5   :  { %5829 = vmatpush1.bf16.msra.mxu0 %v7394_v61  ;;  %v3873_v27 = vadd.f32 %v3872_v21, %v3829_v12  ;;  %v4045_v61 = vrot.slane %v8062_v10, %v4044_v20  ;;  %v7522_v12 = vld [vmem:[#allocation9 + $0x5ec] ss:$16 sps:$4 sm:$0xff]  }
 0x2e6   :  { %5830 = vmatprep.subr.bf16.mxu0 %v7399_v33  ;;  %v7525_v21 = vld [vmem:[#allocation9 + $0x26c] ss:$16 sps:$4 sm:$0xff]  }
 0x2e7   :  { %v7534_v20 = vld [vmem:[#allocation9 + $0x5ac] ss:$16 sps:$4 sm:$0xff]  }
 0x2e9   :  { %5831 = vmatpush1.bf16.msra.mxu0 %v7397_v0 }
 0x2ea   :  { %5832 = vmatprep.subr.bf16.mxu0 %v7402_v36 }
 0x2ed   :  { %5833 = vmatpush1.bf16.msra.mxu0 %v7400_v62  ;;  %v4041_v62 = vrot.slane %v8062_v10, %v4040_v50  ;;  %v7496_v10 = vld [vmem:[#allocation9 + $0x468] ss:$16 sps:$4 sm:$0xff]  }
 0x2ee   :  { %5834 = vmatprep.subr.bf16.mxu0 %v7408_v16  ;;  %v7532_v50 = vld [vmem:[#allocation9 + $0x5a8] ss:$16 sps:$4 sm:$0xff]  }
 0x2f1   :  { %5835 = vmatpush1.bf16.msra.mxu0 %v7406_v34  ;;  %v7492_v34 = vld [vmem:[#allocation9 + $0x48c] ss:$16 sps:$4 sm:$0xff]  }
 0x2f2   :  { %5836 = vmatprep.subr.bf16.mxu0 %v7414_v3 }
 0x2f5   :  { %5837 = vmatpush1.bf16.msra.mxu0 %v7412_v48 }
 0x2f6   :  { %5838 = vmatprep.subr.bf16.mxu0 %v7420_v4 }
 0x2f9   :  { %5839 = vmatpush1.bf16.msra.mxu0 %v7418_v5 }
 0x2fa   :  { %5840 = vmatprep.subr.bf16.mxu0 %v7426_v8 }
 0x2fd   :  { %5841 = vmatpush2.bf16.msra.mxu0 %v7424_v18 }
 0x2fe   :  { %5842 = vmatprep.subr.bf16.mxu0 %v7432_v22  ;;  %v7490_v22 = vld [vmem:[#allocation9 + $0x488] ss:$16 sps:$4 sm:$0xff]  }
 0x301   :  { %5843 = vmatpush2.bf16.msra.mxu0 %v7430_v9 }
 0x302   :  { %5844 = vmatprep.subr.bf16.mxu0 %v7438_v11  ;;  %v7498_v11 = vld [vmem:[#allocation9 + $0x46c] ss:$16 sps:$4 sm:$0xff]  }
 0x305   :  { %5845 = vmatpush2.bf16.msra.mxu0 %v7436_v38 }
 0x306   :  { %5846 = vmatprep.subr.bf16.mxu0 %v7444_v15 }
 0x309   :  { %5847 = vmatpush2.bf16.msra.mxu0 %v7442_v26 }
 0x30a   :  { %5848 = vmatprep.subr.bf16.mxu0 %v7450_v7 }
 0x30d   :  { %5849 = vmatpush2.bf16.msra.mxu0 %v7448_v29 }
 0x30e   :  { %5850 = vmatprep.subr.bf16.mxu0 %v7456_v54  ;;  %v7504_v54 = vld [vmem:[#allocation9 + $0x44c] ss:$16 sps:$4 sm:$0xff]  }
 0x311   :  { %5851 = vmatpush2.bf16.msra.mxu0 %v7454_v55 }
 0x312   :  { %5852 = vmatprep.subr.bf16.mxu0 %v7462_v31 }
 0x315   :  { %5853 = vmatpush2.bf16.msra.mxu0 %v7460_v17  ;;  %v7502_v17 = vld [vmem:[#allocation9 + $0x448] ss:$16 sps:$4 sm:$0xff]  }
 0x316   :  { %5854 = vmatprep.subr.bf16.mxu0 %v7468_v39  ;;  %v7505_v39 = vld [vmem:[#allocation9 + $0x2c8] ss:$16 sps:$4 sm:$0xff]  }
 0x319   :  { %5855 = vmatpush2.bf16.msra.mxu0 %v7466_v41  ;;  %v7508_v41 = vld [vmem:[#allocation9 + $0x428] ss:$16 sps:$4 sm:$0xff]  }
 0x31a   :  { %5910 = vmatprep.subr.bf16.mxu0 %v7474_v32  ;;  %v7511_v32 = vld [vmem:[#allocation9 + $0x2a8] ss:$16 sps:$4 sm:$0xff]  }
 0x31c   :  { %v3909_v13 = vpop.f32.mrf.mxu0  ;;  %5857 = vmatmul.mubr.bf16.vlgmr.msra.gmra.mxu0 %v8010_v23 }
 0x31d   :  { %5911 = vmatpush1.bf16.msra.mxu0 %v7472_v25  ;;  %5942 = vmatprep.mubr.bf16.mxu0 %v8100_v49  ;;  %v3910_v6 = vadd.f32 %v3909_v13, %v3867_v43  ;;  %v7484_v49 = vld [vmem:[#allocation9 + $0x4a8] ss:$16 sps:$4 sm:$0xff]   ;;  %v7528_v43 = vld [vmem:[#allocation9 + $0x5cc] ss:$16 sps:$4 sm:$0xff]  }
 0x31e   :  { %v3952_v63 = vpop.f32.mrf.mxu1  ;;  %v3911_v46 = vpop.f32.mrf.mxu0  ;;  %5912 = vmatprep.subr.bf16.mxu0 %v7480_v42  ;;  %v7514_v25 = vld [vmem:[#allocation9 + $0x408] ss:$16 sps:$4 sm:$0xff]  }
 0x31f   :  { %v3912_v47 = vadd.f32 %v3911_v46, %v3869_v58  ;;  %v3953_v36 = vadd.f32 %v3952_v63, %v3910_v6  ;;  %v7517_v42 = vld [vmem:[#allocation9 + $0x288] ss:$16 sps:$4 sm:$0xff]   ;;  %v7531_v58 = vld [vmem:[#allocation9 + $0x24c] ss:$16 sps:$4 sm:$0xff]  }
 0x320   :  { %v3954_v57 = vpop.f32.mrf.mxu1  ;;  %v3913_v24 = vpop.f32.mrf.mxu0  ;;  %v7523_v13 = vld [vmem:[#allocation9 + $0x268] ss:$16 sps:$4 sm:$0xff]   ;;  %v7537_v6 = vld [vmem:[#allocation9 + $0x22c] ss:$16 sps:$4 sm:$0xff]  }
 0x321   :  { %v3955_v23 = vadd.f32 %v3954_v57, %v3912_v47  ;;  %v3914_v33 = vadd.f32 %v3913_v24, %v3871_v51  ;;  %5913 = vmatpush1.bf16.msra.mxu0 %v7478_v45  ;;  %v4060_v9 = vadd.f32 %v4041_v62, %v3953_v36  ;;  %v7526_v63 = vld [vmem:[#allocation9 + $0x5c8] ss:$16 sps:$4 sm:$0xff]   ;;  %v7540_v46 = vld [vmem:[#allocation9 + $0x58c] ss:$16 sps:$4 sm:$0xff]  }
 0x322   :  { %v3956_v0 = vpop.f32.mrf.mxu1  ;;  %v3915_v16 = vpop.f32.mrf.mxu0  ;;  %5914 = vmatprep.subr.bf16.mxu0 %v7486_v2  ;;  %v7529_v45 = vld [vmem:[#allocation9 + $0x248] ss:$16 sps:$4 sm:$0xff]   ;;  %v7543_v51 = vld [vmem:[#allocation9 + $0x20c] ss:$16 sps:$4 sm:$0xff]  }
 0x323   :  { %v3957_v3 = vadd.f32 %v3956_v0, %v3914_v33  ;;  %v3916_v48 = vadd.f32 %v3915_v16, %v3873_v27  ;;  %v4061_v5 = vadd.f32 %v4045_v61, %v3955_v23  ;;  %v4076_v29 = vmax.f32 %v4060_v9, 0.0  ;;  %v7535_v2 = vld [vmem:[#allocation9 + $0x228] ss:$16 sps:$4 sm:$0xff]   ;;  %v7546_v57 = vld [vmem:[#allocation9 + $0x56c] ss:$16 sps:$4 sm:$0xff]  }
 0x324   :  { %v3958_v4 = vpop.f32.mrf.mxu1  ;;  %v7538_v47 = vld [vmem:[#allocation9 + $0x588] ss:$16 sps:$4 sm:$0xff]   ;;  %v7549_v27 = vld [vmem:[#allocation9 + $0x3ec] ss:$16 sps:$4 sm:$0xff]  }
 0x325   :  { %v4068_v8 = vadd.f32 %v4041_v62, %v3957_v3  ;;  %v3959_v18 = vadd.f32 %v3958_v4, %v3916_v48  ;;  %5915 = vmatpush1.bf16.msra.mxu0 %v7484_v49  ;;  %v4077_v26 = vmax.f32 %v4061_v5, 0.0  ;;  %v7541_v24 = vld [vmem:[#allocation9 + $0x208] ss:$16 sps:$4 sm:$0xff]   ;;  %v7555_v0 = vld [vmem:[#allocation9 + $0x3cc] ss:$16 sps:$4 sm:$0xff]  }
 0x326   :  { %5916 = vmatprep.subr.bf16.mxu0 %v7492_v34  ;;  %v7544_v23 = vld [vmem:[#allocation9 + $0x568] ss:$16 sps:$4 sm:$0xff]   ;;  %v7558_v36 = vld [vmem:[#allocation9 + $0x52c] ss:$16 sps:$4 sm:$0xff]  }
 0x327   :  { %v4069_v38 = vadd.f32 %v4045_v61, %v3959_v18  ;;  %v4084_v15 = vmax.f32 %v4068_v8, 0.0  ;;  %v7552_v61 = vld [vmem:[#allocation9 + $0x54c] ss:$16 sps:$4 sm:$0xff]   ;;  %v7547_v33 = vld [vmem:[#allocation9 + $0x3e8] ss:$16 sps:$4 sm:$0xff]  }
 0x328   :  { %v7550_v49 = vld [vmem:[#allocation9 + $0x548] ss:$16 sps:$4 sm:$0xff]   ;;  %v7561_v16 = vld [vmem:[#allocation9 + $0x3ac] ss:$16 sps:$4 sm:$0xff]  }
 0x329   :  { %v4085_v7 = vmax.f32 %v4069_v38, 0.0  ;;  %5917 = vmatpush1.bf16.msra.mxu0 %v7490_v22  ;;  %v8125_v31 = vpack.c.bf16 %v4084_v15, %v4076_v29  ;;  %v7553_v62 = vld [vmem:[#allocation9 + $0x3c8] ss:$16 sps:$4 sm:$0xff]   ;;  %v7564_v3 = vld [vmem:[#allocation9 + $0x50c] ss:$16 sps:$4 sm:$0xff]  }
 0x32a   :  { %5918 = vmatprep.subr.bf16.mxu0 %v7498_v11  ;;  %v7556_v34 = vld [vmem:[#allocation9 + $0x528] ss:$16 sps:$4 sm:$0xff]   ;;  %v7567_v4 = vld [vmem:[#allocation9 + $0x38c] ss:$16 sps:$4 sm:$0xff]  }
 0x32b   :  { %v8123_v55 = vpack.c.bf16 %v4085_v7, %v4077_v26  ;;  %v7559_v48 = vld [vmem:[#allocation9 + $0x3a8] ss:$16 sps:$4 sm:$0xff]   ;;  %v7570_v18 = vld [vmem:[#allocation9 + $0x36c] ss:$16 sps:$4 sm:$0xff]  }
 0x32c   :  { %v7562_v5 = vld [vmem:[#allocation9 + $0x508] ss:$16 sps:$4 sm:$0xff]   ;;  %v7573_v9 = vld [vmem:[#allocation9 + $0x34c] ss:$16 sps:$4 sm:$0xff]  }
 0x32d   :  { %5813 = vmatprep.mubr.bf16.mxu1 %v8123_v55  ;;  %5919 = vmatpush1.bf16.msra.mxu0 %v7496_v10  ;;  %v7565_v8 = vld [vmem:[#allocation9 + $0x388] ss:$16 sps:$4 sm:$0xff]   ;;  %v7628_v11 = vld [vmem:[#allocation12 + $0x78] sm:$0xff]  }
 0x32e   :  { %5814 = vmatmul.mubr.bf16.vlgmr.msra.gmra.mxu1 %v8125_v31  ;;  %5920 = vmatprep.subr.bf16.mxu0 %v7504_v54  ;;  %v7568_v22 = vld [vmem:[#allocation9 + $0x368] ss:$16 sps:$4 sm:$0xff]   ;;  %v7629_v38 = vld [vmem:[#allocation12 + $0x38] sm:$0xff]   ;;  %v7632_v54 = vld [vmem:[#allocation12 + $0x68] sm:$0xff]  }
 0x32f   :  { %5868 = vmatpush1.bf16.msra.mxu1 %v7499_v30  ;;  %5899 = vmatprep.mubr.bf16.mxu1 %v8076_v44  ;;  %v7520_v44 = vld [vmem:[#allocation9 + $0x5e8] ss:$16 sps:$4 sm:$0xff]   ;;  %v7576_v26 = vld [vmem:[#allocation9 + $0x32c] ss:$16 sps:$4 sm:$0xff]  }
 0x330   :  { %5869 = vmatprep.subr.bf16.mxu1 %v7507_v59  ;;  %v7571_v15 = vld [vmem:[#allocation9 + $0x348] ss:$16 sps:$4 sm:$0xff]   ;;  %v7633_v30 = vld [vmem:[#allocation12 + $0x28] sm:$0xff]  }
 0x331   :  { %5921 = vmatpush1.bf16.msra.mxu0 %v7502_v17  ;;  %v7630_v7 = vld [vmem:[#allocation12 + $0x70] sm:$0xff]   ;;  %v7634_v59 = vld [vmem:[#allocation12 + $0x60] sm:$0xff]  }
 0x332   :  { %5922 = vmatprep.subr.bf16.mxu0 %v7510_v35  ;;  %v7631_v10 = vld [vmem:[#allocation12 + $0x30] sm:$0xff]   ;;  %v7635_v35 = vld [vmem:[#allocation12 + $0x20] sm:$0xff]  }
 0x333   :  { %5870 = vmatpush1.bf16.msra.mxu1 %v7505_v39  ;;  %v7574_v29 = vld [vmem:[#allocation9 + $0x328] ss:$16 sps:$4 sm:$0xff]   ;;  %v7582_v39 = vld [vmem:[#allocation9 + $0x6ec] ss:$16 sps:$4 sm:$0xff]  }
 0x334   :  { %5871 = vmatprep.subr.bf16.mxu1 %v7513_v40  ;;  %v7577_v17 = vld [vmem:[#allocation9 + $0x308] ss:$16 sps:$4 sm:$0xff]   ;;  %v7636_v40 = vld [vmem:[#allocation12 + $0x58] sm:$0xff]  }
 0x335   :  { %5923 = vmatpush1.bf16.msra.mxu0 %v7508_v41  ;;  %v7580_v41 = vld [vmem:[#allocation9 + $0x6e8] ss:$16 sps:$4 sm:$0xff]  }
 0x336   :  { %5924 = vmatprep.subr.bf16.mxu0 %v7516_v53  ;;  %v7585_v53 = vld [vmem:[#allocation9 + $0x6cc] ss:$16 sps:$4 sm:$0xff]  }
 0x337   :  { %5872 = vmatpush1.bf16.msra.mxu1 %v7511_v32  ;;  %v7637_v32 = vld [vmem:[#allocation12 + $0x18] sm:$0xff]  }
 0x338   :  { %5873 = vmatprep.subr.bf16.mxu1 %v7519_v60  ;;  %v7583_v60 = vld [vmem:[#allocation9 + $0x6c8] ss:$16 sps:$4 sm:$0xff]  }
 0x339   :  { %5925 = vmatpush1.bf16.msra.mxu0 %v7514_v25  ;;  %v7588_v25 = vld [vmem:[#allocation9 + $0x6ac] ss:$16 sps:$4 sm:$0xff]  }
 0x33a   :  { %5926 = vmatprep.subr.bf16.mxu0 %v7522_v12  ;;  %v7638_v12 = vld [vmem:[#allocation12 + $0x50] sm:$0xff]  }
 0x33b   :  { %5874 = vmatpush1.bf16.msra.mxu1 %v7517_v42  ;;  %v7639_v42 = vld [vmem:[#allocation12 + $0x10] sm:$0xff]  }
 0x33c   :  { %5875 = vmatprep.subr.bf16.mxu1 %v7525_v21  ;;  %v7586_v21 = vld [vmem:[#allocation9 + $0x6a8] ss:$16 sps:$4 sm:$0xff]  }
 0x33d   :  { %5927 = vmatpush2.bf16.msra.mxu0 %v7520_v44  ;;  %v7591_v44 = vld [vmem:[#allocation9 + $0x68c] ss:$16 sps:$4 sm:$0xff]  }
 0x33e   :  { %5928 = vmatprep.subr.bf16.mxu0 %v7528_v43  ;;  %v7640_v43 = vld [vmem:[#allocation12 + $0x48] sm:$0xff]  }
 0x33f   :  { %5876 = vmatpush1.bf16.msra.mxu1 %v7523_v13  ;;  %v7641_v13 = vld [vmem:[#allocation12 + $0x8] sm:$0xff]  }
 0x340   :  { %5877 = vmatprep.subr.bf16.mxu1 %v7531_v58  ;;  %v7594_v58 = vld [vmem:[#allocation9 + $0x66c] ss:$16 sps:$4 sm:$0xff]  }
 0x341   :  { %5929 = vmatpush2.bf16.msra.mxu0 %v7526_v63  ;;  %v7643_v63 = vld [vmem:[#allocation12] sm:$0xff]  }
 0x342   :  { %5930 = vmatprep.subr.bf16.mxu0 %v7534_v20  ;;  %v7592_v20 = vld [vmem:[#allocation9 + $0x668] ss:$16 sps:$4 sm:$0xff]  }
 0x343   :  { %5878 = vmatpush1.bf16.msra.mxu1 %v7529_v45  ;;  %v7597_v45 = vld [vmem:[#allocation9 + $0x64c] ss:$16 sps:$4 sm:$0xff]  }
 0x344   :  { %5879 = vmatprep.subr.bf16.mxu1 %v7537_v6  ;;  %v7595_v6 = vld [vmem:[#allocation9 + $0x648] ss:$16 sps:$4 sm:$0xff]  }
 0x345   :  { %5931 = vmatpush2.bf16.msra.mxu0 %v7532_v50  ;;  %v7600_v50 = vld [vmem:[#allocation9 + $0x62c] ss:$16 sps:$4 sm:$0xff]  }
 0x346   :  { %5932 = vmatprep.subr.bf16.mxu0 %v7540_v46  ;;  %v7598_v46 = vld [vmem:[#allocation9 + $0x628] ss:$16 sps:$4 sm:$0xff]  }
 0x347   :  { %5880 = vmatpush1.bf16.msra.mxu1 %v7535_v2  ;;  %v7603_v2 = vld [vmem:[#allocation9 + $0x60c] ss:$16 sps:$4 sm:$0xff]  }
 0x348   :  { %5881 = vmatprep.subr.bf16.mxu1 %v7543_v51  ;;  %v7601_v51 = vld [vmem:[#allocation9 + $0x608] ss:$16 sps:$4 sm:$0xff]  }
 0x349   :  { %5933 = vmatpush2.bf16.msra.mxu0 %v7538_v47  ;;  %v7606_v47 = vld [vmem:[#allocation9 + $0x7ec] ss:$16 sps:$4 sm:$0xff]  }
 0x34a   :  { %5934 = vmatprep.subr.bf16.mxu0 %v7546_v57  ;;  %v7604_v57 = vld [vmem:[#allocation9 + $0x7e8] ss:$16 sps:$4 sm:$0xff]  }
 0x34b   :  { %5882 = vmatpush1.bf16.msra.mxu1 %v7541_v24  ;;  %v7609_v24 = vld [vmem:[#allocation9 + $0x7cc] ss:$16 sps:$4 sm:$0xff]  }
 0x34c   :  { %5883 = vmatprep.subr.bf16.mxu1 %v7549_v27  ;;  %v7607_v27 = vld [vmem:[#allocation9 + $0x7c8] ss:$16 sps:$4 sm:$0xff]  }
 0x34d   :  { %5935 = vmatpush2.bf16.msra.mxu0 %v7544_v23  ;;  %v7612_v23 = vld [vmem:[#allocation9 + $0x7ac] ss:$16 sps:$4 sm:$0xff]  }
 0x34e   :  { %5936 = vmatprep.subr.bf16.mxu0 %v7552_v61  ;;  %v7610_v61 = vld [vmem:[#allocation9 + $0x7a8] ss:$16 sps:$4 sm:$0xff]  }
 0x34f   :  { %5884 = vmatpush2.bf16.msra.mxu1 %v7547_v33  ;;  %v7615_v33 = vld [vmem:[#allocation9 + $0x78c] ss:$16 sps:$4 sm:$0xff]  }
 0x350   :  { %5885 = vmatprep.subr.bf16.mxu1 %v7555_v0  ;;  %v7613_v0 = vld [vmem:[#allocation9 + $0x788] ss:$16 sps:$4 sm:$0xff]  }
 0x351   :  { %5937 = vmatpush2.bf16.msra.mxu0 %v7550_v49  ;;  %v7618_v49 = vld [vmem:[#allocation9 + $0x76c] ss:$16 sps:$4 sm:$0xff]  }
 0x352   :  { %5938 = vmatprep.subr.bf16.mxu0 %v7558_v36  ;;  %v7616_v36 = vld [vmem:[#allocation9 + $0x768] ss:$16 sps:$4 sm:$0xff]  }
 0x353   :  { %5886 = vmatpush2.bf16.msra.mxu1 %v7553_v62  ;;  %v7621_v62 = vld [vmem:[#allocation9 + $0x74c] ss:$16 sps:$4 sm:$0xff]  }
 0x354   :  { %5887 = vmatprep.subr.bf16.mxu1 %v7561_v16  ;;  %v7619_v16 = vld [vmem:[#allocation9 + $0x748] ss:$16 sps:$4 sm:$0xff]  }
 0x355   :  { %5939 = vmatpush2.bf16.msra.mxu0 %v7556_v34  ;;  %v7624_v34 = vld [vmem:[#allocation9 + $0x72c] ss:$16 sps:$4 sm:$0xff]  }
 0x356   :  { %5940 = vmatprep.subr.bf16.mxu0 %v7564_v3  ;;  %v7622_v3 = vld [vmem:[#allocation9 + $0x728] ss:$16 sps:$4 sm:$0xff]  }
 0x357   :  { %5888 = vmatpush2.bf16.msra.mxu1 %v7559_v48  ;;  %v7627_v48 = vld [vmem:[#allocation9 + $0x70c] ss:$16 sps:$4 sm:$0xff]  }
 0x358   :  { %5889 = vmatprep.subr.bf16.mxu1 %v7567_v4  ;;  %v7625_v4 = vld [vmem:[#allocation9 + $0x708] ss:$16 sps:$4 sm:$0xff]  }
 0x359   :  { %5941 = vmatpush2.bf16.msra.mxu0 %v7562_v5  ;;  %v7644_v5 = vld [vmem:[#allocation12 + $0xf8] sm:$0xff]  }
 0x35a   :  { %7184 = vmatprep.subr.bf16.mxu0 %v7628_v11  ;;  %v7649_v11 = vld [vmem:[#allocation12 + $0xa8] sm:$0xff]  }
 0x35b   :  { %5890 = vmatpush2.bf16.msra.mxu1 %v7565_v8  ;;  %v7645_v8 = vld [vmem:[#allocation12 + $0xb8] sm:$0xff]  }
 0x35c   :  { %5943 = vmatmul.mubr.bf16.vlgmr.msra.gmra.mxu0 %v8113_v56  ;;  %5891 = vmatprep.subr.bf16.mxu1 %v7570_v18  ;;  %v7579_v56 = vld [vmem:[#allocation9 + $0x30c] ss:$16 sps:$4 sm:$0xff]   ;;  %v7646_v18 = vld [vmem:[#allocation12 + $0xf0] sm:$0xff]  }
 0x35d   :  { %7185 = vmatpush3.bf16.msra.mxu0 %v7629_v38  ;;  %v7650_v38 = vld [vmem:[#allocation12 + $0xe0] sm:$0xff]  }
 0x35e   :  { %7186 = vmatprep.subr.bf16.mxu0 %v7630_v7  ;;  %v7653_v7 = vld [vmem:[#allocation12 + $0x98] sm:$0xff]  }
 0x35f   :  { %5892 = vmatpush2.bf16.msra.mxu1 %v7568_v22  ;;  %v7647_v22 = vld [vmem:[#allocation12 + $0xb0] sm:$0xff]  }
 0x360   :  { %5893 = vmatprep.subr.bf16.mxu1 %v7573_v9  ;;  %v7648_v9 = vld [vmem:[#allocation12 + $0xe8] sm:$0xff]  }
 0x361   :  { %7187 = vmatpush3.bf16.msra.mxu0 %v7631_v10 }
 0x362   :  { %7188 = vmatprep.subr.bf16.mxu0 %v7632_v54  ;;  %v5729_v54 = vpop.f32.mrf.mxu1 }
 0x363   :  { %5894 = vmatpush2.bf16.msra.mxu1 %v7571_v15  ;;  %v7651_v15 = vld [vmem:[#allocation12 + $0xa0] sm:$0xff]  }
 0x364   :  { %5895 = vmatprep.subr.bf16.mxu1 %v7576_v26  ;;  %v7652_v26 = vld [vmem:[#allocation12 + $0xd8] sm:$0xff]  }
 0x365   :  { %7189 = vmatpush3.bf16.msra.mxu0 %v7633_v30 }
 0x366   :  { %7190 = vmatprep.subr.bf16.mxu0 %v7634_v59 }
 0x367   :  { %5896 = vmatpush2.bf16.msra.mxu1 %v7574_v29 }
 0x368   :  { %5897 = vmatprep.subr.bf16.mxu1 %v7579_v56  ;;  %v5731_v56 = vpop.f32.mrf.mxu1 }
 0x369   :  { %7191 = vmatpush3.bf16.msra.mxu0 %v7635_v35 }
 0x36a   :  { %7192 = vmatprep.subr.bf16.mxu0 %v7636_v40  ;;  %v5733_v40 = vpop.f32.mrf.mxu1 }
 0x36b   :  { %5898 = vmatpush2.bf16.msra.mxu1 %v7577_v17  ;;  %v4350_v17 = vld [vmem:[#allocation11] sm:$0xf] }
 0x36c   :  { %5953 = vmatprep.subr.bf16.mxu1 %v7582_v39  ;;  %v4359_v35 = vrot.slane %v4350_v17, %v4020_v28  ;;  %v4355_v39 = vrot.slane %v4350_v17, %v4016_v1 }
 0x36d   :  { %7193 = vmatpush3.bf16.msra.mxu0 %v7637_v32 }
 0x36e   :  { %5900 = vmatmul.mubr.bf16.vlgmr.msra.gmra.mxu1 %v8046_v14  ;;  %7194 = vmatprep.subr.bf16.mxu0 %v7638_v12  ;;  %v7589_v14 = vld [vmem:[#allocation9 + $0x688] ss:$16 sps:$4 sm:$0xff]  }
 0x36f   :  { %5954 = vmatpush1.bf16.msra.mxu1 %v7580_v41  ;;  %5985 = vmatprep.mubr.bf16.mxu1 %v8123_v55  ;;  %v7642_v55 = vld [vmem:[#allocation12 + $0x40] sm:$0xff]  }
 0x370   :  { %5955 = vmatprep.subr.bf16.mxu1 %v7585_v53 }
 0x371   :  { %7195 = vmatpush3.bf16.msra.mxu0 %v7639_v42 }
 0x372   :  { %7196 = vmatprep.subr.bf16.mxu0 %v7640_v43 }
 0x373   :  { %5956 = vmatpush1.bf16.msra.mxu1 %v7583_v60 }
 0x374   :  { %5957 = vmatprep.subr.bf16.mxu1 %v7588_v25  ;;  %v5735_v25 = vpop.f32.mrf.mxu1 }
 0x375   :  { %7197 = vmatpush3.bf16.msra.mxu0 %v7641_v13  ;;  %v7654_v13 = vld [vmem:[#allocation12 + $0xd0] sm:$0xff]  }
 0x376   :  { %7198 = vmatprep.subr.bf16.mxu0 %v7642_v55 }
 0x377   :  { %5958 = vmatpush1.bf16.msra.mxu1 %v7586_v21 }
 0x378   :  { %5959 = vmatprep.subr.bf16.mxu1 %v7591_v44 }
 0x379   :  { %7199 = vmatpush3.bf16.msra.mxu0 %v7643_v63  ;;  %v7655_v63 = vld [vmem:[#allocation12 + $0x90] sm:$0xff]  }
 0x37b   :  { %5960 = vmatpush1.bf16.msra.mxu1 %v7589_v14 }
 0x37c   :  { %5961 = vmatprep.subr.bf16.mxu1 %v7594_v58 }
 0x37f   :  { %5962 = vmatpush1.bf16.msra.mxu1 %v7592_v20 }
 0x380   :  { %5963 = vmatprep.subr.bf16.mxu1 %v7597_v45 }
 0x383   :  { %5964 = vmatpush1.bf16.msra.mxu1 %v7595_v6 }
 0x384   :  { %5965 = vmatprep.subr.bf16.mxu1 %v7600_v50 }
 0x387   :  { %5966 = vmatpush1.bf16.msra.mxu1 %v7598_v46 }
 0x388   :  { %5967 = vmatprep.subr.bf16.mxu1 %v7603_v2 }
 0x38b   :  { %5968 = vmatpush1.bf16.msra.mxu1 %v7601_v51  ;;  %v7656_v51 = vld [vmem:[#allocation12 + $0xc8] sm:$0xff]  }
 0x38c   :  { %5969 = vmatprep.subr.bf16.mxu1 %v7606_v47 }
 0x38f   :  { %5970 = vmatpush2.bf16.msra.mxu1 %v7604_v57 }
 0x390   :  { %5971 = vmatprep.subr.bf16.mxu1 %v7609_v24  ;;  %v7657_v24 = vld [vmem:[#allocation12 + $0x88] sm:$0xff]  }
 0x393   :  { %5972 = vmatpush2.bf16.msra.mxu1 %v7607_v27 }
 0x394   :  { %5973 = vmatprep.subr.bf16.mxu1 %v7612_v23 }
 0x397   :  { %5974 = vmatpush2.bf16.msra.mxu1 %v7610_v61 }
 0x398   :  { %5975 = vmatprep.subr.bf16.mxu1 %v7615_v33 }
 0x39b   :  { %5976 = vmatpush2.bf16.msra.mxu1 %v7613_v0  ;;  %v7658_v0 = vld [vmem:[#allocation12 + $0xc0] sm:$0xff]  }
 0x39c   :  { %5977 = vmatprep.subr.bf16.mxu1 %v7618_v49 }
 0x39f   :  { %5978 = vmatpush2.bf16.msra.mxu1 %v7616_v36  ;;  %v7659_v36 = vld [vmem:[#allocation12 + $0x80] sm:$0xff]  }
 0x3a0   :  { %5979 = vmatprep.subr.bf16.mxu1 %v7621_v62 }
 0x3a3   :  { %5980 = vmatpush2.bf16.msra.mxu1 %v7619_v16 }
 0x3a4   :  { %5981 = vmatprep.subr.bf16.mxu1 %v7624_v34 }
 0x3a7   :  { %5982 = vmatpush2.bf16.msra.mxu1 %v7622_v3 }
 0x3a8   :  { %5983 = vmatprep.subr.bf16.mxu1 %v7627_v48 }
 0x3ab   :  { %5984 = vmatpush2.bf16.msra.mxu1 %v7625_v4 }
 0x3ac   :  { %7206 = vmatprep.subr.bf16.mxu1 %v7644_v5 }
 0x3ae   :  { %5986 = vmatmul.mubr.bf16.vlgmr.msra.gmra.mxu1 %v8125_v31  ;;  %v5686_v31 = vpop.f32.mrf.mxu0 }
 0x3af   :  { %7207 = vmatpush3.bf16.msra.mxu1 %v7645_v8  ;;  %v5687_v60 = vadd.f32 %v5686_v31, %v4355_v39 }
 0x3b0   :  { %7208 = vmatprep.subr.bf16.mxu1 %v7646_v18  ;;  %v5688_v10 = vpop.f32.mrf.mxu0 }
 0x3b1   :  { %v5689_v53 = vadd.f32 %v5688_v10, %v4359_v35  ;;  %v5730_v14 = vadd.f32 %v5729_v54, %v5687_v60 }
 0x3b2   :  { %v5690_v29 = vpop.f32.mrf.mxu0 }
 0x3b3   :  { %7209 = vmatpush3.bf16.msra.mxu1 %v7647_v22  ;;  %v5691_v32 = vadd.f32 %v5690_v29, %v4355_v39  ;;  %v5732_v44 = vadd.f32 %v5731_v56, %v5689_v53  ;;  %v4367_v22 = vrot.slane %v4350_v17, %v4028_v37 }
 0x3b4   :  { %7210 = vmatprep.subr.bf16.mxu1 %v7648_v9  ;;  %v5692_v30 = vpop.f32.mrf.mxu0  ;;  %v4363_v9 = vrot.slane %v4350_v17, %v4024_v19 }
 0x3b5   :  { %v5693_v42 = vadd.f32 %v5692_v30, %v4359_v35  ;;  %v5734_v43 = vadd.f32 %v5733_v40, %v5691_v32 }
 0x3b6   :  { %v5772_v59 = vpop.f32.mrf.mxu0 }
 0x3b7   :  { %7211 = vmatpush3.bf16.msra.mxu1 %v7649_v11  ;;  %v5736_v28 = vadd.f32 %v5735_v25, %v5693_v42  ;;  %v5773_v1 = vadd.f32 %v5772_v59, %v5730_v14 }
 0x3b8   :  { %7212 = vmatprep.subr.bf16.mxu1 %v7650_v38  ;;  %v5774_v41 = vpop.f32.mrf.mxu0 }
 0x3b9   :  { %v5775_v20 = vadd.f32 %v5774_v41, %v5732_v44 }
 0x3ba   :  { %v5776_v12 = vpop.f32.mrf.mxu0 }
 0x3bb   :  { %7213 = vmatpush3.bf16.msra.mxu1 %v7651_v15  ;;  %v5777_v45 = vadd.f32 %v5776_v12, %v5734_v43 }
 0x3bc   :  { %7214 = vmatprep.subr.bf16.mxu1 %v7652_v26  ;;  %v5778_v58 = vpop.f32.mrf.mxu0 }
 0x3bd   :  { %v5779_v50 = vadd.f32 %v5778_v58, %v5736_v28 }
 0x3bf   :  { %7215 = vmatpush3.bf16.msra.mxu1 %v7653_v7 }
 0x3c0   :  { %7216 = vmatprep.subr.bf16.mxu1 %v7654_v13 }
 0x3c3   :  { %7217 = vmatpush3.bf16.msra.mxu1 %v7655_v63 }
 0x3c4   :  { %7218 = vmatprep.subr.bf16.mxu1 %v7656_v51 }
 0x3c7   :  { %7219 = vmatpush3.bf16.msra.mxu1 %v7657_v24 }
 0x3c8   :  { %7220 = vmatprep.subr.bf16.mxu1 %v7658_v0 }
 0x3cb   :  { %7221 = vmatpush3.bf16.msra.mxu1 %v7659_v36 }
 0x3dc   :  { %v5858_v34 = vpop.f32.mrf.mxu0 }
 0x3dd   :  { %v5859_v7 = vadd.f32 %v5858_v34, %v4363_v9 }
 0x3de   :  { %v5860_v3 = vpop.f32.mrf.mxu0 }
 0x3df   :  { %v5861_v15 = vadd.f32 %v5860_v3, %v4367_v22 }
 0x3e0   :  { %v5862_v48 = vpop.f32.mrf.mxu0 }
 0x3e1   :  { %v5863_v26 = vadd.f32 %v5862_v48, %v4363_v9 }
 0x3e2   :  { %v5864_v5 = vpop.f32.mrf.mxu0 }
 0x3e3   :  { %v5865_v10 = vadd.f32 %v5864_v5, %v4367_v22 }
 0x3ee   :  { %v5815_v21 = vpop.f32.mrf.mxu1 }
 0x3ef   :  { %v5816_v47 = vadd.f32 %v5815_v21, %v5773_v1 }
 0x3f0   :  { %v5817_v55 = vpop.f32.mrf.mxu1 }
 0x3f1   :  { %v5818_v46 = vadd.f32 %v5817_v55, %v5775_v20  ;;  %v5996_v49 = vmax.f32 %v5816_v47, 0.0  ;;  %v7151_v20 = vld [vmem:[#allocation14] ss:$0 sm:$0xff] }
 0x3f2   :  { %v5819_v6 = vpop.f32.mrf.mxu1 }
 0x3f3   :  { %v5820_v2 = vadd.f32 %v5819_v6, %v5777_v45  ;;  %v5997_v61 = vmax.f32 %v5818_v46, 0.0 }
 0x3f4   :  { %v5821_v57 = vpop.f32.mrf.mxu1 }
 0x3f5   :  { %v5822_v27 = vadd.f32 %v5821_v57, %v5779_v50  ;;  %v6000_v23 = vmax.f32 %v5820_v2, 0.0 }
 0x3f7   :  { %v6001_v33 = vmax.f32 %v5822_v27, 0.0  ;;  %v6004_v16 = vpack.c.bf16 %v6000_v23, %v5996_v49 }
 0x3f9   :  { %v6005_v62 = vpack.c.bf16 %v6001_v33, %v5997_v61 }
 0x3fb   :  { %6303 = vmatprep.mubr.bf16.mxu0 %v6005_v62 }
 0x3fc   :  { %6304 = vmatmul.mubr.bf16.vlgmr.msra.gmra.mxu0 %v6004_v16 }
 0x41c   :  { %v5944_v18 = vpop.f32.mrf.mxu0 }
 0x41e   :  { %v5946_v38 = vpop.f32.mrf.mxu0 }
 0x420   :  { %v5948_v30 = vpop.f32.mrf.mxu0 }
 0x422   :  { %v5950_v37 = vpop.f32.mrf.mxu0 }
 0x42e   :  { %v5901_v4 = vpop.f32.mrf.mxu1 }
 0x42f   :  { %v5902_v56 = vadd.f32 %v5901_v4, %v5859_v7 }
 0x430   :  { %v5903_v8 = vpop.f32.mrf.mxu1 }
 0x431   :  { %v5904_v29 = vadd.f32 %v5903_v8, %v5861_v15  ;;  %v5945_v53 = vadd.f32 %v5944_v18, %v5902_v56 }
 0x432   :  { %v5905_v11 = vpop.f32.mrf.mxu1 }
 0x433   :  { %v5906_v54 = vadd.f32 %v5905_v11, %v5863_v26  ;;  %v5947_v40 = vadd.f32 %v5946_v38, %v5904_v29 }
 0x434   :  { %v5907_v31 = vpop.f32.mrf.mxu1 }
 0x435   :  { %v5908_v35 = vadd.f32 %v5907_v31, %v5865_v10  ;;  %v5949_v41 = vadd.f32 %v5948_v30, %v5906_v54 }
 0x437   :  { %v5951_v32 = vadd.f32 %v5950_v37, %v5908_v35 }
 0x46e   :  { %v5987_v59 = vpop.f32.mrf.mxu1 }
 0x46f   :  { %v5988_v60 = vadd.f32 %v5987_v59, %v5945_v53 }
 0x470   :  { %v5989_v39 = vpop.f32.mrf.mxu1 }
 0x471   :  { %v5990_v19 = vadd.f32 %v5989_v39, %v5947_v40  ;;  %v5998_v43 = vmax.f32 %v5988_v60, 0.0 }
 0x472   :  { %v5991_v52 = vpop.f32.mrf.mxu1 }
 0x473   :  { %v5992_v17 = vadd.f32 %v5991_v52, %v5949_v41  ;;  %v5999_v21 = vmax.f32 %v5990_v19, 0.0 }
 0x474   :  { %v5993_v25 = vpop.f32.mrf.mxu1 }
 0x475   :  { %v5994_v12 = vadd.f32 %v5993_v25, %v5951_v32  ;;  %v6002_v42 = vmax.f32 %v5992_v17, 0.0 }
 0x477   :  { %v6003_v44 = vmax.f32 %v5994_v12, 0.0  ;;  %v6006_v14 = vpack.c.bf16 %v6002_v42, %v5998_v43 }
 0x479   :  { %v6007_v13 = vpack.c.bf16 %v6003_v44, %v5999_v21 }
 0x47b   :  { %6344 = vmatprep.mubr.bf16.mxu1 %v6007_v13 }
 0x47c   :  { %6345 = vmatmul.mubr.bf16.vlgmr.msra.gmra.mxu1 %v6006_v14 }
 0x4bc   :  { %v7200_v58 = vpop.f32.mrf.mxu0 }
 0x4be   :  { %v7201_v55 = vpop.f32.mrf.mxu0 }
 0x4bf   :  { %v7202_v28 = vadd.f32 %v7201_v55, %v7200_v58 }
 0x4c0   :  { %v7203_v63 = vpop.f32.mrf.mxu0 }
 0x4c1   :  { %v6306_v50 = vadd.f32 %v7202_v28, %v7151_v20 }
 0x4c2   :  { %v7204_v45 = vpop.f32.mrf.mxu0 }
 0x4c3   :  { %v7205_v46 = vadd.f32 %v7204_v45, %v7203_v63 }
 0x4c5   :  { %v6309_v24 = vadd.f32 %v7205_v46, %v7151_v20 }
 0x53c   :  { %v7222_v1 = vpop.f32.mrf.mxu1 }
 0x53e   :  { %v7223_v6 = vpop.f32.mrf.mxu1 }
 0x53f   :  { %v7224_v2 = vadd.f32 %v7223_v6, %v7222_v1 }
 0x540   :  { %v7225_v51 = vpop.f32.mrf.mxu1 }
 0x541   :  { %v6347_v47 = vadd.f32 %v7224_v2, %v6306_v50 }
 0x542   :  { %v7226_v57 = vpop.f32.mrf.mxu1 }
 0x543   :  { %6353 = vst [vmem:[#allocation15] sm:$0xff] %v6347_v47  ;;  %v7227_v27 = vadd.f32 %v7226_v57, %v7225_v51 }
 0x545   :  { %v6350_v23 = vadd.f32 %v7227_v27, %v6309_v24 }
 0x547   :  { %6354 = vst [vmem:[#allocation15 + $0x8] sm:$0xff] %v6350_v23 }
 0x548   :  { %7812 = shalt.err (!%p7809_p11)
}
 0x549   :  { %s7845_s16 = smov 128   ;;  %s7846_s17 = smov 8  }
 0x54a   :  { %6366 = dma.vmem_to_hbm [thread:$0]  %s6361_s6, 256, %s8152_s7, [#allocation5], %s7845_s16, %s7845_s16, %s7846_s17  }
 0x54b   :  { %7829 = dma.done.wait [#allocation5], 256  }
 0x54c   :  { %7830 = vsyncadd [#allocation5], 4294967040 }
 0x54d   :  { %6370 = vsyncpa [#allocation4], 1 }
 0x54e   :  { %6371 = vsyncpa [#allocation7], 1 }
 0x54f   :  { %6372 = vsyncpa [#allocation10], 1 }
 0x550   :  { %6373 = vsyncpa [#allocation13], 1 }
 0x551   :  { %6374 = vsyncpa [#allocation5], 1 }

</bundles_post_ra>
